<compile_context>
chip_gen: v5e
topology: v5e:2x2
jax: 0.10.0
libtpu: 0.0.40
codegen_flags: <defaults>
</compile_context>

<pallas_src>
import math
import functools
import numpy as np
import jax
import jax.numpy as jnp
from jax.experimental import pallas as pl
from jax.experimental.pallas import tpu as pltpu  # noqa: F401  (TPU backend)

# ----------------------------------------------------------------------------
# configuration (small synthetic sizes consistent with the module)
# ----------------------------------------------------------------------------
CONFIG = dict(emb_size=32, hidden1=64, hidden2=48, hidden3=32, n_head=4,
              n_view=2, mask_p=0.3, temperature=0.5, n_sample=2,
              attention_dropout=0.0, dropout=0.0)
D_RNA, D_ATAC, BATCH = 48, 40, 4
RIDGE_LAMBDA = 1.0
LANE = 128  # lane width of the packed parameter slabs


# ----------------------------------------------------------------------------
# in-kernel helpers
# ----------------------------------------------------------------------------
_LANCZOS_G = 7.0
_LANCZOS_COEF = (0.99999999999980993, 676.5203681218851, -1259.1392167224028,
                 771.32342877765313, -176.61502916214059, 12.507343278686905,
                 -0.13857109526572012, 9.9843695780195716e-6, 1.5056327351493116e-7)


def _recip(x):
    # EUP reciprocal (approx) -- frees the VALU on the long ZINB chain.
    return pl.reciprocal(x, approx=True)


def _lgamma_pos(z):
    # TODO(synk): torch.lgamma has no direct Mosaic lowering; Lanczos
    # approximation (valid for the strictly positive arguments used here).
    zm1 = z - 1.0
    x = jnp.full_like(z, _LANCZOS_COEF[0])
    for i in range(1, 9):
        x = x + _LANCZOS_COEF[i] * _recip(zm1 + float(i))
    t = zm1 + _LANCZOS_G + 0.5
    return 0.5 * math.log(2.0 * math.pi) + (zm1 + 0.5) * jnp.log(t) - t + jnp.log(x)


def _nan2inf(x):
    return jnp.where(x != x, jnp.inf, x)


def _sigmoid(x):
    return _recip(1.0 + jnp.exp(-x))


# ----------------------------------------------------------------------------
# parameter-slab layout (static, computed in Python)
# ----------------------------------------------------------------------------
def _modality_layout(d, cfg):
    """Order, (row_offset, in_dim, out_dim, bias_row) per linear layer."""
    E, H1, H2, H3 = cfg['emb_size'], cfg['hidden1'], cfg['hidden2'], cfg['hidden3']
    layout = [('enc0', d, H1), ('enc1', H1, H2), ('enc2', H2, H3), ('enc3', H3, E),
              ('dec0', E, H3), ('dec1', H3, H2), ('dec2', H2, H1), ('dec3', H1, d),
              ('pi', d, d), ('disp', d, d), ('mean', d, d),
              ('mha_in', E, 3 * E), ('mha_out', E, E),
              ('ffn0', E, 4 * E), ('ffn1', 4 * E, E)]
    offs, r = {}, 0
    for i, (name, din, dout) in enumerate(layout):
        assert dout <= LANE
        offs[name] = (r, din, dout, i)
        r += ((din + 7) // 8) * 8          # 8-aligned row blocks
    return layout, offs, r


# ----------------------------------------------------------------------------
# the single fused kernel
# ----------------------------------------------------------------------------
def _fused_kernel(dr_ref, da_ref, wr_ref, br_ref, wa_ref, ba_ref, fw_ref, fd_ref,
                  out_ref, *, B, V, E, H, dims, M, inv_t, offs_rna, offs_atac):
    f32 = jnp.float32

    # ------------------------------------------------------------------
    # per-modality pretrain_ZINB_AE_att forward + its MSE / ZINB losses
    # ------------------------------------------------------------------
    def modality(data_ref, w_ref, b_ref, offs, dim):
        def lin(x, name, relu=False):
            r, din, dout, br = offs[name]
            y = (jnp.dot(x, w_ref[r:r + din, 0:dout], preferred_element_type=f32)
                 + b_ref[br:br + 1, 0:dout])
            return jnp.maximum(y, 0.0) if relu else y

        x_all = data_ref[0:(V + 1) * B, :]          # [masked views ; original]
        raw = data_ref[(V + 1) * B:(V + 2) * B, :]  # raw counts
        sf = data_ref[(V + 2) * B:(V + 3) * B, :]   # scale factor (pre-broadcast)

        # encoder over all rows in one matmul chain
        h = x_all
        for name in ('enc0', 'enc1', 'enc2', 'enc3'):
            h = lin(h, name, relu=True)
        emb_ds = h[:V * B]                          # (V*B, E)  view-major rows
        emb_d = h[V * B:]                           # (B, E)

        # --- multi-head self-attention over the V views of each sample -----
        # same-sample mask built in-kernel from iota (no tiny mask DMA).
        # TODO(synk): averaged attention weights of nn.MultiheadAttention are
        # discarded by the caller, so they are not computed here.
        qkv = lin(emb_ds, 'mha_in')                 # (V*B, 3E)
        hd = E // H
        scale = 1.0 / math.sqrt(hd)
        ri = jax.lax.broadcasted_iota(jnp.int32, (V * B, V * B), 0)
        ci = jax.lax.broadcasted_iota(jnp.int32, (V * B, V * B), 1)
        bias = jnp.where((ri % B) == (ci % B), 0.0, -1e30).astype(f32)
        heads = []
        for hh in range(H):
            q_h = qkv[:, hh * hd:(hh + 1) * hd]
            k_h = qkv[:, E + hh * hd:E + (hh + 1) * hd]
            v_h = qkv[:, 2 * E + hh * hd:2 * E + (hh + 1) * hd]
            s = jax.lax.dot_general(q_h, k_h, (((1,), (1,)), ((), ())),
                                    preferred_element_type=f32) * scale + bias
            s = s - jnp.max(s, axis=-1, keepdims=True)
            p = jnp.exp(s)
            p = p * _recip(jnp.sum(p, axis=-1, keepdims=True))
            heads.append(jnp.dot(p, v_h, preferred_element_type=f32))
        o_cat = jnp.concatenate(heads, axis=1)      # (V*B, E) head concat
        att_out = lin(o_cat, 'mha_out')             # single out-projection matmul

        # --- AdaptiveMaxPool1d(1) over the view axis (static sublane slices)
        pooled = att_out[0:B]
        for vv in range(1, V):
            pooled = jnp.maximum(pooled, att_out[vv * B:(vv + 1) * B])

        # --- FFN ------------------------------------------------------------
        att_emb = lin(lin(pooled, 'ffn0', relu=True), 'ffn1')   # (B, E)

        # --- MSELoss(att_emb, emb_d) -----------------------------------------
        dlt = att_emb - emb_d
        mse = jnp.sum(jnp.sum(dlt * dlt, axis=1, keepdims=True),
                      axis=0, keepdims=True) * (1.0 / float(B * E))

        # --- decoder + pi/disp/mean heads -------------------------------------
        g = emb_d
        for name in ('dec0', 'dec1', 'dec2', 'dec3'):
            g = lin(g, name, relu=True)
        # NOTE: double sigmoid reproduces torch (Sequential(Linear, Sigmoid)
        # followed by torch.sigmoid) faithfully.
        pi = _sigmoid(_sigmoid(lin(g, 'pi')))
        theta = jnp.clip(lin(g, 'disp'), 1e-4, 1e4)                # DispAct
        mean = jnp.clip(jnp.exp(lin(g, 'mean')), 1e-5, 1e6)        # MeanAct
        out = mean * sf                                            # scale_factor

        # --- ZINB(pi, theta, raw, out, ridge_lambda=1.0) ----------------------
        eps = 1e-8
        y_true = raw
        y_pred = jnp.maximum(out, 0.0)
        yt = jnp.maximum(y_true, 1e-4)
        th = jnp.minimum(theta, 1e6)
        t1 = (_lgamma_pos(th + eps) + _lgamma_pos(yt + 1.0)
              - _lgamma_pos(yt + th + eps))
        t2 = ((th + yt) * jnp.log(1.0 + y_pred * _recip(th + eps))
              + yt * (jnp.log(th + eps) - jnp.log(y_pred + eps)))
        nb_case = _nan2inf(t1 + t2) - jnp.log(1.0 - pi + eps)
        ratio = th * _recip(th + y_pred + eps)
        zero_nb = jnp.exp(th * jnp.log(ratio))                     # pow(ratio, theta)
        zero_case = -jnp.log(pi + (1.0 - pi) * zero_nb + eps)
        res = jnp.where(y_true < 1e-8, zero_case, nb_case) + RIDGE_LAMBDA * pi * pi
        zinb = jnp.sum(jnp.sum(res, axis=1, keepdims=True),
                       axis=0, keepdims=True) * (1.0 / float(B * dim))
        zinb = _nan2inf(zinb)
        return emb_d, zinb, mse

    zr0, zinb_r, mse_r = modality(dr_ref, wr_ref, br_ref, offs_rna, dims[0])
    za0, zinb_a, mse_a = modality(da_ref, wa_ref, ba_ref, offs_atac, dims[1])

    # ------------------------------------------------------------------
    # fusion: cross-attention + LayerNorm + ITC + ITM + returned embedding
    # ------------------------------------------------------------------
    lng_r = fw_ref[0:1, 0:E]
    lnb_r = fw_ref[1:2, 0:E]
    lng_a = fw_ref[2:3, 0:E]
    lnb_a = fw_ref[3:4, 0:E]
    b10 = fw_ref[4:5, 0:E]
    b11 = fw_ref[5:6, 0:E]
    b2 = fw_ref[6:7, 0:2]
    w10 = fw_ref[8:8 + 2 * E, 0:E]
    w11 = fw_ref[8 + 2 * E:8 + 3 * E, 0:E]
    w2 = fw_ref[8 + 3 * E:8 + 4 * E, 0:2]

    xscale = 1.0 / math.sqrt(E)                     # Attention: / sqrt(q.shape[1])

    def xattn(qm, km):
        s = jax.lax.dot_general(qm, km, (((1,), (1,)), ((), ())),
                                preferred_element_type=f32) * xscale
        s = s - jnp.max(s, axis=-1, keepdims=True)
        p = jnp.exp(s)
        p = p * _recip(jnp.sum(p, axis=-1, keepdims=True))
        return jnp.dot(p, km, preferred_element_type=f32)

    def layernorm(x, gw, bw):
        mu = jnp.mean(x, axis=-1, keepdims=True)
        var = jnp.mean((x - mu) * (x - mu), axis=-1, keepdims=True)
        return (x - mu) * jax.lax.rsqrt(var + 1e-5) * gw + bw

    zr = layernorm(zr0 + xattn(zr0, za0), lng_r, lnb_r)
    za = layernorm(za0 + xattn(za0, zr0), lng_a, lnb_a)

    # --- ITC (CLIP-style) loss ------------------------------------------------
    neps = 1e-12
    rn = zr * _recip(jnp.maximum(jnp.sqrt(jnp.sum(zr * zr, axis=1, keepdims=True)), neps))
    an = za * _recip(jnp.maximum(jnp.sqrt(jnp.sum(za * za, axis=1, keepdims=True)), neps))
    logits = jax.lax.dot_general(rn, an, (((1,), (1,)), ((), ())),
                                 preferred_element_type=f32) * inv_t
    rmax = jnp.max(logits, axis=1, keepdims=True)
    rlse = jnp.log(jnp.sum(jnp.exp(logits - rmax), axis=1, keepdims=True)) + rmax
    cmax = jnp.max(logits, axis=0, keepdims=True)
    clse = jnp.log(jnp.sum(jnp.exp(logits - cmax), axis=0, keepdims=True)) + cmax
    rib = jax.lax.broadcasted_iota(jnp.int32, (B, B), 0)
    cib = jax.lax.broadcasted_iota(jnp.int32, (B, B), 1)
    diag = jnp.sum(jnp.where(rib == cib, logits, 0.0), axis=1, keepdims=True)
    itc = ((jnp.sum(rlse, axis=0, keepdims=True)
            + jnp.sum(clse, axis=1, keepdims=True)) * (1.0 / (2.0 * B))
           - jnp.sum(diag, axis=0, keepdims=True) * (1.0 / float(B)))

    # --- shared fc1 chain (concat realised as split matmuls) -------------------
    w10_r = w10[:E, :]
    w10_a = w10[E:, :]

    def fc1_chain(xr, xa):
        h0 = jnp.maximum(jnp.dot(xr, w10_r, preferred_element_type=f32)
                         + jnp.dot(xa, w10_a, preferred_element_type=f32)
                         + b10, 0.0)
        return jnp.maximum(jnp.dot(h0, w11, preferred_element_type=f32) + b11, 0.0)

    # --- ITM branch on host-precomputed positive/negative pairs ----------------
    g_r = jnp.dot(fd_ref[0:M, 0:B], zr, preferred_element_type=f32)       # gather
    g_a = jnp.dot(fd_ref[0:M, B:2 * B], za, preferred_element_type=f32)
    lab = fd_ref[0:M, 2 * B:2 * B + 2]                                    # one-hot labels
    hh = fc1_chain(g_r, g_a)
    logit2 = jnp.dot(hh, w2, preferred_element_type=f32) + b2             # (M, 2)
    pm = jnp.max(logit2, axis=1, keepdims=True)
    pe = jnp.exp(logit2 - pm)
    pred = pe * _recip(jnp.sum(pe, axis=1, keepdims=True))                # nn.Softmax(dim=1)
    # NOTE: the torch module applies F.cross_entropy ON TOP of the softmaxed
    # probabilities; this is reproduced faithfully (do not "fix").
    qm = jnp.max(pred, axis=1, keepdims=True)
    lse = jnp.log(jnp.sum(jnp.exp(pred - qm), axis=1, keepdims=True)) + qm
    pick = jnp.sum(lab * pred, axis=1, keepdims=True)
    itm = jnp.sum(lse - pick, axis=0, keepdims=True) * (1.0 / float(M))

    # --- returned embedding z (torch.no_grad branch; its softmax pred is
    # discarded by the module and therefore not computed) -----------------------
    z = fc1_chain(zr, za)                                                 # (B, E)

    # --- single lane-dense (8, 128) output slab --------------------------------
    lane = jax.lax.broadcasted_iota(jnp.int32, (1, LANE), 1)
    loss_row = (jnp.where(lane == 0, zinb_r, 0.0) + jnp.where(lane == 1, zinb_a, 0.0)
                + jnp.where(lane == 2, mse_r, 0.0) + jnp.where(lane == 3, mse_a, 0.0)
                + jnp.where(lane == 4, itc, 0.0) + jnp.where(lane == 5, itm, 0.0))
    z_pad = jnp.concatenate([z, jnp.zeros((B, LANE - E), f32)], axis=1)
    out_ref[...] = jnp.concatenate(
        [z_pad, loss_row, jnp.zeros((8 - B - 1, LANE), f32)], axis=0)


# ----------------------------------------------------------------------------
# pallas_call wrapper (single launch for the whole forward)
# ----------------------------------------------------------------------------
def contrastive_forward(wr, br, wa, ba, fw, fdata,
                        rna, atac, rna_s, atac_s, rna_raw, atac_raw, mask_key,
                        *, cfg, offs_rna, offs_atac, d_rna, d_atac, M):
    B = rna.shape[0]
    V, E, H = cfg['n_view'], cfg['emb_size'], cfg['n_head']
    k_r, k_a = jax.random.split(mask_key)

    # generate_mask_view: random column masks (view-major rows), done in JAX,
    # then packed with raw counts + broadcast scale factors into one data slab.
    def data_slab(d, raw, s, dim, k):
        keep = (jax.random.uniform(k, (V, dim)) >= cfg['mask_p']).astype(jnp.float32)
        ds = (d[None, :, :] * keep[:, None, :]).reshape(V * B, dim)
        sfb = jnp.broadcast_to(s.reshape(B, 1).astype(jnp.float32), (B, dim))
        return jnp.concatenate([ds, d, raw.astype(jnp.float32), sfb], axis=0)

    dr = data_slab(rna, rna_raw, rna_s, d_rna, k_r)       # ((V+3)*B, d_rna)
    da = data_slab(atac, atac_raw, atac_s, d_atac, k_a)   # ((V+3)*B, d_atac)

    inputs = [dr, da, wr, br, wa, ba, fw, fdata]
    out = pl.pallas_call(
        functools.partial(_fused_kernel, B=B, V=V, E=E, H=H,
                          dims=(d_rna, d_atac), M=M,
                          inv_t=1.0 / float(cfg['temperature']),
                          offs_rna=offs_rna, offs_atac=offs_atac),
        grid=(1,),
        in_specs=[pl.BlockSpec(a.shape, lambda i: (0, 0)) for a in inputs],
        out_specs=pl.BlockSpec((8, LANE), lambda i: (0, 0)),
        out_shape=jax.ShapeDtypeStruct((8, LANE), jnp.float32),
    )(*inputs)

    z = out[:B, :E]
    # order matches torch: (z_loss1, z_loss2, mse_loss1, mse_loss2, itc, itm, z)
    return out[B, 0], out[B, 1], out[B, 2], out[B, 3], out[B, 4], out[B, 5], z


# ----------------------------------------------------------------------------
# parameter init (deterministic, torch-like uniform fan-in init)
# ----------------------------------------------------------------------------
def _init_linear(key, fan_in, fan_out):
    kw, kb = jax.random.split(key)
    bound = 1.0 / math.sqrt(fan_in)
    w = jax.random.uniform(kw, (fan_in, fan_out), jnp.float32, -bound, bound)
    b = jax.random.uniform(kb, (1, fan_out), jnp.float32, -bound, bound)
    return w, b


def init_pretrain(key, d, cfg):
    E = cfg['emb_size']
    dims = [d, cfg['hidden1'], cfg['hidden2'], cfg['hidden3'], E]
    rdims = dims[::-1]
    k = jax.random.split(key, 15)
    return dict(
        enc=[_init_linear(k[i], dims[i], dims[i + 1]) for i in range(4)],
        dec=[_init_linear(k[4 + i], rdims[i], rdims[i + 1]) for i in range(4)],
        pi=_init_linear(k[8], d, d),
        disp=_init_linear(k[9], d, d),
        mean=_init_linear(k[10], d, d),
        mha_in=_init_linear(k[11], E, 3 * E),
        mha_out=_init_linear(k[12], E, E),
        ffn=[_init_linear(k[13], E, 4 * E), _init_linear(k[14], 4 * E, E)],
    )


def init_model(key, d_rna, d_atac, cfg):
    E = cfg['emb_size']
    k = jax.random.split(key, 5)
    return dict(
        rnaAE=init_pretrain(k[0], d_rna, cfg),
        atacAE=init_pretrain(k[1], d_atac, cfg),
        fc1=[_init_linear(k[2], 2 * E, E), _init_linear(k[3], E, E)],
        fc2=_init_linear(k[4], E, 2),
        norm_rna=(jnp.ones((1, E), jnp.float32), jnp.zeros((1, E), jnp.float32)),
        norm_atac=(jnp.ones((1, E), jnp.float32), jnp.zeros((1, E), jnp.float32)),
    )


# ----------------------------------------------------------------------------
# host-side parameter packing into (8,128)-friendly slabs (done once)
# ----------------------------------------------------------------------------
def pack_modality_params(p, d, cfg):
    layout, offs, total_rows = _modality_layout(d, cfg)
    named = {
        'enc0': p['enc'][0], 'enc1': p['enc'][1], 'enc2': p['enc'][2], 'enc3': p['enc'][3],
        'dec0': p['dec'][0], 'dec1': p['dec'][1], 'dec2': p['dec'][2], 'dec3': p['dec'][3],
        'pi': p['pi'], 'disp': p['disp'], 'mean': p['mean'],
        'mha_in': p['mha_in'], 'mha_out': p['mha_out'],
        'ffn0': p['ffn'][0], 'ffn1': p['ffn'][1],
    }
    w_slab = np.zeros((total_rows, LANE), np.float32)
    nb = ((len(layout) + 7) // 8) * 8
    b_slab = np.zeros((nb, LANE), np.float32)
    for name, din, dout in layout:
        r, _, _, bi = offs[name]
        w, b = named[name]
        w_slab[r:r + din, :dout] = np.asarray(w)
        b_slab[bi, :dout] = np.asarray(b).reshape(-1)
    return jnp.asarray(w_slab), jnp.asarray(b_slab), offs


def pack_fusion_params(params, cfg):
    E = cfg['emb_size']
    (w10, b10), (w11, b11) = params['fc1']
    w2, b2 = params['fc2']
    lng_r, lnb_r = params['norm_rna']
    lng_a, lnb_a = params['norm_atac']
    slab = np.zeros((8 + 4 * E, E), np.float32)
    slab[0, :E] = np.asarray(lng_r).reshape(-1)
    slab[1, :E] = np.asarray(lnb_r).reshape(-1)
    slab[2, :E] = np.asarray(lng_a).reshape(-1)
    slab[3, :E] = np.asarray(lnb_a).reshape(-1)
    slab[4, :E] = np.asarray(b10).reshape(-1)
    slab[5, :E] = np.asarray(b11).reshape(-1)
    slab[6, :2] = np.asarray(b2).reshape(-1)
    slab[8:8 + 2 * E, :E] = np.asarray(w10)
    slab[8 + 2 * E:8 + 3 * E, :E] = np.asarray(w11)
    slab[8 + 3 * E:8 + 4 * E, :2] = np.asarray(w2)
    return jnp.asarray(slab)


# ----------------------------------------------------------------------------
# host-side negative sampling, hoisted out of the jitted forward
# (one slab: [g_rna one-hot | g_atac one-hot | label one-hot])
# ----------------------------------------------------------------------------
def build_negative_slab(label, n_sample, rng):
    label = np.asarray(label)
    n = label.shape[0]
    rna_idx, atac_idx, new_label = [], [], []
    for index in range(n):
        target = label[index]
        negative_index = [i for i in range(n) if label[i] != target and i != index]
        k = min(n_sample, len(negative_index))
        samples = rng.choice(negative_index, size=k, replace=False) if k > 0 else []
        rna_idx += [index] * (k + 1)
        atac_idx += [index] + [int(s) for s in samples]
        new_label += [1] + [0] * k
    M = len(new_label)
    slab = np.zeros((M, 2 * n + 2), np.float32)
    slab[np.arange(M), np.asarray(rna_idx)] = 1.0
    slab[np.arange(M), n + np.asarray(atac_idx)] = 1.0
    slab[np.arange(M), 2 * n + np.asarray(new_label)] = 1.0
    return jnp.asarray(slab), M


# ----------------------------------------------------------------------------
if __name__ == "__main__":
    cfg = CONFIG
    key = jax.random.PRNGKey(0)
    kp, kd, km = jax.random.split(key, 3)
    params = init_model(kp, D_RNA, D_ATAC, cfg)

    kd = jax.random.split(kd, 6)
    rna = jax.random.normal(kd[0], (BATCH, D_RNA), jnp.float32)
    atac = jax.random.normal(kd[1], (BATCH, D_ATAC), jnp.float32)
    rna_raw = jax.random.poisson(kd[2], 3.0, (BATCH, D_RNA)).astype(jnp.float32)
    atac_raw = jax.random.poisson(kd[3], 3.0, (BATCH, D_ATAC)).astype(jnp.float32)
    rna_s = jax.random.uniform(kd[4], (BATCH,), jnp.float32, 0.5, 2.0)
    atac_s = jax.random.uniform(kd[5], (BATCH,), jnp.float32, 0.5, 2.0)
    label = np.array([0, 1, 0, 1], dtype=np.int32)

    # one-time host-side packing (static layout, done outside jit)
    wr, br, offs_rna = pack_modality_params(params['rnaAE'], D_RNA, cfg)
    wa, ba, offs_atac = pack_modality_params(params['atacAE'], D_ATAC, cfg)
    fw = pack_fusion_params(params, cfg)
    fdata, M = build_negative_slab(label, cfg['n_sample'], np.random.default_rng(0))

    forward = jax.jit(functools.partial(
        contrastive_forward, cfg=cfg, offs_rna=offs_rna, offs_atac=offs_atac,
        d_rna=D_RNA, d_atac=D_ATAC, M=M))

    outs = forward(wr, br, wa, ba, fw, fdata,
                   rna, atac, rna_s, atac_s, rna_raw, atac_raw, km)
    outs = jax.block_until_ready(outs)
    print("KERNEL_OK")
</pallas_src>

<mosaic_0001>
module attributes {stable_mosaic.version = 11 : i64} {
  func.func @_fused_kernel(%arg0: i32, %arg1: memref<20x48xf32, #tpu.memory_space<vmem>>, %arg2: memref<20x40xf32, #tpu.memory_space<vmem>>, %arg3: memref<736x128xf32, #tpu.memory_space<vmem>>, %arg4: memref<16x128xf32, #tpu.memory_space<vmem>>, %arg5: memref<704x128xf32, #tpu.memory_space<vmem>>, %arg6: memref<16x128xf32, #tpu.memory_space<vmem>>, %arg7: memref<136x32xf32, #tpu.memory_space<vmem>>, %arg8: memref<12x10xf32, #tpu.memory_space<vmem>>, %arg9: memref<8x128xf32, #tpu.memory_space<vmem>>) attributes {dimension_semantics = [#tpu.dimension_semantics<arbitrary>], iteration_bounds = array<i64: 1>, scalar_prefetch = 0 : i64, scratch_operands = 0 : i64, tpu.core_type = #tpu.core_type<tc>, window_params = [{pipeline_mode = #tpu.pipeline_mode<synchronous>, transform_indices = @transform_0, window_bounds = array<i64: 20, 48>}, {pipeline_mode = #tpu.pipeline_mode<synchronous>, transform_indices = @transform_1, window_bounds = array<i64: 20, 40>}, {pipeline_mode = #tpu.pipeline_mode<synchronous>, transform_indices = @transform_2, window_bounds = array<i64: 736, 128>}, {pipeline_mode = #tpu.pipeline_mode<synchronous>, transform_indices = @transform_3, window_bounds = array<i64: 16, 128>}, {pipeline_mode = #tpu.pipeline_mode<synchronous>, transform_indices = @transform_4, window_bounds = array<i64: 704, 128>}, {pipeline_mode = #tpu.pipeline_mode<synchronous>, transform_indices = @transform_5, window_bounds = array<i64: 16, 128>}, {pipeline_mode = #tpu.pipeline_mode<synchronous>, transform_indices = @transform_6, window_bounds = array<i64: 136, 32>}, {pipeline_mode = #tpu.pipeline_mode<synchronous>, transform_indices = @transform_7, window_bounds = array<i64: 12, 10>}, {pipeline_mode = #tpu.pipeline_mode<synchronous>, transform_indices = @transform_8, window_bounds = array<i64: 8, 128>}]} {
    %c0 = arith.constant 0 : index
    %c0_0 = arith.constant 0 : index
    %0 = vector.load %arg1[%c0, %c0_0] : memref<20x48xf32, #tpu.memory_space<vmem>>, vector<12x48xf32>
    %c12 = arith.constant 12 : index
    %c0_1 = arith.constant 0 : index
    %1 = vector.load %arg1[%c12, %c0_1] : memref<20x48xf32, #tpu.memory_space<vmem>>, vector<4x48xf32>
    %c16 = arith.constant 16 : index
    %c0_2 = arith.constant 0 : index
    %2 = vector.load %arg1[%c16, %c0_2] : memref<20x48xf32, #tpu.memory_space<vmem>>, vector<4x48xf32>
    %c0_3 = arith.constant 0 : index
    %c0_4 = arith.constant 0 : index
    %3 = vector.load %arg3[%c0_3, %c0_4] : memref<736x128xf32, #tpu.memory_space<vmem>>, vector<48x64xf32>
    %cst = arith.constant dense<0.000000e+00> : vector<12x64xf32>
    %4 = tpu.matmul %0, %3, %cst {dimension_numbers = #tpu.dot_dimension_numbers<[1], [0], [0], [1], [0, 0, 1, 1], [], []>} : vector<12x48xf32>, vector<48x64xf32>, vector<12x64xf32> -> vector<12x64xf32>
    %c0_5 = arith.constant 0 : index
    %c0_6 = arith.constant 0 : index
    %5 = vector.load %arg4[%c0_5, %c0_6] : memref<16x128xf32, #tpu.memory_space<vmem>>, vector<1x64xf32>
    %6 = vector.broadcast %5 : vector<1x64xf32> to vector<12x64xf32>
    %7 = arith.addf %4, %6 : vector<12x64xf32>
    %cst_7 = arith.constant 0.000000e+00 : f32
    %8 = vector.broadcast %cst_7 : f32 to vector<12x64xf32>
    %9 = arith.maximumf %7, %8 : vector<12x64xf32>
    %c48 = arith.constant 48 : index
    %c0_8 = arith.constant 0 : index
    %10 = vector.load %arg3[%c48, %c0_8] : memref<736x128xf32, #tpu.memory_space<vmem>>, vector<64x48xf32>
    %cst_9 = arith.constant dense<0.000000e+00> : vector<12x48xf32>
    %11 = tpu.matmul %9, %10, %cst_9 {dimension_numbers = #tpu.dot_dimension_numbers<[1], [0], [0], [1], [0, 0, 1, 1], [], []>} : vector<12x64xf32>, vector<64x48xf32>, vector<12x48xf32> -> vector<12x48xf32>
    %c1 = arith.constant 1 : index
    %c0_10 = arith.constant 0 : index
    %12 = vector.load %arg4[%c1, %c0_10] : memref<16x128xf32, #tpu.memory_space<vmem>>, vector<1x48xf32>
    %13 = vector.broadcast %12 : vector<1x48xf32> to vector<12x48xf32>
    %14 = arith.addf %11, %13 : vector<12x48xf32>
    %cst_11 = arith.constant 0.000000e+00 : f32
    %15 = vector.broadcast %cst_11 : f32 to vector<12x48xf32>
    %16 = arith.maximumf %14, %15 : vector<12x48xf32>
    %c112 = arith.constant 112 : index
    %c0_12 = arith.constant 0 : index
    %17 = vector.load %arg3[%c112, %c0_12] : memref<736x128xf32, #tpu.memory_space<vmem>>, vector<48x32xf32>
    %cst_13 = arith.constant dense<0.000000e+00> : vector<12x32xf32>
    %18 = tpu.matmul %16, %17, %cst_13 {dimension_numbers = #tpu.dot_dimension_numbers<[1], [0], [0], [1], [0, 0, 1, 1], [], []>} : vector<12x48xf32>, vector<48x32xf32>, vector<12x32xf32> -> vector<12x32xf32>
    %c2 = arith.constant 2 : index
    %c0_14 = arith.constant 0 : index
    %19 = vector.load %arg4[%c2, %c0_14] : memref<16x128xf32, #tpu.memory_space<vmem>>, vector<1x32xf32>
    %20 = vector.broadcast %19 : vector<1x32xf32> to vector<12x32xf32>
    %21 = arith.addf %18, %20 : vector<12x32xf32>
    %cst_15 = arith.constant 0.000000e+00 : f32
    %22 = vector.broadcast %cst_15 : f32 to vector<12x32xf32>
    %23 = arith.maximumf %21, %22 : vector<12x32xf32>
    %c160 = arith.constant 160 : index
    %c0_16 = arith.constant 0 : index
    %24 = vector.load %arg3[%c160, %c0_16] : memref<736x128xf32, #tpu.memory_space<vmem>>, vector<32x32xf32>
    %cst_17 = arith.constant dense<0.000000e+00> : vector<12x32xf32>
    %25 = tpu.matmul %23, %24, %cst_17 {dimension_numbers = #tpu.dot_dimension_numbers<[1], [0], [0], [1], [0, 0, 1, 1], [], []>} : vector<12x32xf32>, vector<32x32xf32>, vector<12x32xf32> -> vector<12x32xf32>
    %c3 = arith.constant 3 : index
    %c0_18 = arith.constant 0 : index
    %26 = vector.load %arg4[%c3, %c0_18] : memref<16x128xf32, #tpu.memory_space<vmem>>, vector<1x32xf32>
    %27 = vector.broadcast %26 : vector<1x32xf32> to vector<12x32xf32>
    %28 = arith.addf %25, %27 : vector<12x32xf32>
    %cst_19 = arith.constant 0.000000e+00 : f32
    %29 = vector.broadcast %cst_19 : f32 to vector<12x32xf32>
    %30 = arith.maximumf %28, %29 : vector<12x32xf32>
    %31 = vector.extract_strided_slice %30 {offsets = [0, 0], sizes = [8, 32], strides = [1, 1]} : vector<12x32xf32> to vector<8x32xf32>
    %32 = vector.extract_strided_slice %30 {offsets = [8, 0], sizes = [4, 32], strides = [1, 1]} : vector<12x32xf32> to vector<4x32xf32>
    %c512 = arith.constant 512 : index
    %c0_20 = arith.constant 0 : index
    %33 = vector.load %arg3[%c512, %c0_20] : memref<736x128xf32, #tpu.memory_space<vmem>>, vector<32x96xf32>
    %cst_21 = arith.constant dense<0.000000e+00> : vector<8x96xf32>
    %34 = tpu.matmul %31, %33, %cst_21 {dimension_numbers = #tpu.dot_dimension_numbers<[1], [0], [0], [1], [0, 0, 1, 1], [], []>} : vector<8x32xf32>, vector<32x96xf32>, vector<8x96xf32> -> vector<8x96xf32>
    %c11 = arith.constant 11 : index
    %c0_22 = arith.constant 0 : index
    %35 = vector.load %arg4[%c11, %c0_22] : memref<16x128xf32, #tpu.memory_space<vmem>>, vector<1x96xf32>
    %36 = vector.broadcast %35 : vector<1x96xf32> to vector<8x96xf32>
    %37 = arith.addf %34, %36 : vector<8x96xf32>
    %38 = tpu.iota {dimensions = array<i32: 0>} : vector<8x8xi32>
    %39 = tpu.iota {dimensions = array<i32: 1>} : vector<8x8xi32>
    %c4_i32 = arith.constant 4 : i32
    %c0_i32 = arith.constant 0 : i32
    %40 = arith.cmpi eq, %c4_i32, %c0_i32 : i32
    %c1_i32 = arith.constant 1 : i32
    %41 = arith.select %40, %c1_i32, %c4_i32 : i32
    %42 = vector.broadcast %41 : i32 to vector<8x8xi32>
    %43 = arith.remsi %38, %42 : vector<8x8xi32>
    %c0_i32_23 = arith.constant 0 : i32
    %44 = vector.broadcast %c0_i32_23 : i32 to vector<8x8xi32>
    %45 = arith.cmpi ne, %43, %44 : vector<8x8xi32>
    %c0_i32_24 = arith.constant 0 : i32
    %46 = vector.broadcast %c0_i32_24 : i32 to vector<8x8xi32>
    %47 = arith.cmpi slt, %43, %46 : vector<8x8xi32>
    %c0_i32_25 = arith.constant 0 : i32
    %48 = arith.cmpi slt, %41, %c0_i32_25 : i32
    %49 = vector.broadcast %48 : i1 to vector<8x8xi1>
    %50 = vector.broadcast %49 : vector<8x8xi1> to vector<8x8xi1>
    %51 = arith.xori %47, %50 : vector<8x8xi1>
    %52 = arith.andi %51, %45 : vector<8x8xi1>
    %53 = vector.broadcast %41 : i32 to vector<8x8xi32>
    %54 = arith.addi %43, %53 : vector<8x8xi32>
    %55 = arith.select %52, %54, %43 : vector<8x8xi1>, vector<8x8xi32>
    %c4_i32_26 = arith.constant 4 : i32
    %c0_i32_27 = arith.constant 0 : i32
    %56 = arith.cmpi eq, %c4_i32_26, %c0_i32_27 : i32
    %c1_i32_28 = arith.constant 1 : i32
    %57 = arith.select %56, %c1_i32_28, %c4_i32_26 : i32
    %58 = vector.broadcast %57 : i32 to vector<8x8xi32>
    %59 = arith.remsi %39, %58 : vector<8x8xi32>
    %c0_i32_29 = arith.constant 0 : i32
    %60 = vector.broadcast %c0_i32_29 : i32 to vector<8x8xi32>
    %61 = arith.cmpi ne, %59, %60 : vector<8x8xi32>
    %c0_i32_30 = arith.constant 0 : i32
    %62 = vector.broadcast %c0_i32_30 : i32 to vector<8x8xi32>
    %63 = arith.cmpi slt, %59, %62 : vector<8x8xi32>
    %c0_i32_31 = arith.constant 0 : i32
    %64 = arith.cmpi slt, %57, %c0_i32_31 : i32
    %65 = vector.broadcast %64 : i1 to vector<8x8xi1>
    %66 = vector.broadcast %65 : vector<8x8xi1> to vector<8x8xi1>
    %67 = arith.xori %63, %66 : vector<8x8xi1>
    %68 = arith.andi %67, %61 : vector<8x8xi1>
    %69 = vector.broadcast %57 : i32 to vector<8x8xi32>
    %70 = arith.addi %59, %69 : vector<8x8xi32>
    %71 = arith.select %68, %70, %59 : vector<8x8xi1>, vector<8x8xi32>
    %72 = arith.cmpi eq, %55, %71 : vector<8x8xi32>
    %cst_32 = arith.constant 0.000000e+00 : f32
    %cst_33 = arith.constant -1.000000e+30 : f32
    %73 = vector.broadcast %cst_32 : f32 to vector<8x8xf32>
    %74 = vector.broadcast %cst_33 : f32 to vector<8x8xf32>
    %75 = arith.select %72, %73, %74 : vector<8x8xi1>, vector<8x8xf32>
    %76 = vector.extract_strided_slice %37 {offsets = [0, 0], sizes = [8, 8], strides = [1, 1]} : vector<8x96xf32> to vector<8x8xf32>
    %77 = vector.extract_strided_slice %37 {offsets = [0, 32], sizes = [8, 8], strides = [1, 1]} : vector<8x96xf32> to vector<8x8xf32>
    %78 = vector.extract_strided_slice %37 {offsets = [0, 64], sizes = [8, 8], strides = [1, 1]} : vector<8x96xf32> to vector<8x8xf32>
    %cst_34 = arith.constant dense<0.000000e+00> : vector<8x8xf32>
    %79 = tpu.matmul %76, %77, %cst_34 {dimension_numbers = #tpu.dot_dimension_numbers<[1], [1], [0], [0], [0, 0, 1, 0], [], []>} : vector<8x8xf32>, vector<8x8xf32>, vector<8x8xf32> -> vector<8x8xf32>
    %cst_35 = arith.constant 0.353553385 : f32
    %80 = vector.broadcast %cst_35 : f32 to vector<8x8xf32>
    %81 = arith.mulf %79, %80 : vector<8x8xf32>
    %82 = arith.addf %81, %75 : vector<8x8xf32>
    %cst_36 = arith.constant dense<0xFF800000> : vector<8xf32>
    %83 = vector.multi_reduction <maximumf>, %82, %cst_36 [1] : vector<8x8xf32> to vector<8xf32>
    %84 = vector.shape_cast %83 : vector<8xf32> to vector<8x1xf32>
    %85 = vector.broadcast %84 : vector<8x1xf32> to vector<8x8xf32>
    %86 = arith.subf %82, %85 : vector<8x8xf32>
    %87 = math.exp %86 : vector<8x8xf32>
    %cst_37 = arith.constant dense<0.000000e+00> : vector<8xf32>
    %88 = vector.multi_reduction <add>, %87, %cst_37 [1] : vector<8x8xf32> to vector<8xf32>
    %89 = vector.shape_cast %88 : vector<8xf32> to vector<8x1xf32>
    %90 = tpu.reciprocal %89 {approx = true} : vector<8x1xf32> -> vector<8x1xf32>
    %91 = vector.broadcast %90 : vector<8x1xf32> to vector<8x8xf32>
    %92 = arith.mulf %87, %91 : vector<8x8xf32>
    %cst_38 = arith.constant dense<0.000000e+00> : vector<8x8xf32>
    %93 = tpu.matmul %92, %78, %cst_38 {dimension_numbers = #tpu.dot_dimension_numbers<[1], [0], [0], [1], [0, 0, 1, 1], [], []>} : vector<8x8xf32>, vector<8x8xf32>, vector<8x8xf32> -> vector<8x8xf32>
    %94 = vector.extract_strided_slice %37 {offsets = [0, 8], sizes = [8, 8], strides = [1, 1]} : vector<8x96xf32> to vector<8x8xf32>
    %95 = vector.extract_strided_slice %37 {offsets = [0, 40], sizes = [8, 8], strides = [1, 1]} : vector<8x96xf32> to vector<8x8xf32>
    %96 = vector.extract_strided_slice %37 {offsets = [0, 72], sizes = [8, 8], strides = [1, 1]} : vector<8x96xf32> to vector<8x8xf32>
    %cst_39 = arith.constant dense<0.000000e+00> : vector<8x8xf32>
    %97 = tpu.matmul %94, %95, %cst_39 {dimension_numbers = #tpu.dot_dimension_numbers<[1], [1], [0], [0], [0, 0, 1, 0], [], []>} : vector<8x8xf32>, vector<8x8xf32>, vector<8x8xf32> -> vector<8x8xf32>
    %cst_40 = arith.constant 0.353553385 : f32
    %98 = vector.broadcast %cst_40 : f32 to vector<8x8xf32>
    %99 = arith.mulf %97, %98 : vector<8x8xf32>
    %100 = arith.addf %99, %75 : vector<8x8xf32>
    %cst_41 = arith.constant dense<0xFF800000> : vector<8xf32>
    %101 = vector.multi_reduction <maximumf>, %100, %cst_41 [1] : vector<8x8xf32> to vector<8xf32>
    %102 = vector.shape_cast %101 : vector<8xf32> to vector<8x1xf32>
    %103 = vector.broadcast %102 : vector<8x1xf32> to vector<8x8xf32>
    %104 = arith.subf %100, %103 : vector<8x8xf32>
    %105 = math.exp %104 : vector<8x8xf32>
    %cst_42 = arith.constant dense<0.000000e+00> : vector<8xf32>
    %106 = vector.multi_reduction <add>, %105, %cst_42 [1] : vector<8x8xf32> to vector<8xf32>
    %107 = vector.shape_cast %106 : vector<8xf32> to vector<8x1xf32>
    %108 = tpu.reciprocal %107 {approx = true} : vector<8x1xf32> -> vector<8x1xf32>
    %109 = vector.broadcast %108 : vector<8x1xf32> to vector<8x8xf32>
    %110 = arith.mulf %105, %109 : vector<8x8xf32>
    %cst_43 = arith.constant dense<0.000000e+00> : vector<8x8xf32>
    %111 = tpu.matmul %110, %96, %cst_43 {dimension_numbers = #tpu.dot_dimension_numbers<[1], [0], [0], [1], [0, 0, 1, 1], [], []>} : vector<8x8xf32>, vector<8x8xf32>, vector<8x8xf32> -> vector<8x8xf32>
    %112 = vector.extract_strided_slice %37 {offsets = [0, 16], sizes = [8, 8], strides = [1, 1]} : vector<8x96xf32> to vector<8x8xf32>
    %113 = vector.extract_strided_slice %37 {offsets = [0, 48], sizes = [8, 8], strides = [1, 1]} : vector<8x96xf32> to vector<8x8xf32>
    %114 = vector.extract_strided_slice %37 {offsets = [0, 80], sizes = [8, 8], strides = [1, 1]} : vector<8x96xf32> to vector<8x8xf32>
    %cst_44 = arith.constant dense<0.000000e+00> : vector<8x8xf32>
    %115 = tpu.matmul %112, %113, %cst_44 {dimension_numbers = #tpu.dot_dimension_numbers<[1], [1], [0], [0], [0, 0, 1, 0], [], []>} : vector<8x8xf32>, vector<8x8xf32>, vector<8x8xf32> -> vector<8x8xf32>
    %cst_45 = arith.constant 0.353553385 : f32
    %116 = vector.broadcast %cst_45 : f32 to vector<8x8xf32>
    %117 = arith.mulf %115, %116 : vector<8x8xf32>
    %118 = arith.addf %117, %75 : vector<8x8xf32>
    %cst_46 = arith.constant dense<0xFF800000> : vector<8xf32>
    %119 = vector.multi_reduction <maximumf>, %118, %cst_46 [1] : vector<8x8xf32> to vector<8xf32>
    %120 = vector.shape_cast %119 : vector<8xf32> to vector<8x1xf32>
    %121 = vector.broadcast %120 : vector<8x1xf32> to vector<8x8xf32>
    %122 = arith.subf %118, %121 : vector<8x8xf32>
    %123 = math.exp %122 : vector<8x8xf32>
    %cst_47 = arith.constant dense<0.000000e+00> : vector<8xf32>
    %124 = vector.multi_reduction <add>, %123, %cst_47 [1] : vector<8x8xf32> to vector<8xf32>
    %125 = vector.shape_cast %124 : vector<8xf32> to vector<8x1xf32>
    %126 = tpu.reciprocal %125 {approx = true} : vector<8x1xf32> -> vector<8x1xf32>
    %127 = vector.broadcast %126 : vector<8x1xf32> to vector<8x8xf32>
    %128 = arith.mulf %123, %127 : vector<8x8xf32>
    %cst_48 = arith.constant dense<0.000000e+00> : vector<8x8xf32>
    %129 = tpu.matmul %128, %114, %cst_48 {dimension_numbers = #tpu.dot_dimension_numbers<[1], [0], [0], [1], [0, 0, 1, 1], [], []>} : vector<8x8xf32>, vector<8x8xf32>, vector<8x8xf32> -> vector<8x8xf32>
    %130 = vector.extract_strided_slice %37 {offsets = [0, 24], sizes = [8, 8], strides = [1, 1]} : vector<8x96xf32> to vector<8x8xf32>
    %131 = vector.extract_strided_slice %37 {offsets = [0, 56], sizes = [8, 8], strides = [1, 1]} : vector<8x96xf32> to vector<8x8xf32>
    %132 = vector.extract_strided_slice %37 {offsets = [0, 88], sizes = [8, 8], strides = [1, 1]} : vector<8x96xf32> to vector<8x8xf32>
    %cst_49 = arith.constant dense<0.000000e+00> : vector<8x8xf32>
    %133 = tpu.matmul %130, %131, %cst_49 {dimension_numbers = #tpu.dot_dimension_numbers<[1], [1], [0], [0], [0, 0, 1, 0], [], []>} : vector<8x8xf32>, vector<8x8xf32>, vector<8x8xf32> -> vector<8x8xf32>
    %cst_50 = arith.constant 0.353553385 : f32
    %134 = vector.broadcast %cst_50 : f32 to vector<8x8xf32>
    %135 = arith.mulf %133, %134 : vector<8x8xf32>
    %136 = arith.addf %135, %75 : vector<8x8xf32>
    %cst_51 = arith.constant dense<0xFF800000> : vector<8xf32>
    %137 = vector.multi_reduction <maximumf>, %136, %cst_51 [1] : vector<8x8xf32> to vector<8xf32>
    %138 = vector.shape_cast %137 : vector<8xf32> to vector<8x1xf32>
    %139 = vector.broadcast %138 : vector<8x1xf32> to vector<8x8xf32>
    %140 = arith.subf %136, %139 : vector<8x8xf32>
    %141 = math.exp %140 : vector<8x8xf32>
    %cst_52 = arith.constant dense<0.000000e+00> : vector<8xf32>
    %142 = vector.multi_reduction <add>, %141, %cst_52 [1] : vector<8x8xf32> to vector<8xf32>
    %143 = vector.shape_cast %142 : vector<8xf32> to vector<8x1xf32>
    %144 = tpu.reciprocal %143 {approx = true} : vector<8x1xf32> -> vector<8x1xf32>
    %145 = vector.broadcast %144 : vector<8x1xf32> to vector<8x8xf32>
    %146 = arith.mulf %141, %145 : vector<8x8xf32>
    %cst_53 = arith.constant dense<0.000000e+00> : vector<8x8xf32>
    %147 = tpu.matmul %146, %132, %cst_53 {dimension_numbers = #tpu.dot_dimension_numbers<[1], [0], [0], [1], [0, 0, 1, 1], [], []>} : vector<8x8xf32>, vector<8x8xf32>, vector<8x8xf32> -> vector<8x8xf32>
    %148 = tpu.concatenate %93, %111, %129, %147 in 1 : vector<8x8xf32>, vector<8x8xf32>, vector<8x8xf32>, vector<8x8xf32> -> vector<8x32xf32>
    %c544 = arith.constant 544 : index
    %c0_54 = arith.constant 0 : index
    %149 = vector.load %arg3[%c544, %c0_54] : memref<736x128xf32, #tpu.memory_space<vmem>>, vector<32x32xf32>
    %cst_55 = arith.constant dense<0.000000e+00> : vector<8x32xf32>
    %150 = tpu.matmul %148, %149, %cst_55 {dimension_numbers = #tpu.dot_dimension_numbers<[1], [0], [0], [1], [0, 0, 1, 1], [], []>} : vector<8x32xf32>, vector<32x32xf32>, vector<8x32xf32> -> vector<8x32xf32>
    %c12_56 = arith.constant 12 : index
    %c0_57 = arith.constant 0 : index
    %151 = vector.load %arg4[%c12_56, %c0_57] : memref<16x128xf32, #tpu.memory_space<vmem>>, vector<1x32xf32>
    %152 = vector.broadcast %151 : vector<1x32xf32> to vector<8x32xf32>
    %153 = arith.addf %150, %152 : vector<8x32xf32>
    %154 = vector.extract_strided_slice %153 {offsets = [0, 0], sizes = [4, 32], strides = [1, 1]} : vector<8x32xf32> to vector<4x32xf32>
    %155 = vector.extract_strided_slice %153 {offsets = [4, 0], sizes = [4, 32], strides = [1, 1]} : vector<8x32xf32> to vector<4x32xf32>
    %156 = arith.maximumf %154, %155 : vector<4x32xf32>
    %c576 = arith.constant 576 : index
    %c0_58 = arith.constant 0 : index
    %157 = vector.load %arg3[%c576, %c0_58] : memref<736x128xf32, #tpu.memory_space<vmem>>, vector<32x128xf32>
    %cst_59 = arith.constant dense<0.000000e+00> : vector<4x128xf32>
    %158 = tpu.matmul %156, %157, %cst_59 {dimension_numbers = #tpu.dot_dimension_numbers<[1], [0], [0], [1], [0, 0, 1, 1], [], []>} : vector<4x32xf32>, vector<32x128xf32>, vector<4x128xf32> -> vector<4x128xf32>
    %c13 = arith.constant 13 : index
    %c0_60 = arith.constant 0 : index
    %159 = vector.load %arg4[%c13, %c0_60] : memref<16x128xf32, #tpu.memory_space<vmem>>, vector<1x128xf32>
    %160 = vector.broadcast %159 : vector<1x128xf32> to vector<4x128xf32>
    %161 = arith.addf %158, %160 : vector<4x128xf32>
    %cst_61 = arith.constant 0.000000e+00 : f32
    %162 = vector.broadcast %cst_61 : f32 to vector<4x128xf32>
    %163 = arith.maximumf %161, %162 : vector<4x128xf32>
    %c608 = arith.constant 608 : index
    %c0_62 = arith.constant 0 : index
    %164 = vector.load %arg3[%c608, %c0_62] : memref<736x128xf32, #tpu.memory_space<vmem>>, vector<128x32xf32>
    %cst_63 = arith.constant dense<0.000000e+00> : vector<4x32xf32>
    %165 = tpu.matmul %163, %164, %cst_63 {dimension_numbers = #tpu.dot_dimension_numbers<[1], [0], [0], [1], [0, 0, 1, 1], [], []>} : vector<4x128xf32>, vector<128x32xf32>, vector<4x32xf32> -> vector<4x32xf32>
    %c14 = arith.constant 14 : index
    %c0_64 = arith.constant 0 : index
    %166 = vector.load %arg4[%c14, %c0_64] : memref<16x128xf32, #tpu.memory_space<vmem>>, vector<1x32xf32>
    %167 = vector.broadcast %166 : vector<1x32xf32> to vector<4x32xf32>
    %168 = arith.addf %165, %167 : vector<4x32xf32>
    %169 = arith.subf %168, %32 : vector<4x32xf32>
    %170 = arith.mulf %169, %169 : vector<4x32xf32>
    %cst_65 = arith.constant dense<0.000000e+00> : vector<4xf32>
    %171 = vector.multi_reduction <add>, %170, %cst_65 [1] : vector<4x32xf32> to vector<4xf32>
    %172 = vector.shape_cast %171 : vector<4xf32> to vector<4x1xf32>
    %cst_66 = arith.constant dense<0.000000e+00> : vector<1xf32>
    %173 = vector.multi_reduction <add>, %172, %cst_66 [0] : vector<4x1xf32> to vector<1xf32>
    %174 = vector.shape_cast %173 : vector<1xf32> to vector<1x1xf32>
    %cst_67 = arith.constant 7.812500e-03 : f32
    %175 = vector.broadcast %cst_67 : f32 to vector<1x1xf32>
    %176 = arith.mulf %174, %175 : vector<1x1xf32>
    %c192 = arith.constant 192 : index
    %c0_68 = arith.constant 0 : index
    %177 = vector.load %arg3[%c192, %c0_68] : memref<736x128xf32, #tpu.memory_space<vmem>>, vector<32x32xf32>
    %cst_69 = arith.constant dense<0.000000e+00> : vector<4x32xf32>
    %178 = tpu.matmul %32, %177, %cst_69 {dimension_numbers = #tpu.dot_dimension_numbers<[1], [0], [0], [1], [0, 0, 1, 1], [], []>} : vector<4x32xf32>, vector<32x32xf32>, vector<4x32xf32> -> vector<4x32xf32>
    %c4 = arith.constant 4 : index
    %c0_70 = arith.constant 0 : index
    %179 = vector.load %arg4[%c4, %c0_70] : memref<16x128xf32, #tpu.memory_space<vmem>>, vector<1x32xf32>
    %180 = vector.broadcast %179 : vector<1x32xf32> to vector<4x32xf32>
    %181 = arith.addf %178, %180 : vector<4x32xf32>
    %cst_71 = arith.constant 0.000000e+00 : f32
    %182 = vector.broadcast %cst_71 : f32 to vector<4x32xf32>
    %183 = arith.maximumf %181, %182 : vector<4x32xf32>
    %c224 = arith.constant 224 : index
    %c0_72 = arith.constant 0 : index
    %184 = vector.load %arg3[%c224, %c0_72] : memref<736x128xf32, #tpu.memory_space<vmem>>, vector<32x48xf32>
    %cst_73 = arith.constant dense<0.000000e+00> : vector<4x48xf32>
    %185 = tpu.matmul %183, %184, %cst_73 {dimension_numbers = #tpu.dot_dimension_numbers<[1], [0], [0], [1], [0, 0, 1, 1], [], []>} : vector<4x32xf32>, vector<32x48xf32>, vector<4x48xf32> -> vector<4x48xf32>
    %c5 = arith.constant 5 : index
    %c0_74 = arith.constant 0 : index
    %186 = vector.load %arg4[%c5, %c0_74] : memref<16x128xf32, #tpu.memory_space<vmem>>, vector<1x48xf32>
    %187 = vector.broadcast %186 : vector<1x48xf32> to vector<4x48xf32>
    %188 = arith.addf %185, %187 : vector<4x48xf32>
    %cst_75 = arith.constant 0.000000e+00 : f32
    %189 = vector.broadcast %cst_75 : f32 to vector<4x48xf32>
    %190 = arith.maximumf %188, %189 : vector<4x48xf32>
    %c256 = arith.constant 256 : index
    %c0_76 = arith.constant 0 : index
    %191 = vector.load %arg3[%c256, %c0_76] : memref<736x128xf32, #tpu.memory_space<vmem>>, vector<48x64xf32>
    %cst_77 = arith.constant dense<0.000000e+00> : vector<4x64xf32>
    %192 = tpu.matmul %190, %191, %cst_77 {dimension_numbers = #tpu.dot_dimension_numbers<[1], [0], [0], [1], [0, 0, 1, 1], [], []>} : vector<4x48xf32>, vector<48x64xf32>, vector<4x64xf32> -> vector<4x64xf32>
    %c6 = arith.constant 6 : index
    %c0_78 = arith.constant 0 : index
    %193 = vector.load %arg4[%c6, %c0_78] : memref<16x128xf32, #tpu.memory_space<vmem>>, vector<1x64xf32>
    %194 = vector.broadcast %193 : vector<1x64xf32> to vector<4x64xf32>
    %195 = arith.addf %192, %194 : vector<4x64xf32>
    %cst_79 = arith.constant 0.000000e+00 : f32
    %196 = vector.broadcast %cst_79 : f32 to vector<4x64xf32>
    %197 = arith.maximumf %195, %196 : vector<4x64xf32>
    %c304 = arith.constant 304 : index
    %c0_80 = arith.constant 0 : index
    %198 = vector.load %arg3[%c304, %c0_80] : memref<736x128xf32, #tpu.memory_space<vmem>>, vector<64x48xf32>
    %cst_81 = arith.constant dense<0.000000e+00> : vector<4x48xf32>
    %199 = tpu.matmul %197, %198, %cst_81 {dimension_numbers = #tpu.dot_dimension_numbers<[1], [0], [0], [1], [0, 0, 1, 1], [], []>} : vector<4x64xf32>, vector<64x48xf32>, vector<4x48xf32> -> vector<4x48xf32>
    %c7 = arith.constant 7 : index
    %c0_82 = arith.constant 0 : index
    %200 = vector.load %arg4[%c7, %c0_82] : memref<16x128xf32, #tpu.memory_space<vmem>>, vector<1x48xf32>
    %201 = vector.broadcast %200 : vector<1x48xf32> to vector<4x48xf32>
    %202 = arith.addf %199, %201 : vector<4x48xf32>
    %cst_83 = arith.constant 0.000000e+00 : f32
    %203 = vector.broadcast %cst_83 : f32 to vector<4x48xf32>
    %204 = arith.maximumf %202, %203 : vector<4x48xf32>
    %c368 = arith.constant 368 : index
    %c0_84 = arith.constant 0 : index
    %205 = vector.load %arg3[%c368, %c0_84] : memref<736x128xf32, #tpu.memory_space<vmem>>, vector<48x48xf32>
    %cst_85 = arith.constant dense<0.000000e+00> : vector<4x48xf32>
    %206 = tpu.matmul %204, %205, %cst_85 {dimension_numbers = #tpu.dot_dimension_numbers<[1], [0], [0], [1], [0, 0, 1, 1], [], []>} : vector<4x48xf32>, vector<48x48xf32>, vector<4x48xf32> -> vector<4x48xf32>
    %c8 = arith.constant 8 : index
    %c0_86 = arith.constant 0 : index
    %207 = vector.load %arg4[%c8, %c0_86] : memref<16x128xf32, #tpu.memory_space<vmem>>, vector<1x48xf32>
    %208 = vector.broadcast %207 : vector<1x48xf32> to vector<4x48xf32>
    %209 = arith.addf %206, %208 : vector<4x48xf32>
    %cst_87 = arith.constant 0.000000e+00 : f32
    %210 = vector.broadcast %cst_87 : f32 to vector<4x48xf32>
    %211 = arith.subf %210, %209 : vector<4x48xf32>
    %212 = math.exp %211 : vector<4x48xf32>
    %cst_88 = arith.constant 1.000000e+00 : f32
    %213 = vector.broadcast %cst_88 : f32 to vector<4x48xf32>
    %214 = arith.addf %213, %212 : vector<4x48xf32>
    %215 = tpu.reciprocal %214 {approx = true} : vector<4x48xf32> -> vector<4x48xf32>
    %cst_89 = arith.constant 0.000000e+00 : f32
    %216 = vector.broadcast %cst_89 : f32 to vector<4x48xf32>
    %217 = arith.subf %216, %215 : vector<4x48xf32>
    %218 = math.exp %217 : vector<4x48xf32>
    %cst_90 = arith.constant 1.000000e+00 : f32
    %219 = vector.broadcast %cst_90 : f32 to vector<4x48xf32>
    %220 = arith.addf %219, %218 : vector<4x48xf32>
    %221 = tpu.reciprocal %220 {approx = true} : vector<4x48xf32> -> vector<4x48xf32>
    %c416 = arith.constant 416 : index
    %c0_91 = arith.constant 0 : index
    %222 = vector.load %arg3[%c416, %c0_91] : memref<736x128xf32, #tpu.memory_space<vmem>>, vector<48x48xf32>
    %cst_92 = arith.constant dense<0.000000e+00> : vector<4x48xf32>
    %223 = tpu.matmul %204, %222, %cst_92 {dimension_numbers = #tpu.dot_dimension_numbers<[1], [0], [0], [1], [0, 0, 1, 1], [], []>} : vector<4x48xf32>, vector<48x48xf32>, vector<4x48xf32> -> vector<4x48xf32>
    %c9 = arith.constant 9 : index
    %c0_93 = arith.constant 0 : index
    %224 = vector.load %arg4[%c9, %c0_93] : memref<16x128xf32, #tpu.memory_space<vmem>>, vector<1x48xf32>
    %225 = vector.broadcast %224 : vector<1x48xf32> to vector<4x48xf32>
    %226 = arith.addf %223, %225 : vector<4x48xf32>
    %cst_94 = arith.constant 9.99999974E-5 : f32
    %cst_95 = arith.constant 1.000000e+04 : f32
    %227 = vector.broadcast %cst_94 : f32 to vector<4x48xf32>
    %228 = arith.maximumf %227, %226 : vector<4x48xf32>
    %229 = vector.broadcast %cst_95 : f32 to vector<4x48xf32>
    %230 = arith.minimumf %229, %228 : vector<4x48xf32>
    %c464 = arith.constant 464 : index
    %c0_96 = arith.constant 0 : index
    %231 = vector.load %arg3[%c464, %c0_96] : memref<736x128xf32, #tpu.memory_space<vmem>>, vector<48x48xf32>
    %cst_97 = arith.constant dense<0.000000e+00> : vector<4x48xf32>
    %232 = tpu.matmul %204, %231, %cst_97 {dimension_numbers = #tpu.dot_dimension_numbers<[1], [0], [0], [1], [0, 0, 1, 1], [], []>} : vector<4x48xf32>, vector<48x48xf32>, vector<4x48xf32> -> vector<4x48xf32>
    %c10 = arith.constant 10 : index
    %c0_98 = arith.constant 0 : index
    %233 = vector.load %arg4[%c10, %c0_98] : memref<16x128xf32, #tpu.memory_space<vmem>>, vector<1x48xf32>
    %234 = vector.broadcast %233 : vector<1x48xf32> to vector<4x48xf32>
    %235 = arith.addf %232, %234 : vector<4x48xf32>
    %236 = math.exp %235 : vector<4x48xf32>
    %cst_99 = arith.constant 9.99999974E-6 : f32
    %cst_100 = arith.constant 1.000000e+06 : f32
    %237 = vector.broadcast %cst_99 : f32 to vector<4x48xf32>
    %238 = arith.maximumf %237, %236 : vector<4x48xf32>
    %239 = vector.broadcast %cst_100 : f32 to vector<4x48xf32>
    %240 = arith.minimumf %239, %238 : vector<4x48xf32>
    %241 = arith.mulf %240, %2 : vector<4x48xf32>
    %cst_101 = arith.constant 0.000000e+00 : f32
    %242 = vector.broadcast %cst_101 : f32 to vector<4x48xf32>
    %243 = arith.maximumf %241, %242 : vector<4x48xf32>
    %cst_102 = arith.constant 9.99999974E-5 : f32
    %244 = vector.broadcast %cst_102 : f32 to vector<4x48xf32>
    %245 = arith.maximumf %1, %244 : vector<4x48xf32>
    %cst_103 = arith.constant 1.000000e+06 : f32
    %246 = vector.broadcast %cst_103 : f32 to vector<4x48xf32>
    %247 = arith.minimumf %230, %246 : vector<4x48xf32>
    %cst_104 = arith.constant 9.99999993E-9 : f32
    %248 = vector.broadcast %cst_104 : f32 to vector<4x48xf32>
    %249 = arith.addf %247, %248 : vector<4x48xf32>
    %cst_105 = arith.constant 1.000000e+00 : f32
    %250 = vector.broadcast %cst_105 : f32 to vector<4x48xf32>
    %251 = arith.subf %249, %250 : vector<4x48xf32>
    %cst_106 = arith.constant 1.000000e+00 : f32
    %252 = vector.broadcast %cst_106 : f32 to vector<4x48xf32>
    %cst_107 = arith.constant 1.000000e+00 : f32
    %253 = vector.broadcast %cst_107 : f32 to vector<4x48xf32>
    %254 = arith.addf %251, %253 : vector<4x48xf32>
    %255 = tpu.reciprocal %254 {approx = true} : vector<4x48xf32> -> vector<4x48xf32>
    %cst_108 = arith.constant 676.520386 : f32
    %256 = vector.broadcast %cst_108 : f32 to vector<4x48xf32>
    %257 = arith.mulf %256, %255 : vector<4x48xf32>
    %258 = arith.addf %252, %257 : vector<4x48xf32>
    %cst_109 = arith.constant 2.000000e+00 : f32
    %259 = vector.broadcast %cst_109 : f32 to vector<4x48xf32>
    %260 = arith.addf %251, %259 : vector<4x48xf32>
    %261 = tpu.reciprocal %260 {approx = true} : vector<4x48xf32> -> vector<4x48xf32>
    %cst_110 = arith.constant -1259.13916 : f32
    %262 = vector.broadcast %cst_110 : f32 to vector<4x48xf32>
    %263 = arith.mulf %262, %261 : vector<4x48xf32>
    %264 = arith.addf %258, %263 : vector<4x48xf32>
    %cst_111 = arith.constant 3.000000e+00 : f32
    %265 = vector.broadcast %cst_111 : f32 to vector<4x48xf32>
    %266 = arith.addf %251, %265 : vector<4x48xf32>
    %267 = tpu.reciprocal %266 {approx = true} : vector<4x48xf32> -> vector<4x48xf32>
    %cst_112 = arith.constant 771.323425 : f32
    %268 = vector.broadcast %cst_112 : f32 to vector<4x48xf32>
    %269 = arith.mulf %268, %267 : vector<4x48xf32>
    %270 = arith.addf %264, %269 : vector<4x48xf32>
    %cst_113 = arith.constant 4.000000e+00 : f32
    %271 = vector.broadcast %cst_113 : f32 to vector<4x48xf32>
    %272 = arith.addf %251, %271 : vector<4x48xf32>
    %273 = tpu.reciprocal %272 {approx = true} : vector<4x48xf32> -> vector<4x48xf32>
    %cst_114 = arith.constant -176.615036 : f32
    %274 = vector.broadcast %cst_114 : f32 to vector<4x48xf32>
    %275 = arith.mulf %274, %273 : vector<4x48xf32>
    %276 = arith.addf %270, %275 : vector<4x48xf32>
    %cst_115 = arith.constant 5.000000e+00 : f32
    %277 = vector.broadcast %cst_115 : f32 to vector<4x48xf32>
    %278 = arith.addf %251, %277 : vector<4x48xf32>
    %279 = tpu.reciprocal %278 {approx = true} : vector<4x48xf32> -> vector<4x48xf32>
    %cst_116 = arith.constant 12.5073433 : f32
    %280 = vector.broadcast %cst_116 : f32 to vector<4x48xf32>
    %281 = arith.mulf %280, %279 : vector<4x48xf32>
    %282 = arith.addf %276, %281 : vector<4x48xf32>
    %cst_117 = arith.constant 6.000000e+00 : f32
    %283 = vector.broadcast %cst_117 : f32 to vector<4x48xf32>
    %284 = arith.addf %251, %283 : vector<4x48xf32>
    %285 = tpu.reciprocal %284 {approx = true} : vector<4x48xf32> -> vector<4x48xf32>
    %cst_118 = arith.constant -0.138571098 : f32
    %286 = vector.broadcast %cst_118 : f32 to vector<4x48xf32>
    %287 = arith.mulf %286, %285 : vector<4x48xf32>
    %288 = arith.addf %282, %287 : vector<4x48xf32>
    %cst_119 = arith.constant 7.000000e+00 : f32
    %289 = vector.broadcast %cst_119 : f32 to vector<4x48xf32>
    %290 = arith.addf %251, %289 : vector<4x48xf32>
    %291 = tpu.reciprocal %290 {approx = true} : vector<4x48xf32> -> vector<4x48xf32>
    %cst_120 = arith.constant 9.98436917E-6 : f32
    %292 = vector.broadcast %cst_120 : f32 to vector<4x48xf32>
    %293 = arith.mulf %292, %291 : vector<4x48xf32>
    %294 = arith.addf %288, %293 : vector<4x48xf32>
    %cst_121 = arith.constant 8.000000e+00 : f32
    %295 = vector.broadcast %cst_121 : f32 to vector<4x48xf32>
    %296 = arith.addf %251, %295 : vector<4x48xf32>
    %297 = tpu.reciprocal %296 {approx = true} : vector<4x48xf32> -> vector<4x48xf32>
    %cst_122 = arith.constant 1.50563267E-7 : f32
    %298 = vector.broadcast %cst_122 : f32 to vector<4x48xf32>
    %299 = arith.mulf %298, %297 : vector<4x48xf32>
    %300 = arith.addf %294, %299 : vector<4x48xf32>
    %cst_123 = arith.constant 7.000000e+00 : f32
    %301 = vector.broadcast %cst_123 : f32 to vector<4x48xf32>
    %302 = arith.addf %251, %301 : vector<4x48xf32>
    %cst_124 = arith.constant 5.000000e-01 : f32
    %303 = vector.broadcast %cst_124 : f32 to vector<4x48xf32>
    %304 = arith.addf %302, %303 : vector<4x48xf32>
    %cst_125 = arith.constant 5.000000e-01 : f32
    %305 = vector.broadcast %cst_125 : f32 to vector<4x48xf32>
    %306 = arith.addf %251, %305 : vector<4x48xf32>
    %307 = math.log %304 : vector<4x48xf32>
    %308 = arith.mulf %306, %307 : vector<4x48xf32>
    %cst_126 = arith.constant 0.918938517 : f32
    %309 = vector.broadcast %cst_126 : f32 to vector<4x48xf32>
    %310 = arith.addf %309, %308 : vector<4x48xf32>
    %311 = arith.subf %310, %304 : vector<4x48xf32>
    %312 = math.log %300 : vector<4x48xf32>
    %313 = arith.addf %311, %312 : vector<4x48xf32>
    %cst_127 = arith.constant 1.000000e+00 : f32
    %314 = vector.broadcast %cst_127 : f32 to vector<4x48xf32>
    %315 = arith.addf %245, %314 : vector<4x48xf32>
    %cst_128 = arith.constant 1.000000e+00 : f32
    %316 = vector.broadcast %cst_128 : f32 to vector<4x48xf32>
    %317 = arith.subf %315, %316 : vector<4x48xf32>
    %cst_129 = arith.constant 1.000000e+00 : f32
    %318 = vector.broadcast %cst_129 : f32 to vector<4x48xf32>
    %cst_130 = arith.constant 1.000000e+00 : f32
    %319 = vector.broadcast %cst_130 : f32 to vector<4x48xf32>
    %320 = arith.addf %317, %319 : vector<4x48xf32>
    %321 = tpu.reciprocal %320 {approx = true} : vector<4x48xf32> -> vector<4x48xf32>
    %cst_131 = arith.constant 676.520386 : f32
    %322 = vector.broadcast %cst_131 : f32 to vector<4x48xf32>
    %323 = arith.mulf %322, %321 : vector<4x48xf32>
    %324 = arith.addf %318, %323 : vector<4x48xf32>
    %cst_132 = arith.constant 2.000000e+00 : f32
    %325 = vector.broadcast %cst_132 : f32 to vector<4x48xf32>
    %326 = arith.addf %317, %325 : vector<4x48xf32>
    %327 = tpu.reciprocal %326 {approx = true} : vector<4x48xf32> -> vector<4x48xf32>
    %cst_133 = arith.constant -1259.13916 : f32
    %328 = vector.broadcast %cst_133 : f32 to vector<4x48xf32>
    %329 = arith.mulf %328, %327 : vector<4x48xf32>
    %330 = arith.addf %324, %329 : vector<4x48xf32>
    %cst_134 = arith.constant 3.000000e+00 : f32
    %331 = vector.broadcast %cst_134 : f32 to vector<4x48xf32>
    %332 = arith.addf %317, %331 : vector<4x48xf32>
    %333 = tpu.reciprocal %332 {approx = true} : vector<4x48xf32> -> vector<4x48xf32>
    %cst_135 = arith.constant 771.323425 : f32
    %334 = vector.broadcast %cst_135 : f32 to vector<4x48xf32>
    %335 = arith.mulf %334, %333 : vector<4x48xf32>
    %336 = arith.addf %330, %335 : vector<4x48xf32>
    %cst_136 = arith.constant 4.000000e+00 : f32
    %337 = vector.broadcast %cst_136 : f32 to vector<4x48xf32>
    %338 = arith.addf %317, %337 : vector<4x48xf32>
    %339 = tpu.reciprocal %338 {approx = true} : vector<4x48xf32> -> vector<4x48xf32>
    %cst_137 = arith.constant -176.615036 : f32
    %340 = vector.broadcast %cst_137 : f32 to vector<4x48xf32>
    %341 = arith.mulf %340, %339 : vector<4x48xf32>
    %342 = arith.addf %336, %341 : vector<4x48xf32>
    %cst_138 = arith.constant 5.000000e+00 : f32
    %343 = vector.broadcast %cst_138 : f32 to vector<4x48xf32>
    %344 = arith.addf %317, %343 : vector<4x48xf32>
    %345 = tpu.reciprocal %344 {approx = true} : vector<4x48xf32> -> vector<4x48xf32>
    %cst_139 = arith.constant 12.5073433 : f32
    %346 = vector.broadcast %cst_139 : f32 to vector<4x48xf32>
    %347 = arith.mulf %346, %345 : vector<4x48xf32>
    %348 = arith.addf %342, %347 : vector<4x48xf32>
    %cst_140 = arith.constant 6.000000e+00 : f32
    %349 = vector.broadcast %cst_140 : f32 to vector<4x48xf32>
    %350 = arith.addf %317, %349 : vector<4x48xf32>
    %351 = tpu.reciprocal %350 {approx = true} : vector<4x48xf32> -> vector<4x48xf32>
    %cst_141 = arith.constant -0.138571098 : f32
    %352 = vector.broadcast %cst_141 : f32 to vector<4x48xf32>
    %353 = arith.mulf %352, %351 : vector<4x48xf32>
    %354 = arith.addf %348, %353 : vector<4x48xf32>
    %cst_142 = arith.constant 7.000000e+00 : f32
    %355 = vector.broadcast %cst_142 : f32 to vector<4x48xf32>
    %356 = arith.addf %317, %355 : vector<4x48xf32>
    %357 = tpu.reciprocal %356 {approx = true} : vector<4x48xf32> -> vector<4x48xf32>
    %cst_143 = arith.constant 9.98436917E-6 : f32
    %358 = vector.broadcast %cst_143 : f32 to vector<4x48xf32>
    %359 = arith.mulf %358, %357 : vector<4x48xf32>
    %360 = arith.addf %354, %359 : vector<4x48xf32>
    %cst_144 = arith.constant 8.000000e+00 : f32
    %361 = vector.broadcast %cst_144 : f32 to vector<4x48xf32>
    %362 = arith.addf %317, %361 : vector<4x48xf32>
    %363 = tpu.reciprocal %362 {approx = true} : vector<4x48xf32> -> vector<4x48xf32>
    %cst_145 = arith.constant 1.50563267E-7 : f32
    %364 = vector.broadcast %cst_145 : f32 to vector<4x48xf32>
    %365 = arith.mulf %364, %363 : vector<4x48xf32>
    %366 = arith.addf %360, %365 : vector<4x48xf32>
    %cst_146 = arith.constant 7.000000e+00 : f32
    %367 = vector.broadcast %cst_146 : f32 to vector<4x48xf32>
    %368 = arith.addf %317, %367 : vector<4x48xf32>
    %cst_147 = arith.constant 5.000000e-01 : f32
    %369 = vector.broadcast %cst_147 : f32 to vector<4x48xf32>
    %370 = arith.addf %368, %369 : vector<4x48xf32>
    %cst_148 = arith.constant 5.000000e-01 : f32
    %371 = vector.broadcast %cst_148 : f32 to vector<4x48xf32>
    %372 = arith.addf %317, %371 : vector<4x48xf32>
    %373 = math.log %370 : vector<4x48xf32>
    %374 = arith.mulf %372, %373 : vector<4x48xf32>
    %cst_149 = arith.constant 0.918938517 : f32
    %375 = vector.broadcast %cst_149 : f32 to vector<4x48xf32>
    %376 = arith.addf %375, %374 : vector<4x48xf32>
    %377 = arith.subf %376, %370 : vector<4x48xf32>
    %378 = math.log %366 : vector<4x48xf32>
    %379 = arith.addf %377, %378 : vector<4x48xf32>
    %380 = arith.addf %313, %379 : vector<4x48xf32>
    %381 = arith.addf %245, %247 : vector<4x48xf32>
    %cst_150 = arith.constant 9.99999993E-9 : f32
    %382 = vector.broadcast %cst_150 : f32 to vector<4x48xf32>
    %383 = arith.addf %381, %382 : vector<4x48xf32>
    %cst_151 = arith.constant 1.000000e+00 : f32
    %384 = vector.broadcast %cst_151 : f32 to vector<4x48xf32>
    %385 = arith.subf %383, %384 : vector<4x48xf32>
    %cst_152 = arith.constant 1.000000e+00 : f32
    %386 = vector.broadcast %cst_152 : f32 to vector<4x48xf32>
    %cst_153 = arith.constant 1.000000e+00 : f32
    %387 = vector.broadcast %cst_153 : f32 to vector<4x48xf32>
    %388 = arith.addf %385, %387 : vector<4x48xf32>
    %389 = tpu.reciprocal %388 {approx = true} : vector<4x48xf32> -> vector<4x48xf32>
    %cst_154 = arith.constant 676.520386 : f32
    %390 = vector.broadcast %cst_154 : f32 to vector<4x48xf32>
    %391 = arith.mulf %390, %389 : vector<4x48xf32>
    %392 = arith.addf %386, %391 : vector<4x48xf32>
    %cst_155 = arith.constant 2.000000e+00 : f32
    %393 = vector.broadcast %cst_155 : f32 to vector<4x48xf32>
    %394 = arith.addf %385, %393 : vector<4x48xf32>
    %395 = tpu.reciprocal %394 {approx = true} : vector<4x48xf32> -> vector<4x48xf32>
    %cst_156 = arith.constant -1259.13916 : f32
    %396 = vector.broadcast %cst_156 : f32 to vector<4x48xf32>
    %397 = arith.mulf %396, %395 : vector<4x48xf32>
    %398 = arith.addf %392, %397 : vector<4x48xf32>
    %cst_157 = arith.constant 3.000000e+00 : f32
    %399 = vector.broadcast %cst_157 : f32 to vector<4x48xf32>
    %400 = arith.addf %385, %399 : vector<4x48xf32>
    %401 = tpu.reciprocal %400 {approx = true} : vector<4x48xf32> -> vector<4x48xf32>
    %cst_158 = arith.constant 771.323425 : f32
    %402 = vector.broadcast %cst_158 : f32 to vector<4x48xf32>
    %403 = arith.mulf %402, %401 : vector<4x48xf32>
    %404 = arith.addf %398, %403 : vector<4x48xf32>
    %cst_159 = arith.constant 4.000000e+00 : f32
    %405 = vector.broadcast %cst_159 : f32 to vector<4x48xf32>
    %406 = arith.addf %385, %405 : vector<4x48xf32>
    %407 = tpu.reciprocal %406 {approx = true} : vector<4x48xf32> -> vector<4x48xf32>
    %cst_160 = arith.constant -176.615036 : f32
    %408 = vector.broadcast %cst_160 : f32 to vector<4x48xf32>
    %409 = arith.mulf %408, %407 : vector<4x48xf32>
    %410 = arith.addf %404, %409 : vector<4x48xf32>
    %cst_161 = arith.constant 5.000000e+00 : f32
    %411 = vector.broadcast %cst_161 : f32 to vector<4x48xf32>
    %412 = arith.addf %385, %411 : vector<4x48xf32>
    %413 = tpu.reciprocal %412 {approx = true} : vector<4x48xf32> -> vector<4x48xf32>
    %cst_162 = arith.constant 12.5073433 : f32
    %414 = vector.broadcast %cst_162 : f32 to vector<4x48xf32>
    %415 = arith.mulf %414, %413 : vector<4x48xf32>
    %416 = arith.addf %410, %415 : vector<4x48xf32>
    %cst_163 = arith.constant 6.000000e+00 : f32
    %417 = vector.broadcast %cst_163 : f32 to vector<4x48xf32>
    %418 = arith.addf %385, %417 : vector<4x48xf32>
    %419 = tpu.reciprocal %418 {approx = true} : vector<4x48xf32> -> vector<4x48xf32>
    %cst_164 = arith.constant -0.138571098 : f32
    %420 = vector.broadcast %cst_164 : f32 to vector<4x48xf32>
    %421 = arith.mulf %420, %419 : vector<4x48xf32>
    %422 = arith.addf %416, %421 : vector<4x48xf32>
    %cst_165 = arith.constant 7.000000e+00 : f32
    %423 = vector.broadcast %cst_165 : f32 to vector<4x48xf32>
    %424 = arith.addf %385, %423 : vector<4x48xf32>
    %425 = tpu.reciprocal %424 {approx = true} : vector<4x48xf32> -> vector<4x48xf32>
    %cst_166 = arith.constant 9.98436917E-6 : f32
    %426 = vector.broadcast %cst_166 : f32 to vector<4x48xf32>
    %427 = arith.mulf %426, %425 : vector<4x48xf32>
    %428 = arith.addf %422, %427 : vector<4x48xf32>
    %cst_167 = arith.constant 8.000000e+00 : f32
    %429 = vector.broadcast %cst_167 : f32 to vector<4x48xf32>
    %430 = arith.addf %385, %429 : vector<4x48xf32>
    %431 = tpu.reciprocal %430 {approx = true} : vector<4x48xf32> -> vector<4x48xf32>
    %cst_168 = arith.constant 1.50563267E-7 : f32
    %432 = vector.broadcast %cst_168 : f32 to vector<4x48xf32>
    %433 = arith.mulf %432, %431 : vector<4x48xf32>
    %434 = arith.addf %428, %433 : vector<4x48xf32>
    %cst_169 = arith.constant 7.000000e+00 : f32
    %435 = vector.broadcast %cst_169 : f32 to vector<4x48xf32>
    %436 = arith.addf %385, %435 : vector<4x48xf32>
    %cst_170 = arith.constant 5.000000e-01 : f32
    %437 = vector.broadcast %cst_170 : f32 to vector<4x48xf32>
    %438 = arith.addf %436, %437 : vector<4x48xf32>
    %cst_171 = arith.constant 5.000000e-01 : f32
    %439 = vector.broadcast %cst_171 : f32 to vector<4x48xf32>
    %440 = arith.addf %385, %439 : vector<4x48xf32>
    %441 = math.log %438 : vector<4x48xf32>
    %442 = arith.mulf %440, %441 : vector<4x48xf32>
    %cst_172 = arith.constant 0.918938517 : f32
    %443 = vector.broadcast %cst_172 : f32 to vector<4x48xf32>
    %444 = arith.addf %443, %442 : vector<4x48xf32>
    %445 = arith.subf %444, %438 : vector<4x48xf32>
    %446 = math.log %434 : vector<4x48xf32>
    %447 = arith.addf %445, %446 : vector<4x48xf32>
    %448 = arith.subf %380, %447 : vector<4x48xf32>
    %449 = arith.addf %247, %245 : vector<4x48xf32>
    %cst_173 = arith.constant 9.99999993E-9 : f32
    %450 = vector.broadcast %cst_173 : f32 to vector<4x48xf32>
    %451 = arith.addf %247, %450 : vector<4x48xf32>
    %452 = tpu.reciprocal %451 {approx = true} : vector<4x48xf32> -> vector<4x48xf32>
    %453 = arith.mulf %243, %452 : vector<4x48xf32>
    %cst_174 = arith.constant 1.000000e+00 : f32
    %454 = vector.broadcast %cst_174 : f32 to vector<4x48xf32>
    %455 = arith.addf %454, %453 : vector<4x48xf32>
    %456 = math.log %455 : vector<4x48xf32>
    %457 = arith.mulf %449, %456 : vector<4x48xf32>
    %cst_175 = arith.constant 9.99999993E-9 : f32
    %458 = vector.broadcast %cst_175 : f32 to vector<4x48xf32>
    %459 = arith.addf %247, %458 : vector<4x48xf32>
    %460 = math.log %459 : vector<4x48xf32>
    %cst_176 = arith.constant 9.99999993E-9 : f32
    %461 = vector.broadcast %cst_176 : f32 to vector<4x48xf32>
    %462 = arith.addf %243, %461 : vector<4x48xf32>
    %463 = math.log %462 : vector<4x48xf32>
    %464 = arith.subf %460, %463 : vector<4x48xf32>
    %465 = arith.mulf %245, %464 : vector<4x48xf32>
    %466 = arith.addf %457, %465 : vector<4x48xf32>
    %467 = arith.addf %448, %466 : vector<4x48xf32>
    %468 = arith.cmpf one, %467, %467 : vector<4x48xf32>
    %cst_177 = arith.constant 0x7F800000 : f32
    %469 = vector.broadcast %cst_177 : f32 to vector<4x48xf32>
    %470 = arith.select %468, %469, %467 : vector<4x48xi1>, vector<4x48xf32>
    %cst_178 = arith.constant 1.000000e+00 : f32
    %471 = vector.broadcast %cst_178 : f32 to vector<4x48xf32>
    %472 = arith.subf %471, %221 : vector<4x48xf32>
    %cst_179 = arith.constant 9.99999993E-9 : f32
    %473 = vector.broadcast %cst_179 : f32 to vector<4x48xf32>
    %474 = arith.addf %472, %473 : vector<4x48xf32>
    %475 = math.log %474 : vector<4x48xf32>
    %476 = arith.subf %470, %475 : vector<4x48xf32>
    %477 = arith.addf %247, %243 : vector<4x48xf32>
    %cst_180 = arith.constant 9.99999993E-9 : f32
    %478 = vector.broadcast %cst_180 : f32 to vector<4x48xf32>
    %479 = arith.addf %477, %478 : vector<4x48xf32>
    %480 = tpu.reciprocal %479 {approx = true} : vector<4x48xf32> -> vector<4x48xf32>
    %481 = arith.mulf %247, %480 : vector<4x48xf32>
    %482 = math.log %481 : vector<4x48xf32>
    %483 = arith.mulf %247, %482 : vector<4x48xf32>
    %484 = math.exp %483 : vector<4x48xf32>
    %cst_181 = arith.constant 1.000000e+00 : f32
    %485 = vector.broadcast %cst_181 : f32 to vector<4x48xf32>
    %486 = arith.subf %485, %221 : vector<4x48xf32>
    %487 = arith.mulf %486, %484 : vector<4x48xf32>
    %488 = arith.addf %221, %487 : vector<4x48xf32>
    %cst_182 = arith.constant 9.99999993E-9 : f32
    %489 = vector.broadcast %cst_182 : f32 to vector<4x48xf32>
    %490 = arith.addf %488, %489 : vector<4x48xf32>
    %491 = math.log %490 : vector<4x48xf32>
    %cst_183 = arith.constant 0.000000e+00 : f32
    %492 = vector.broadcast %cst_183 : f32 to vector<4x48xf32>
    %493 = arith.subf %492, %491 : vector<4x48xf32>
    %cst_184 = arith.constant 9.99999993E-9 : f32
    %494 = vector.broadcast %cst_184 : f32 to vector<4x48xf32>
    %495 = arith.cmpf olt, %1, %494 : vector<4x48xf32>
    %496 = arith.select %495, %493, %476 : vector<4x48xi1>, vector<4x48xf32>
    %cst_185 = arith.constant 1.000000e+00 : f32
    %497 = vector.broadcast %cst_185 : f32 to vector<4x48xf32>
    %498 = arith.mulf %497, %221 : vector<4x48xf32>
    %499 = arith.mulf %498, %221 : vector<4x48xf32>
    %500 = arith.addf %496, %499 : vector<4x48xf32>
    %cst_186 = arith.constant dense<0.000000e+00> : vector<4xf32>
    %501 = vector.multi_reduction <add>, %500, %cst_186 [1] : vector<4x48xf32> to vector<4xf32>
    %502 = vector.shape_cast %501 : vector<4xf32> to vector<4x1xf32>
    %cst_187 = arith.constant dense<0.000000e+00> : vector<1xf32>
    %503 = vector.multi_reduction <add>, %502, %cst_187 [0] : vector<4x1xf32> to vector<1xf32>
    %504 = vector.shape_cast %503 : vector<1xf32> to vector<1x1xf32>
    %cst_188 = arith.constant 0.00520833349 : f32
    %505 = vector.broadcast %cst_188 : f32 to vector<1x1xf32>
    %506 = arith.mulf %504, %505 : vector<1x1xf32>
    %507 = arith.cmpf one, %506, %506 : vector<1x1xf32>
    %cst_189 = arith.constant 0x7F800000 : f32
    %508 = vector.broadcast %cst_189 : f32 to vector<1x1xf32>
    %509 = arith.select %507, %508, %506 : vector<1x1xi1>, vector<1x1xf32>
    %c0_190 = arith.constant 0 : index
    %c0_191 = arith.constant 0 : index
    %510 = vector.load %arg2[%c0_190, %c0_191] : memref<20x40xf32, #tpu.memory_space<vmem>>, vector<12x40xf32>
    %c12_192 = arith.constant 12 : index
    %c0_193 = arith.constant 0 : index
    %511 = vector.load %arg2[%c12_192, %c0_193] : memref<20x40xf32, #tpu.memory_space<vmem>>, vector<4x40xf32>
    %c16_194 = arith.constant 16 : index
    %c0_195 = arith.constant 0 : index
    %512 = vector.load %arg2[%c16_194, %c0_195] : memref<20x40xf32, #tpu.memory_space<vmem>>, vector<4x40xf32>
    %c0_196 = arith.constant 0 : index
    %c0_197 = arith.constant 0 : index
    %513 = vector.load %arg5[%c0_196, %c0_197] : memref<704x128xf32, #tpu.memory_space<vmem>>, vector<40x64xf32>
    %cst_198 = arith.constant dense<0.000000e+00> : vector<12x64xf32>
    %514 = tpu.matmul %510, %513, %cst_198 {dimension_numbers = #tpu.dot_dimension_numbers<[1], [0], [0], [1], [0, 0, 1, 1], [], []>} : vector<12x40xf32>, vector<40x64xf32>, vector<12x64xf32> -> vector<12x64xf32>
    %c0_199 = arith.constant 0 : index
    %c0_200 = arith.constant 0 : index
    %515 = vector.load %arg6[%c0_199, %c0_200] : memref<16x128xf32, #tpu.memory_space<vmem>>, vector<1x64xf32>
    %516 = vector.broadcast %515 : vector<1x64xf32> to vector<12x64xf32>
    %517 = arith.addf %514, %516 : vector<12x64xf32>
    %cst_201 = arith.constant 0.000000e+00 : f32
    %518 = vector.broadcast %cst_201 : f32 to vector<12x64xf32>
    %519 = arith.maximumf %517, %518 : vector<12x64xf32>
    %c40 = arith.constant 40 : index
    %c0_202 = arith.constant 0 : index
    %520 = vector.load %arg5[%c40, %c0_202] : memref<704x128xf32, #tpu.memory_space<vmem>>, vector<64x48xf32>
    %cst_203 = arith.constant dense<0.000000e+00> : vector<12x48xf32>
    %521 = tpu.matmul %519, %520, %cst_203 {dimension_numbers = #tpu.dot_dimension_numbers<[1], [0], [0], [1], [0, 0, 1, 1], [], []>} : vector<12x64xf32>, vector<64x48xf32>, vector<12x48xf32> -> vector<12x48xf32>
    %c1_204 = arith.constant 1 : index
    %c0_205 = arith.constant 0 : index
    %522 = vector.load %arg6[%c1_204, %c0_205] : memref<16x128xf32, #tpu.memory_space<vmem>>, vector<1x48xf32>
    %523 = vector.broadcast %522 : vector<1x48xf32> to vector<12x48xf32>
    %524 = arith.addf %521, %523 : vector<12x48xf32>
    %cst_206 = arith.constant 0.000000e+00 : f32
    %525 = vector.broadcast %cst_206 : f32 to vector<12x48xf32>
    %526 = arith.maximumf %524, %525 : vector<12x48xf32>
    %c104 = arith.constant 104 : index
    %c0_207 = arith.constant 0 : index
    %527 = vector.load %arg5[%c104, %c0_207] : memref<704x128xf32, #tpu.memory_space<vmem>>, vector<48x32xf32>
    %cst_208 = arith.constant dense<0.000000e+00> : vector<12x32xf32>
    %528 = tpu.matmul %526, %527, %cst_208 {dimension_numbers = #tpu.dot_dimension_numbers<[1], [0], [0], [1], [0, 0, 1, 1], [], []>} : vector<12x48xf32>, vector<48x32xf32>, vector<12x32xf32> -> vector<12x32xf32>
    %c2_209 = arith.constant 2 : index
    %c0_210 = arith.constant 0 : index
    %529 = vector.load %arg6[%c2_209, %c0_210] : memref<16x128xf32, #tpu.memory_space<vmem>>, vector<1x32xf32>
    %530 = vector.broadcast %529 : vector<1x32xf32> to vector<12x32xf32>
    %531 = arith.addf %528, %530 : vector<12x32xf32>
    %cst_211 = arith.constant 0.000000e+00 : f32
    %532 = vector.broadcast %cst_211 : f32 to vector<12x32xf32>
    %533 = arith.maximumf %531, %532 : vector<12x32xf32>
    %c152 = arith.constant 152 : index
    %c0_212 = arith.constant 0 : index
    %534 = vector.load %arg5[%c152, %c0_212] : memref<704x128xf32, #tpu.memory_space<vmem>>, vector<32x32xf32>
    %cst_213 = arith.constant dense<0.000000e+00> : vector<12x32xf32>
    %535 = tpu.matmul %533, %534, %cst_213 {dimension_numbers = #tpu.dot_dimension_numbers<[1], [0], [0], [1], [0, 0, 1, 1], [], []>} : vector<12x32xf32>, vector<32x32xf32>, vector<12x32xf32> -> vector<12x32xf32>
    %c3_214 = arith.constant 3 : index
    %c0_215 = arith.constant 0 : index
    %536 = vector.load %arg6[%c3_214, %c0_215] : memref<16x128xf32, #tpu.memory_space<vmem>>, vector<1x32xf32>
    %537 = vector.broadcast %536 : vector<1x32xf32> to vector<12x32xf32>
    %538 = arith.addf %535, %537 : vector<12x32xf32>
    %cst_216 = arith.constant 0.000000e+00 : f32
    %539 = vector.broadcast %cst_216 : f32 to vector<12x32xf32>
    %540 = arith.maximumf %538, %539 : vector<12x32xf32>
    %541 = vector.extract_strided_slice %540 {offsets = [0, 0], sizes = [8, 32], strides = [1, 1]} : vector<12x32xf32> to vector<8x32xf32>
    %542 = vector.extract_strided_slice %540 {offsets = [8, 0], sizes = [4, 32], strides = [1, 1]} : vector<12x32xf32> to vector<4x32xf32>
    %c480 = arith.constant 480 : index
    %c0_217 = arith.constant 0 : index
    %543 = vector.load %arg5[%c480, %c0_217] : memref<704x128xf32, #tpu.memory_space<vmem>>, vector<32x96xf32>
    %cst_218 = arith.constant dense<0.000000e+00> : vector<8x96xf32>
    %544 = tpu.matmul %541, %543, %cst_218 {dimension_numbers = #tpu.dot_dimension_numbers<[1], [0], [0], [1], [0, 0, 1, 1], [], []>} : vector<8x32xf32>, vector<32x96xf32>, vector<8x96xf32> -> vector<8x96xf32>
    %c11_219 = arith.constant 11 : index
    %c0_220 = arith.constant 0 : index
    %545 = vector.load %arg6[%c11_219, %c0_220] : memref<16x128xf32, #tpu.memory_space<vmem>>, vector<1x96xf32>
    %546 = vector.broadcast %545 : vector<1x96xf32> to vector<8x96xf32>
    %547 = arith.addf %544, %546 : vector<8x96xf32>
    %548 = tpu.iota {dimensions = array<i32: 0>} : vector<8x8xi32>
    %549 = tpu.iota {dimensions = array<i32: 1>} : vector<8x8xi32>
    %c4_i32_221 = arith.constant 4 : i32
    %c0_i32_222 = arith.constant 0 : i32
    %550 = arith.cmpi eq, %c4_i32_221, %c0_i32_222 : i32
    %c1_i32_223 = arith.constant 1 : i32
    %551 = arith.select %550, %c1_i32_223, %c4_i32_221 : i32
    %552 = vector.broadcast %551 : i32 to vector<8x8xi32>
    %553 = arith.remsi %548, %552 : vector<8x8xi32>
    %c0_i32_224 = arith.constant 0 : i32
    %554 = vector.broadcast %c0_i32_224 : i32 to vector<8x8xi32>
    %555 = arith.cmpi ne, %553, %554 : vector<8x8xi32>
    %c0_i32_225 = arith.constant 0 : i32
    %556 = vector.broadcast %c0_i32_225 : i32 to vector<8x8xi32>
    %557 = arith.cmpi slt, %553, %556 : vector<8x8xi32>
    %c0_i32_226 = arith.constant 0 : i32
    %558 = arith.cmpi slt, %551, %c0_i32_226 : i32
    %559 = vector.broadcast %558 : i1 to vector<8x8xi1>
    %560 = vector.broadcast %559 : vector<8x8xi1> to vector<8x8xi1>
    %561 = arith.xori %557, %560 : vector<8x8xi1>
    %562 = arith.andi %561, %555 : vector<8x8xi1>
    %563 = vector.broadcast %551 : i32 to vector<8x8xi32>
    %564 = arith.addi %553, %563 : vector<8x8xi32>
    %565 = arith.select %562, %564, %553 : vector<8x8xi1>, vector<8x8xi32>
    %c4_i32_227 = arith.constant 4 : i32
    %c0_i32_228 = arith.constant 0 : i32
    %566 = arith.cmpi eq, %c4_i32_227, %c0_i32_228 : i32
    %c1_i32_229 = arith.constant 1 : i32
    %567 = arith.select %566, %c1_i32_229, %c4_i32_227 : i32
    %568 = vector.broadcast %567 : i32 to vector<8x8xi32>
    %569 = arith.remsi %549, %568 : vector<8x8xi32>
    %c0_i32_230 = arith.constant 0 : i32
    %570 = vector.broadcast %c0_i32_230 : i32 to vector<8x8xi32>
    %571 = arith.cmpi ne, %569, %570 : vector<8x8xi32>
    %c0_i32_231 = arith.constant 0 : i32
    %572 = vector.broadcast %c0_i32_231 : i32 to vector<8x8xi32>
    %573 = arith.cmpi slt, %569, %572 : vector<8x8xi32>
    %c0_i32_232 = arith.constant 0 : i32
    %574 = arith.cmpi slt, %567, %c0_i32_232 : i32
    %575 = vector.broadcast %574 : i1 to vector<8x8xi1>
    %576 = vector.broadcast %575 : vector<8x8xi1> to vector<8x8xi1>
    %577 = arith.xori %573, %576 : vector<8x8xi1>
    %578 = arith.andi %577, %571 : vector<8x8xi1>
    %579 = vector.broadcast %567 : i32 to vector<8x8xi32>
    %580 = arith.addi %569, %579 : vector<8x8xi32>
    %581 = arith.select %578, %580, %569 : vector<8x8xi1>, vector<8x8xi32>
    %582 = arith.cmpi eq, %565, %581 : vector<8x8xi32>
    %cst_233 = arith.constant 0.000000e+00 : f32
    %cst_234 = arith.constant -1.000000e+30 : f32
    %583 = vector.broadcast %cst_233 : f32 to vector<8x8xf32>
    %584 = vector.broadcast %cst_234 : f32 to vector<8x8xf32>
    %585 = arith.select %582, %583, %584 : vector<8x8xi1>, vector<8x8xf32>
    %586 = vector.extract_strided_slice %547 {offsets = [0, 0], sizes = [8, 8], strides = [1, 1]} : vector<8x96xf32> to vector<8x8xf32>
    %587 = vector.extract_strided_slice %547 {offsets = [0, 32], sizes = [8, 8], strides = [1, 1]} : vector<8x96xf32> to vector<8x8xf32>
    %588 = vector.extract_strided_slice %547 {offsets = [0, 64], sizes = [8, 8], strides = [1, 1]} : vector<8x96xf32> to vector<8x8xf32>
    %cst_235 = arith.constant dense<0.000000e+00> : vector<8x8xf32>
    %589 = tpu.matmul %586, %587, %cst_235 {dimension_numbers = #tpu.dot_dimension_numbers<[1], [1], [0], [0], [0, 0, 1, 0], [], []>} : vector<8x8xf32>, vector<8x8xf32>, vector<8x8xf32> -> vector<8x8xf32>
    %cst_236 = arith.constant 0.353553385 : f32
    %590 = vector.broadcast %cst_236 : f32 to vector<8x8xf32>
    %591 = arith.mulf %589, %590 : vector<8x8xf32>
    %592 = arith.addf %591, %585 : vector<8x8xf32>
    %cst_237 = arith.constant dense<0xFF800000> : vector<8xf32>
    %593 = vector.multi_reduction <maximumf>, %592, %cst_237 [1] : vector<8x8xf32> to vector<8xf32>
    %594 = vector.shape_cast %593 : vector<8xf32> to vector<8x1xf32>
    %595 = vector.broadcast %594 : vector<8x1xf32> to vector<8x8xf32>
    %596 = arith.subf %592, %595 : vector<8x8xf32>
    %597 = math.exp %596 : vector<8x8xf32>
    %cst_238 = arith.constant dense<0.000000e+00> : vector<8xf32>
    %598 = vector.multi_reduction <add>, %597, %cst_238 [1] : vector<8x8xf32> to vector<8xf32>
    %599 = vector.shape_cast %598 : vector<8xf32> to vector<8x1xf32>
    %600 = tpu.reciprocal %599 {approx = true} : vector<8x1xf32> -> vector<8x1xf32>
    %601 = vector.broadcast %600 : vector<8x1xf32> to vector<8x8xf32>
    %602 = arith.mulf %597, %601 : vector<8x8xf32>
    %cst_239 = arith.constant dense<0.000000e+00> : vector<8x8xf32>
    %603 = tpu.matmul %602, %588, %cst_239 {dimension_numbers = #tpu.dot_dimension_numbers<[1], [0], [0], [1], [0, 0, 1, 1], [], []>} : vector<8x8xf32>, vector<8x8xf32>, vector<8x8xf32> -> vector<8x8xf32>
    %604 = vector.extract_strided_slice %547 {offsets = [0, 8], sizes = [8, 8], strides = [1, 1]} : vector<8x96xf32> to vector<8x8xf32>
    %605 = vector.extract_strided_slice %547 {offsets = [0, 40], sizes = [8, 8], strides = [1, 1]} : vector<8x96xf32> to vector<8x8xf32>
    %606 = vector.extract_strided_slice %547 {offsets = [0, 72], sizes = [8, 8], strides = [1, 1]} : vector<8x96xf32> to vector<8x8xf32>
    %cst_240 = arith.constant dense<0.000000e+00> : vector<8x8xf32>
    %607 = tpu.matmul %604, %605, %cst_240 {dimension_numbers = #tpu.dot_dimension_numbers<[1], [1], [0], [0], [0, 0, 1, 0], [], []>} : vector<8x8xf32>, vector<8x8xf32>, vector<8x8xf32> -> vector<8x8xf32>
    %cst_241 = arith.constant 0.353553385 : f32
    %608 = vector.broadcast %cst_241 : f32 to vector<8x8xf32>
    %609 = arith.mulf %607, %608 : vector<8x8xf32>
    %610 = arith.addf %609, %585 : vector<8x8xf32>
    %cst_242 = arith.constant dense<0xFF800000> : vector<8xf32>
    %611 = vector.multi_reduction <maximumf>, %610, %cst_242 [1] : vector<8x8xf32> to vector<8xf32>
    %612 = vector.shape_cast %611 : vector<8xf32> to vector<8x1xf32>
    %613 = vector.broadcast %612 : vector<8x1xf32> to vector<8x8xf32>
    %614 = arith.subf %610, %613 : vector<8x8xf32>
    %615 = math.exp %614 : vector<8x8xf32>
    %cst_243 = arith.constant dense<0.000000e+00> : vector<8xf32>
    %616 = vector.multi_reduction <add>, %615, %cst_243 [1] : vector<8x8xf32> to vector<8xf32>
    %617 = vector.shape_cast %616 : vector<8xf32> to vector<8x1xf32>
    %618 = tpu.reciprocal %617 {approx = true} : vector<8x1xf32> -> vector<8x1xf32>
    %619 = vector.broadcast %618 : vector<8x1xf32> to vector<8x8xf32>
    %620 = arith.mulf %615, %619 : vector<8x8xf32>
    %cst_244 = arith.constant dense<0.000000e+00> : vector<8x8xf32>
    %621 = tpu.matmul %620, %606, %cst_244 {dimension_numbers = #tpu.dot_dimension_numbers<[1], [0], [0], [1], [0, 0, 1, 1], [], []>} : vector<8x8xf32>, vector<8x8xf32>, vector<8x8xf32> -> vector<8x8xf32>
    %622 = vector.extract_strided_slice %547 {offsets = [0, 16], sizes = [8, 8], strides = [1, 1]} : vector<8x96xf32> to vector<8x8xf32>
    %623 = vector.extract_strided_slice %547 {offsets = [0, 48], sizes = [8, 8], strides = [1, 1]} : vector<8x96xf32> to vector<8x8xf32>
    %624 = vector.extract_strided_slice %547 {offsets = [0, 80], sizes = [8, 8], strides = [1, 1]} : vector<8x96xf32> to vector<8x8xf32>
    %cst_245 = arith.constant dense<0.000000e+00> : vector<8x8xf32>
    %625 = tpu.matmul %622, %623, %cst_245 {dimension_numbers = #tpu.dot_dimension_numbers<[1], [1], [0], [0], [0, 0, 1, 0], [], []>} : vector<8x8xf32>, vector<8x8xf32>, vector<8x8xf32> -> vector<8x8xf32>
    %cst_246 = arith.constant 0.353553385 : f32
    %626 = vector.broadcast %cst_246 : f32 to vector<8x8xf32>
    %627 = arith.mulf %625, %626 : vector<8x8xf32>
    %628 = arith.addf %627, %585 : vector<8x8xf32>
    %cst_247 = arith.constant dense<0xFF800000> : vector<8xf32>
    %629 = vector.multi_reduction <maximumf>, %628, %cst_247 [1] : vector<8x8xf32> to vector<8xf32>
    %630 = vector.shape_cast %629 : vector<8xf32> to vector<8x1xf32>
    %631 = vector.broadcast %630 : vector<8x1xf32> to vector<8x8xf32>
    %632 = arith.subf %628, %631 : vector<8x8xf32>
    %633 = math.exp %632 : vector<8x8xf32>
    %cst_248 = arith.constant dense<0.000000e+00> : vector<8xf32>
    %634 = vector.multi_reduction <add>, %633, %cst_248 [1] : vector<8x8xf32> to vector<8xf32>
    %635 = vector.shape_cast %634 : vector<8xf32> to vector<8x1xf32>
    %636 = tpu.reciprocal %635 {approx = true} : vector<8x1xf32> -> vector<8x1xf32>
    %637 = vector.broadcast %636 : vector<8x1xf32> to vector<8x8xf32>
    %638 = arith.mulf %633, %637 : vector<8x8xf32>
    %cst_249 = arith.constant dense<0.000000e+00> : vector<8x8xf32>
    %639 = tpu.matmul %638, %624, %cst_249 {dimension_numbers = #tpu.dot_dimension_numbers<[1], [0], [0], [1], [0, 0, 1, 1], [], []>} : vector<8x8xf32>, vector<8x8xf32>, vector<8x8xf32> -> vector<8x8xf32>
    %640 = vector.extract_strided_slice %547 {offsets = [0, 24], sizes = [8, 8], strides = [1, 1]} : vector<8x96xf32> to vector<8x8xf32>
    %641 = vector.extract_strided_slice %547 {offsets = [0, 56], sizes = [8, 8], strides = [1, 1]} : vector<8x96xf32> to vector<8x8xf32>
    %642 = vector.extract_strided_slice %547 {offsets = [0, 88], sizes = [8, 8], strides = [1, 1]} : vector<8x96xf32> to vector<8x8xf32>
    %cst_250 = arith.constant dense<0.000000e+00> : vector<8x8xf32>
    %643 = tpu.matmul %640, %641, %cst_250 {dimension_numbers = #tpu.dot_dimension_numbers<[1], [1], [0], [0], [0, 0, 1, 0], [], []>} : vector<8x8xf32>, vector<8x8xf32>, vector<8x8xf32> -> vector<8x8xf32>
    %cst_251 = arith.constant 0.353553385 : f32
    %644 = vector.broadcast %cst_251 : f32 to vector<8x8xf32>
    %645 = arith.mulf %643, %644 : vector<8x8xf32>
    %646 = arith.addf %645, %585 : vector<8x8xf32>
    %cst_252 = arith.constant dense<0xFF800000> : vector<8xf32>
    %647 = vector.multi_reduction <maximumf>, %646, %cst_252 [1] : vector<8x8xf32> to vector<8xf32>
    %648 = vector.shape_cast %647 : vector<8xf32> to vector<8x1xf32>
    %649 = vector.broadcast %648 : vector<8x1xf32> to vector<8x8xf32>
    %650 = arith.subf %646, %649 : vector<8x8xf32>
    %651 = math.exp %650 : vector<8x8xf32>
    %cst_253 = arith.constant dense<0.000000e+00> : vector<8xf32>
    %652 = vector.multi_reduction <add>, %651, %cst_253 [1] : vector<8x8xf32> to vector<8xf32>
    %653 = vector.shape_cast %652 : vector<8xf32> to vector<8x1xf32>
    %654 = tpu.reciprocal %653 {approx = true} : vector<8x1xf32> -> vector<8x1xf32>
    %655 = vector.broadcast %654 : vector<8x1xf32> to vector<8x8xf32>
    %656 = arith.mulf %651, %655 : vector<8x8xf32>
    %cst_254 = arith.constant dense<0.000000e+00> : vector<8x8xf32>
    %657 = tpu.matmul %656, %642, %cst_254 {dimension_numbers = #tpu.dot_dimension_numbers<[1], [0], [0], [1], [0, 0, 1, 1], [], []>} : vector<8x8xf32>, vector<8x8xf32>, vector<8x8xf32> -> vector<8x8xf32>
    %658 = tpu.concatenate %603, %621, %639, %657 in 1 : vector<8x8xf32>, vector<8x8xf32>, vector<8x8xf32>, vector<8x8xf32> -> vector<8x32xf32>
    %c512_255 = arith.constant 512 : index
    %c0_256 = arith.constant 0 : index
    %659 = vector.load %arg5[%c512_255, %c0_256] : memref<704x128xf32, #tpu.memory_space<vmem>>, vector<32x32xf32>
    %cst_257 = arith.constant dense<0.000000e+00> : vector<8x32xf32>
    %660 = tpu.matmul %658, %659, %cst_257 {dimension_numbers = #tpu.dot_dimension_numbers<[1], [0], [0], [1], [0, 0, 1, 1], [], []>} : vector<8x32xf32>, vector<32x32xf32>, vector<8x32xf32> -> vector<8x32xf32>
    %c12_258 = arith.constant 12 : index
    %c0_259 = arith.constant 0 : index
    %661 = vector.load %arg6[%c12_258, %c0_259] : memref<16x128xf32, #tpu.memory_space<vmem>>, vector<1x32xf32>
    %662 = vector.broadcast %661 : vector<1x32xf32> to vector<8x32xf32>
    %663 = arith.addf %660, %662 : vector<8x32xf32>
    %664 = vector.extract_strided_slice %663 {offsets = [0, 0], sizes = [4, 32], strides = [1, 1]} : vector<8x32xf32> to vector<4x32xf32>
    %665 = vector.extract_strided_slice %663 {offsets = [4, 0], sizes = [4, 32], strides = [1, 1]} : vector<8x32xf32> to vector<4x32xf32>
    %666 = arith.maximumf %664, %665 : vector<4x32xf32>
    %c544_260 = arith.constant 544 : index
    %c0_261 = arith.constant 0 : index
    %667 = vector.load %arg5[%c544_260, %c0_261] : memref<704x128xf32, #tpu.memory_space<vmem>>, vector<32x128xf32>
    %cst_262 = arith.constant dense<0.000000e+00> : vector<4x128xf32>
    %668 = tpu.matmul %666, %667, %cst_262 {dimension_numbers = #tpu.dot_dimension_numbers<[1], [0], [0], [1], [0, 0, 1, 1], [], []>} : vector<4x32xf32>, vector<32x128xf32>, vector<4x128xf32> -> vector<4x128xf32>
    %c13_263 = arith.constant 13 : index
    %c0_264 = arith.constant 0 : index
    %669 = vector.load %arg6[%c13_263, %c0_264] : memref<16x128xf32, #tpu.memory_space<vmem>>, vector<1x128xf32>
    %670 = vector.broadcast %669 : vector<1x128xf32> to vector<4x128xf32>
    %671 = arith.addf %668, %670 : vector<4x128xf32>
    %cst_265 = arith.constant 0.000000e+00 : f32
    %672 = vector.broadcast %cst_265 : f32 to vector<4x128xf32>
    %673 = arith.maximumf %671, %672 : vector<4x128xf32>
    %c576_266 = arith.constant 576 : index
    %c0_267 = arith.constant 0 : index
    %674 = vector.load %arg5[%c576_266, %c0_267] : memref<704x128xf32, #tpu.memory_space<vmem>>, vector<128x32xf32>
    %cst_268 = arith.constant dense<0.000000e+00> : vector<4x32xf32>
    %675 = tpu.matmul %673, %674, %cst_268 {dimension_numbers = #tpu.dot_dimension_numbers<[1], [0], [0], [1], [0, 0, 1, 1], [], []>} : vector<4x128xf32>, vector<128x32xf32>, vector<4x32xf32> -> vector<4x32xf32>
    %c14_269 = arith.constant 14 : index
    %c0_270 = arith.constant 0 : index
    %676 = vector.load %arg6[%c14_269, %c0_270] : memref<16x128xf32, #tpu.memory_space<vmem>>, vector<1x32xf32>
    %677 = vector.broadcast %676 : vector<1x32xf32> to vector<4x32xf32>
    %678 = arith.addf %675, %677 : vector<4x32xf32>
    %679 = arith.subf %678, %542 : vector<4x32xf32>
    %680 = arith.mulf %679, %679 : vector<4x32xf32>
    %cst_271 = arith.constant dense<0.000000e+00> : vector<4xf32>
    %681 = vector.multi_reduction <add>, %680, %cst_271 [1] : vector<4x32xf32> to vector<4xf32>
    %682 = vector.shape_cast %681 : vector<4xf32> to vector<4x1xf32>
    %cst_272 = arith.constant dense<0.000000e+00> : vector<1xf32>
    %683 = vector.multi_reduction <add>, %682, %cst_272 [0] : vector<4x1xf32> to vector<1xf32>
    %684 = vector.shape_cast %683 : vector<1xf32> to vector<1x1xf32>
    %cst_273 = arith.constant 7.812500e-03 : f32
    %685 = vector.broadcast %cst_273 : f32 to vector<1x1xf32>
    %686 = arith.mulf %684, %685 : vector<1x1xf32>
    %c184 = arith.constant 184 : index
    %c0_274 = arith.constant 0 : index
    %687 = vector.load %arg5[%c184, %c0_274] : memref<704x128xf32, #tpu.memory_space<vmem>>, vector<32x32xf32>
    %cst_275 = arith.constant dense<0.000000e+00> : vector<4x32xf32>
    %688 = tpu.matmul %542, %687, %cst_275 {dimension_numbers = #tpu.dot_dimension_numbers<[1], [0], [0], [1], [0, 0, 1, 1], [], []>} : vector<4x32xf32>, vector<32x32xf32>, vector<4x32xf32> -> vector<4x32xf32>
    %c4_276 = arith.constant 4 : index
    %c0_277 = arith.constant 0 : index
    %689 = vector.load %arg6[%c4_276, %c0_277] : memref<16x128xf32, #tpu.memory_space<vmem>>, vector<1x32xf32>
    %690 = vector.broadcast %689 : vector<1x32xf32> to vector<4x32xf32>
    %691 = arith.addf %688, %690 : vector<4x32xf32>
    %cst_278 = arith.constant 0.000000e+00 : f32
    %692 = vector.broadcast %cst_278 : f32 to vector<4x32xf32>
    %693 = arith.maximumf %691, %692 : vector<4x32xf32>
    %c216 = arith.constant 216 : index
    %c0_279 = arith.constant 0 : index
    %694 = vector.load %arg5[%c216, %c0_279] : memref<704x128xf32, #tpu.memory_space<vmem>>, vector<32x48xf32>
    %cst_280 = arith.constant dense<0.000000e+00> : vector<4x48xf32>
    %695 = tpu.matmul %693, %694, %cst_280 {dimension_numbers = #tpu.dot_dimension_numbers<[1], [0], [0], [1], [0, 0, 1, 1], [], []>} : vector<4x32xf32>, vector<32x48xf32>, vector<4x48xf32> -> vector<4x48xf32>
    %c5_281 = arith.constant 5 : index
    %c0_282 = arith.constant 0 : index
    %696 = vector.load %arg6[%c5_281, %c0_282] : memref<16x128xf32, #tpu.memory_space<vmem>>, vector<1x48xf32>
    %697 = vector.broadcast %696 : vector<1x48xf32> to vector<4x48xf32>
    %698 = arith.addf %695, %697 : vector<4x48xf32>
    %cst_283 = arith.constant 0.000000e+00 : f32
    %699 = vector.broadcast %cst_283 : f32 to vector<4x48xf32>
    %700 = arith.maximumf %698, %699 : vector<4x48xf32>
    %c248 = arith.constant 248 : index
    %c0_284 = arith.constant 0 : index
    %701 = vector.load %arg5[%c248, %c0_284] : memref<704x128xf32, #tpu.memory_space<vmem>>, vector<48x64xf32>
    %cst_285 = arith.constant dense<0.000000e+00> : vector<4x64xf32>
    %702 = tpu.matmul %700, %701, %cst_285 {dimension_numbers = #tpu.dot_dimension_numbers<[1], [0], [0], [1], [0, 0, 1, 1], [], []>} : vector<4x48xf32>, vector<48x64xf32>, vector<4x64xf32> -> vector<4x64xf32>
    %c6_286 = arith.constant 6 : index
    %c0_287 = arith.constant 0 : index
    %703 = vector.load %arg6[%c6_286, %c0_287] : memref<16x128xf32, #tpu.memory_space<vmem>>, vector<1x64xf32>
    %704 = vector.broadcast %703 : vector<1x64xf32> to vector<4x64xf32>
    %705 = arith.addf %702, %704 : vector<4x64xf32>
    %cst_288 = arith.constant 0.000000e+00 : f32
    %706 = vector.broadcast %cst_288 : f32 to vector<4x64xf32>
    %707 = arith.maximumf %705, %706 : vector<4x64xf32>
    %c296 = arith.constant 296 : index
    %c0_289 = arith.constant 0 : index
    %708 = vector.load %arg5[%c296, %c0_289] : memref<704x128xf32, #tpu.memory_space<vmem>>, vector<64x40xf32>
    %cst_290 = arith.constant dense<0.000000e+00> : vector<4x40xf32>
    %709 = tpu.matmul %707, %708, %cst_290 {dimension_numbers = #tpu.dot_dimension_numbers<[1], [0], [0], [1], [0, 0, 1, 1], [], []>} : vector<4x64xf32>, vector<64x40xf32>, vector<4x40xf32> -> vector<4x40xf32>
    %c7_291 = arith.constant 7 : index
    %c0_292 = arith.constant 0 : index
    %710 = vector.load %arg6[%c7_291, %c0_292] : memref<16x128xf32, #tpu.memory_space<vmem>>, vector<1x40xf32>
    %711 = vector.broadcast %710 : vector<1x40xf32> to vector<4x40xf32>
    %712 = arith.addf %709, %711 : vector<4x40xf32>
    %cst_293 = arith.constant 0.000000e+00 : f32
    %713 = vector.broadcast %cst_293 : f32 to vector<4x40xf32>
    %714 = arith.maximumf %712, %713 : vector<4x40xf32>
    %c360 = arith.constant 360 : index
    %c0_294 = arith.constant 0 : index
    %715 = vector.load %arg5[%c360, %c0_294] : memref<704x128xf32, #tpu.memory_space<vmem>>, vector<40x40xf32>
    %cst_295 = arith.constant dense<0.000000e+00> : vector<4x40xf32>
    %716 = tpu.matmul %714, %715, %cst_295 {dimension_numbers = #tpu.dot_dimension_numbers<[1], [0], [0], [1], [0, 0, 1, 1], [], []>} : vector<4x40xf32>, vector<40x40xf32>, vector<4x40xf32> -> vector<4x40xf32>
    %c8_296 = arith.constant 8 : index
    %c0_297 = arith.constant 0 : index
    %717 = vector.load %arg6[%c8_296, %c0_297] : memref<16x128xf32, #tpu.memory_space<vmem>>, vector<1x40xf32>
    %718 = vector.broadcast %717 : vector<1x40xf32> to vector<4x40xf32>
    %719 = arith.addf %716, %718 : vector<4x40xf32>
    %cst_298 = arith.constant 0.000000e+00 : f32
    %720 = vector.broadcast %cst_298 : f32 to vector<4x40xf32>
    %721 = arith.subf %720, %719 : vector<4x40xf32>
    %722 = math.exp %721 : vector<4x40xf32>
    %cst_299 = arith.constant 1.000000e+00 : f32
    %723 = vector.broadcast %cst_299 : f32 to vector<4x40xf32>
    %724 = arith.addf %723, %722 : vector<4x40xf32>
    %725 = tpu.reciprocal %724 {approx = true} : vector<4x40xf32> -> vector<4x40xf32>
    %cst_300 = arith.constant 0.000000e+00 : f32
    %726 = vector.broadcast %cst_300 : f32 to vector<4x40xf32>
    %727 = arith.subf %726, %725 : vector<4x40xf32>
    %728 = math.exp %727 : vector<4x40xf32>
    %cst_301 = arith.constant 1.000000e+00 : f32
    %729 = vector.broadcast %cst_301 : f32 to vector<4x40xf32>
    %730 = arith.addf %729, %728 : vector<4x40xf32>
    %731 = tpu.reciprocal %730 {approx = true} : vector<4x40xf32> -> vector<4x40xf32>
    %c400 = arith.constant 400 : index
    %c0_302 = arith.constant 0 : index
    %732 = vector.load %arg5[%c400, %c0_302] : memref<704x128xf32, #tpu.memory_space<vmem>>, vector<40x40xf32>
    %cst_303 = arith.constant dense<0.000000e+00> : vector<4x40xf32>
    %733 = tpu.matmul %714, %732, %cst_303 {dimension_numbers = #tpu.dot_dimension_numbers<[1], [0], [0], [1], [0, 0, 1, 1], [], []>} : vector<4x40xf32>, vector<40x40xf32>, vector<4x40xf32> -> vector<4x40xf32>
    %c9_304 = arith.constant 9 : index
    %c0_305 = arith.constant 0 : index
    %734 = vector.load %arg6[%c9_304, %c0_305] : memref<16x128xf32, #tpu.memory_space<vmem>>, vector<1x40xf32>
    %735 = vector.broadcast %734 : vector<1x40xf32> to vector<4x40xf32>
    %736 = arith.addf %733, %735 : vector<4x40xf32>
    %cst_306 = arith.constant 9.99999974E-5 : f32
    %cst_307 = arith.constant 1.000000e+04 : f32
    %737 = vector.broadcast %cst_306 : f32 to vector<4x40xf32>
    %738 = arith.maximumf %737, %736 : vector<4x40xf32>
    %739 = vector.broadcast %cst_307 : f32 to vector<4x40xf32>
    %740 = arith.minimumf %739, %738 : vector<4x40xf32>
    %c440 = arith.constant 440 : index
    %c0_308 = arith.constant 0 : index
    %741 = vector.load %arg5[%c440, %c0_308] : memref<704x128xf32, #tpu.memory_space<vmem>>, vector<40x40xf32>
    %cst_309 = arith.constant dense<0.000000e+00> : vector<4x40xf32>
    %742 = tpu.matmul %714, %741, %cst_309 {dimension_numbers = #tpu.dot_dimension_numbers<[1], [0], [0], [1], [0, 0, 1, 1], [], []>} : vector<4x40xf32>, vector<40x40xf32>, vector<4x40xf32> -> vector<4x40xf32>
    %c10_310 = arith.constant 10 : index
    %c0_311 = arith.constant 0 : index
    %743 = vector.load %arg6[%c10_310, %c0_311] : memref<16x128xf32, #tpu.memory_space<vmem>>, vector<1x40xf32>
    %744 = vector.broadcast %743 : vector<1x40xf32> to vector<4x40xf32>
    %745 = arith.addf %742, %744 : vector<4x40xf32>
    %746 = math.exp %745 : vector<4x40xf32>
    %cst_312 = arith.constant 9.99999974E-6 : f32
    %cst_313 = arith.constant 1.000000e+06 : f32
    %747 = vector.broadcast %cst_312 : f32 to vector<4x40xf32>
    %748 = arith.maximumf %747, %746 : vector<4x40xf32>
    %749 = vector.broadcast %cst_313 : f32 to vector<4x40xf32>
    %750 = arith.minimumf %749, %748 : vector<4x40xf32>
    %751 = arith.mulf %750, %512 : vector<4x40xf32>
    %cst_314 = arith.constant 0.000000e+00 : f32
    %752 = vector.broadcast %cst_314 : f32 to vector<4x40xf32>
    %753 = arith.maximumf %751, %752 : vector<4x40xf32>
    %cst_315 = arith.constant 9.99999974E-5 : f32
    %754 = vector.broadcast %cst_315 : f32 to vector<4x40xf32>
    %755 = arith.maximumf %511, %754 : vector<4x40xf32>
    %cst_316 = arith.constant 1.000000e+06 : f32
    %756 = vector.broadcast %cst_316 : f32 to vector<4x40xf32>
    %757 = arith.minimumf %740, %756 : vector<4x40xf32>
    %cst_317 = arith.constant 9.99999993E-9 : f32
    %758 = vector.broadcast %cst_317 : f32 to vector<4x40xf32>
    %759 = arith.addf %757, %758 : vector<4x40xf32>
    %cst_318 = arith.constant 1.000000e+00 : f32
    %760 = vector.broadcast %cst_318 : f32 to vector<4x40xf32>
    %761 = arith.subf %759, %760 : vector<4x40xf32>
    %cst_319 = arith.constant 1.000000e+00 : f32
    %762 = vector.broadcast %cst_319 : f32 to vector<4x40xf32>
    %cst_320 = arith.constant 1.000000e+00 : f32
    %763 = vector.broadcast %cst_320 : f32 to vector<4x40xf32>
    %764 = arith.addf %761, %763 : vector<4x40xf32>
    %765 = tpu.reciprocal %764 {approx = true} : vector<4x40xf32> -> vector<4x40xf32>
    %cst_321 = arith.constant 676.520386 : f32
    %766 = vector.broadcast %cst_321 : f32 to vector<4x40xf32>
    %767 = arith.mulf %766, %765 : vector<4x40xf32>
    %768 = arith.addf %762, %767 : vector<4x40xf32>
    %cst_322 = arith.constant 2.000000e+00 : f32
    %769 = vector.broadcast %cst_322 : f32 to vector<4x40xf32>
    %770 = arith.addf %761, %769 : vector<4x40xf32>
    %771 = tpu.reciprocal %770 {approx = true} : vector<4x40xf32> -> vector<4x40xf32>
    %cst_323 = arith.constant -1259.13916 : f32
    %772 = vector.broadcast %cst_323 : f32 to vector<4x40xf32>
    %773 = arith.mulf %772, %771 : vector<4x40xf32>
    %774 = arith.addf %768, %773 : vector<4x40xf32>
    %cst_324 = arith.constant 3.000000e+00 : f32
    %775 = vector.broadcast %cst_324 : f32 to vector<4x40xf32>
    %776 = arith.addf %761, %775 : vector<4x40xf32>
    %777 = tpu.reciprocal %776 {approx = true} : vector<4x40xf32> -> vector<4x40xf32>
    %cst_325 = arith.constant 771.323425 : f32
    %778 = vector.broadcast %cst_325 : f32 to vector<4x40xf32>
    %779 = arith.mulf %778, %777 : vector<4x40xf32>
    %780 = arith.addf %774, %779 : vector<4x40xf32>
    %cst_326 = arith.constant 4.000000e+00 : f32
    %781 = vector.broadcast %cst_326 : f32 to vector<4x40xf32>
    %782 = arith.addf %761, %781 : vector<4x40xf32>
    %783 = tpu.reciprocal %782 {approx = true} : vector<4x40xf32> -> vector<4x40xf32>
    %cst_327 = arith.constant -176.615036 : f32
    %784 = vector.broadcast %cst_327 : f32 to vector<4x40xf32>
    %785 = arith.mulf %784, %783 : vector<4x40xf32>
    %786 = arith.addf %780, %785 : vector<4x40xf32>
    %cst_328 = arith.constant 5.000000e+00 : f32
    %787 = vector.broadcast %cst_328 : f32 to vector<4x40xf32>
    %788 = arith.addf %761, %787 : vector<4x40xf32>
    %789 = tpu.reciprocal %788 {approx = true} : vector<4x40xf32> -> vector<4x40xf32>
    %cst_329 = arith.constant 12.5073433 : f32
    %790 = vector.broadcast %cst_329 : f32 to vector<4x40xf32>
    %791 = arith.mulf %790, %789 : vector<4x40xf32>
    %792 = arith.addf %786, %791 : vector<4x40xf32>
    %cst_330 = arith.constant 6.000000e+00 : f32
    %793 = vector.broadcast %cst_330 : f32 to vector<4x40xf32>
    %794 = arith.addf %761, %793 : vector<4x40xf32>
    %795 = tpu.reciprocal %794 {approx = true} : vector<4x40xf32> -> vector<4x40xf32>
    %cst_331 = arith.constant -0.138571098 : f32
    %796 = vector.broadcast %cst_331 : f32 to vector<4x40xf32>
    %797 = arith.mulf %796, %795 : vector<4x40xf32>
    %798 = arith.addf %792, %797 : vector<4x40xf32>
    %cst_332 = arith.constant 7.000000e+00 : f32
    %799 = vector.broadcast %cst_332 : f32 to vector<4x40xf32>
    %800 = arith.addf %761, %799 : vector<4x40xf32>
    %801 = tpu.reciprocal %800 {approx = true} : vector<4x40xf32> -> vector<4x40xf32>
    %cst_333 = arith.constant 9.98436917E-6 : f32
    %802 = vector.broadcast %cst_333 : f32 to vector<4x40xf32>
    %803 = arith.mulf %802, %801 : vector<4x40xf32>
    %804 = arith.addf %798, %803 : vector<4x40xf32>
    %cst_334 = arith.constant 8.000000e+00 : f32
    %805 = vector.broadcast %cst_334 : f32 to vector<4x40xf32>
    %806 = arith.addf %761, %805 : vector<4x40xf32>
    %807 = tpu.reciprocal %806 {approx = true} : vector<4x40xf32> -> vector<4x40xf32>
    %cst_335 = arith.constant 1.50563267E-7 : f32
    %808 = vector.broadcast %cst_335 : f32 to vector<4x40xf32>
    %809 = arith.mulf %808, %807 : vector<4x40xf32>
    %810 = arith.addf %804, %809 : vector<4x40xf32>
    %cst_336 = arith.constant 7.000000e+00 : f32
    %811 = vector.broadcast %cst_336 : f32 to vector<4x40xf32>
    %812 = arith.addf %761, %811 : vector<4x40xf32>
    %cst_337 = arith.constant 5.000000e-01 : f32
    %813 = vector.broadcast %cst_337 : f32 to vector<4x40xf32>
    %814 = arith.addf %812, %813 : vector<4x40xf32>
    %cst_338 = arith.constant 5.000000e-01 : f32
    %815 = vector.broadcast %cst_338 : f32 to vector<4x40xf32>
    %816 = arith.addf %761, %815 : vector<4x40xf32>
    %817 = math.log %814 : vector<4x40xf32>
    %818 = arith.mulf %816, %817 : vector<4x40xf32>
    %cst_339 = arith.constant 0.918938517 : f32
    %819 = vector.broadcast %cst_339 : f32 to vector<4x40xf32>
    %820 = arith.addf %819, %818 : vector<4x40xf32>
    %821 = arith.subf %820, %814 : vector<4x40xf32>
    %822 = math.log %810 : vector<4x40xf32>
    %823 = arith.addf %821, %822 : vector<4x40xf32>
    %cst_340 = arith.constant 1.000000e+00 : f32
    %824 = vector.broadcast %cst_340 : f32 to vector<4x40xf32>
    %825 = arith.addf %755, %824 : vector<4x40xf32>
    %cst_341 = arith.constant 1.000000e+00 : f32
    %826 = vector.broadcast %cst_341 : f32 to vector<4x40xf32>
    %827 = arith.subf %825, %826 : vector<4x40xf32>
    %cst_342 = arith.constant 1.000000e+00 : f32
    %828 = vector.broadcast %cst_342 : f32 to vector<4x40xf32>
    %cst_343 = arith.constant 1.000000e+00 : f32
    %829 = vector.broadcast %cst_343 : f32 to vector<4x40xf32>
    %830 = arith.addf %827, %829 : vector<4x40xf32>
    %831 = tpu.reciprocal %830 {approx = true} : vector<4x40xf32> -> vector<4x40xf32>
    %cst_344 = arith.constant 676.520386 : f32
    %832 = vector.broadcast %cst_344 : f32 to vector<4x40xf32>
    %833 = arith.mulf %832, %831 : vector<4x40xf32>
    %834 = arith.addf %828, %833 : vector<4x40xf32>
    %cst_345 = arith.constant 2.000000e+00 : f32
    %835 = vector.broadcast %cst_345 : f32 to vector<4x40xf32>
    %836 = arith.addf %827, %835 : vector<4x40xf32>
    %837 = tpu.reciprocal %836 {approx = true} : vector<4x40xf32> -> vector<4x40xf32>
    %cst_346 = arith.constant -1259.13916 : f32
    %838 = vector.broadcast %cst_346 : f32 to vector<4x40xf32>
    %839 = arith.mulf %838, %837 : vector<4x40xf32>
    %840 = arith.addf %834, %839 : vector<4x40xf32>
    %cst_347 = arith.constant 3.000000e+00 : f32
    %841 = vector.broadcast %cst_347 : f32 to vector<4x40xf32>
    %842 = arith.addf %827, %841 : vector<4x40xf32>
    %843 = tpu.reciprocal %842 {approx = true} : vector<4x40xf32> -> vector<4x40xf32>
    %cst_348 = arith.constant 771.323425 : f32
    %844 = vector.broadcast %cst_348 : f32 to vector<4x40xf32>
    %845 = arith.mulf %844, %843 : vector<4x40xf32>
    %846 = arith.addf %840, %845 : vector<4x40xf32>
    %cst_349 = arith.constant 4.000000e+00 : f32
    %847 = vector.broadcast %cst_349 : f32 to vector<4x40xf32>
    %848 = arith.addf %827, %847 : vector<4x40xf32>
    %849 = tpu.reciprocal %848 {approx = true} : vector<4x40xf32> -> vector<4x40xf32>
    %cst_350 = arith.constant -176.615036 : f32
    %850 = vector.broadcast %cst_350 : f32 to vector<4x40xf32>
    %851 = arith.mulf %850, %849 : vector<4x40xf32>
    %852 = arith.addf %846, %851 : vector<4x40xf32>
    %cst_351 = arith.constant 5.000000e+00 : f32
    %853 = vector.broadcast %cst_351 : f32 to vector<4x40xf32>
    %854 = arith.addf %827, %853 : vector<4x40xf32>
    %855 = tpu.reciprocal %854 {approx = true} : vector<4x40xf32> -> vector<4x40xf32>
    %cst_352 = arith.constant 12.5073433 : f32
    %856 = vector.broadcast %cst_352 : f32 to vector<4x40xf32>
    %857 = arith.mulf %856, %855 : vector<4x40xf32>
    %858 = arith.addf %852, %857 : vector<4x40xf32>
    %cst_353 = arith.constant 6.000000e+00 : f32
    %859 = vector.broadcast %cst_353 : f32 to vector<4x40xf32>
    %860 = arith.addf %827, %859 : vector<4x40xf32>
    %861 = tpu.reciprocal %860 {approx = true} : vector<4x40xf32> -> vector<4x40xf32>
    %cst_354 = arith.constant -0.138571098 : f32
    %862 = vector.broadcast %cst_354 : f32 to vector<4x40xf32>
    %863 = arith.mulf %862, %861 : vector<4x40xf32>
    %864 = arith.addf %858, %863 : vector<4x40xf32>
    %cst_355 = arith.constant 7.000000e+00 : f32
    %865 = vector.broadcast %cst_355 : f32 to vector<4x40xf32>
    %866 = arith.addf %827, %865 : vector<4x40xf32>
    %867 = tpu.reciprocal %866 {approx = true} : vector<4x40xf32> -> vector<4x40xf32>
    %cst_356 = arith.constant 9.98436917E-6 : f32
    %868 = vector.broadcast %cst_356 : f32 to vector<4x40xf32>
    %869 = arith.mulf %868, %867 : vector<4x40xf32>
    %870 = arith.addf %864, %869 : vector<4x40xf32>
    %cst_357 = arith.constant 8.000000e+00 : f32
    %871 = vector.broadcast %cst_357 : f32 to vector<4x40xf32>
    %872 = arith.addf %827, %871 : vector<4x40xf32>
    %873 = tpu.reciprocal %872 {approx = true} : vector<4x40xf32> -> vector<4x40xf32>
    %cst_358 = arith.constant 1.50563267E-7 : f32
    %874 = vector.broadcast %cst_358 : f32 to vector<4x40xf32>
    %875 = arith.mulf %874, %873 : vector<4x40xf32>
    %876 = arith.addf %870, %875 : vector<4x40xf32>
    %cst_359 = arith.constant 7.000000e+00 : f32
    %877 = vector.broadcast %cst_359 : f32 to vector<4x40xf32>
    %878 = arith.addf %827, %877 : vector<4x40xf32>
    %cst_360 = arith.constant 5.000000e-01 : f32
    %879 = vector.broadcast %cst_360 : f32 to vector<4x40xf32>
    %880 = arith.addf %878, %879 : vector<4x40xf32>
    %cst_361 = arith.constant 5.000000e-01 : f32
    %881 = vector.broadcast %cst_361 : f32 to vector<4x40xf32>
    %882 = arith.addf %827, %881 : vector<4x40xf32>
    %883 = math.log %880 : vector<4x40xf32>
    %884 = arith.mulf %882, %883 : vector<4x40xf32>
    %cst_362 = arith.constant 0.918938517 : f32
    %885 = vector.broadcast %cst_362 : f32 to vector<4x40xf32>
    %886 = arith.addf %885, %884 : vector<4x40xf32>
    %887 = arith.subf %886, %880 : vector<4x40xf32>
    %888 = math.log %876 : vector<4x40xf32>
    %889 = arith.addf %887, %888 : vector<4x40xf32>
    %890 = arith.addf %823, %889 : vector<4x40xf32>
    %891 = arith.addf %755, %757 : vector<4x40xf32>
    %cst_363 = arith.constant 9.99999993E-9 : f32
    %892 = vector.broadcast %cst_363 : f32 to vector<4x40xf32>
    %893 = arith.addf %891, %892 : vector<4x40xf32>
    %cst_364 = arith.constant 1.000000e+00 : f32
    %894 = vector.broadcast %cst_364 : f32 to vector<4x40xf32>
    %895 = arith.subf %893, %894 : vector<4x40xf32>
    %cst_365 = arith.constant 1.000000e+00 : f32
    %896 = vector.broadcast %cst_365 : f32 to vector<4x40xf32>
    %cst_366 = arith.constant 1.000000e+00 : f32
    %897 = vector.broadcast %cst_366 : f32 to vector<4x40xf32>
    %898 = arith.addf %895, %897 : vector<4x40xf32>
    %899 = tpu.reciprocal %898 {approx = true} : vector<4x40xf32> -> vector<4x40xf32>
    %cst_367 = arith.constant 676.520386 : f32
    %900 = vector.broadcast %cst_367 : f32 to vector<4x40xf32>
    %901 = arith.mulf %900, %899 : vector<4x40xf32>
    %902 = arith.addf %896, %901 : vector<4x40xf32>
    %cst_368 = arith.constant 2.000000e+00 : f32
    %903 = vector.broadcast %cst_368 : f32 to vector<4x40xf32>
    %904 = arith.addf %895, %903 : vector<4x40xf32>
    %905 = tpu.reciprocal %904 {approx = true} : vector<4x40xf32> -> vector<4x40xf32>
    %cst_369 = arith.constant -1259.13916 : f32
    %906 = vector.broadcast %cst_369 : f32 to vector<4x40xf32>
    %907 = arith.mulf %906, %905 : vector<4x40xf32>
    %908 = arith.addf %902, %907 : vector<4x40xf32>
    %cst_370 = arith.constant 3.000000e+00 : f32
    %909 = vector.broadcast %cst_370 : f32 to vector<4x40xf32>
    %910 = arith.addf %895, %909 : vector<4x40xf32>
    %911 = tpu.reciprocal %910 {approx = true} : vector<4x40xf32> -> vector<4x40xf32>
    %cst_371 = arith.constant 771.323425 : f32
    %912 = vector.broadcast %cst_371 : f32 to vector<4x40xf32>
    %913 = arith.mulf %912, %911 : vector<4x40xf32>
    %914 = arith.addf %908, %913 : vector<4x40xf32>
    %cst_372 = arith.constant 4.000000e+00 : f32
    %915 = vector.broadcast %cst_372 : f32 to vector<4x40xf32>
    %916 = arith.addf %895, %915 : vector<4x40xf32>
    %917 = tpu.reciprocal %916 {approx = true} : vector<4x40xf32> -> vector<4x40xf32>
    %cst_373 = arith.constant -176.615036 : f32
    %918 = vector.broadcast %cst_373 : f32 to vector<4x40xf32>
    %919 = arith.mulf %918, %917 : vector<4x40xf32>
    %920 = arith.addf %914, %919 : vector<4x40xf32>
    %cst_374 = arith.constant 5.000000e+00 : f32
    %921 = vector.broadcast %cst_374 : f32 to vector<4x40xf32>
    %922 = arith.addf %895, %921 : vector<4x40xf32>
    %923 = tpu.reciprocal %922 {approx = true} : vector<4x40xf32> -> vector<4x40xf32>
    %cst_375 = arith.constant 12.5073433 : f32
    %924 = vector.broadcast %cst_375 : f32 to vector<4x40xf32>
    %925 = arith.mulf %924, %923 : vector<4x40xf32>
    %926 = arith.addf %920, %925 : vector<4x40xf32>
    %cst_376 = arith.constant 6.000000e+00 : f32
    %927 = vector.broadcast %cst_376 : f32 to vector<4x40xf32>
    %928 = arith.addf %895, %927 : vector<4x40xf32>
    %929 = tpu.reciprocal %928 {approx = true} : vector<4x40xf32> -> vector<4x40xf32>
    %cst_377 = arith.constant -0.138571098 : f32
    %930 = vector.broadcast %cst_377 : f32 to vector<4x40xf32>
    %931 = arith.mulf %930, %929 : vector<4x40xf32>
    %932 = arith.addf %926, %931 : vector<4x40xf32>
    %cst_378 = arith.constant 7.000000e+00 : f32
    %933 = vector.broadcast %cst_378 : f32 to vector<4x40xf32>
    %934 = arith.addf %895, %933 : vector<4x40xf32>
    %935 = tpu.reciprocal %934 {approx = true} : vector<4x40xf32> -> vector<4x40xf32>
    %cst_379 = arith.constant 9.98436917E-6 : f32
    %936 = vector.broadcast %cst_379 : f32 to vector<4x40xf32>
    %937 = arith.mulf %936, %935 : vector<4x40xf32>
    %938 = arith.addf %932, %937 : vector<4x40xf32>
    %cst_380 = arith.constant 8.000000e+00 : f32
    %939 = vector.broadcast %cst_380 : f32 to vector<4x40xf32>
    %940 = arith.addf %895, %939 : vector<4x40xf32>
    %941 = tpu.reciprocal %940 {approx = true} : vector<4x40xf32> -> vector<4x40xf32>
    %cst_381 = arith.constant 1.50563267E-7 : f32
    %942 = vector.broadcast %cst_381 : f32 to vector<4x40xf32>
    %943 = arith.mulf %942, %941 : vector<4x40xf32>
    %944 = arith.addf %938, %943 : vector<4x40xf32>
    %cst_382 = arith.constant 7.000000e+00 : f32
    %945 = vector.broadcast %cst_382 : f32 to vector<4x40xf32>
    %946 = arith.addf %895, %945 : vector<4x40xf32>
    %cst_383 = arith.constant 5.000000e-01 : f32
    %947 = vector.broadcast %cst_383 : f32 to vector<4x40xf32>
    %948 = arith.addf %946, %947 : vector<4x40xf32>
    %cst_384 = arith.constant 5.000000e-01 : f32
    %949 = vector.broadcast %cst_384 : f32 to vector<4x40xf32>
    %950 = arith.addf %895, %949 : vector<4x40xf32>
    %951 = math.log %948 : vector<4x40xf32>
    %952 = arith.mulf %950, %951 : vector<4x40xf32>
    %cst_385 = arith.constant 0.918938517 : f32
    %953 = vector.broadcast %cst_385 : f32 to vector<4x40xf32>
    %954 = arith.addf %953, %952 : vector<4x40xf32>
    %955 = arith.subf %954, %948 : vector<4x40xf32>
    %956 = math.log %944 : vector<4x40xf32>
    %957 = arith.addf %955, %956 : vector<4x40xf32>
    %958 = arith.subf %890, %957 : vector<4x40xf32>
    %959 = arith.addf %757, %755 : vector<4x40xf32>
    %cst_386 = arith.constant 9.99999993E-9 : f32
    %960 = vector.broadcast %cst_386 : f32 to vector<4x40xf32>
    %961 = arith.addf %757, %960 : vector<4x40xf32>
    %962 = tpu.reciprocal %961 {approx = true} : vector<4x40xf32> -> vector<4x40xf32>
    %963 = arith.mulf %753, %962 : vector<4x40xf32>
    %cst_387 = arith.constant 1.000000e+00 : f32
    %964 = vector.broadcast %cst_387 : f32 to vector<4x40xf32>
    %965 = arith.addf %964, %963 : vector<4x40xf32>
    %966 = math.log %965 : vector<4x40xf32>
    %967 = arith.mulf %959, %966 : vector<4x40xf32>
    %cst_388 = arith.constant 9.99999993E-9 : f32
    %968 = vector.broadcast %cst_388 : f32 to vector<4x40xf32>
    %969 = arith.addf %757, %968 : vector<4x40xf32>
    %970 = math.log %969 : vector<4x40xf32>
    %cst_389 = arith.constant 9.99999993E-9 : f32
    %971 = vector.broadcast %cst_389 : f32 to vector<4x40xf32>
    %972 = arith.addf %753, %971 : vector<4x40xf32>
    %973 = math.log %972 : vector<4x40xf32>
    %974 = arith.subf %970, %973 : vector<4x40xf32>
    %975 = arith.mulf %755, %974 : vector<4x40xf32>
    %976 = arith.addf %967, %975 : vector<4x40xf32>
    %977 = arith.addf %958, %976 : vector<4x40xf32>
    %978 = arith.cmpf one, %977, %977 : vector<4x40xf32>
    %cst_390 = arith.constant 0x7F800000 : f32
    %979 = vector.broadcast %cst_390 : f32 to vector<4x40xf32>
    %980 = arith.select %978, %979, %977 : vector<4x40xi1>, vector<4x40xf32>
    %cst_391 = arith.constant 1.000000e+00 : f32
    %981 = vector.broadcast %cst_391 : f32 to vector<4x40xf32>
    %982 = arith.subf %981, %731 : vector<4x40xf32>
    %cst_392 = arith.constant 9.99999993E-9 : f32
    %983 = vector.broadcast %cst_392 : f32 to vector<4x40xf32>
    %984 = arith.addf %982, %983 : vector<4x40xf32>
    %985 = math.log %984 : vector<4x40xf32>
    %986 = arith.subf %980, %985 : vector<4x40xf32>
    %987 = arith.addf %757, %753 : vector<4x40xf32>
    %cst_393 = arith.constant 9.99999993E-9 : f32
    %988 = vector.broadcast %cst_393 : f32 to vector<4x40xf32>
    %989 = arith.addf %987, %988 : vector<4x40xf32>
    %990 = tpu.reciprocal %989 {approx = true} : vector<4x40xf32> -> vector<4x40xf32>
    %991 = arith.mulf %757, %990 : vector<4x40xf32>
    %992 = math.log %991 : vector<4x40xf32>
    %993 = arith.mulf %757, %992 : vector<4x40xf32>
    %994 = math.exp %993 : vector<4x40xf32>
    %cst_394 = arith.constant 1.000000e+00 : f32
    %995 = vector.broadcast %cst_394 : f32 to vector<4x40xf32>
    %996 = arith.subf %995, %731 : vector<4x40xf32>
    %997 = arith.mulf %996, %994 : vector<4x40xf32>
    %998 = arith.addf %731, %997 : vector<4x40xf32>
    %cst_395 = arith.constant 9.99999993E-9 : f32
    %999 = vector.broadcast %cst_395 : f32 to vector<4x40xf32>
    %1000 = arith.addf %998, %999 : vector<4x40xf32>
    %1001 = math.log %1000 : vector<4x40xf32>
    %cst_396 = arith.constant 0.000000e+00 : f32
    %1002 = vector.broadcast %cst_396 : f32 to vector<4x40xf32>
    %1003 = arith.subf %1002, %1001 : vector<4x40xf32>
    %cst_397 = arith.constant 9.99999993E-9 : f32
    %1004 = vector.broadcast %cst_397 : f32 to vector<4x40xf32>
    %1005 = arith.cmpf olt, %511, %1004 : vector<4x40xf32>
    %1006 = arith.select %1005, %1003, %986 : vector<4x40xi1>, vector<4x40xf32>
    %cst_398 = arith.constant 1.000000e+00 : f32
    %1007 = vector.broadcast %cst_398 : f32 to vector<4x40xf32>
    %1008 = arith.mulf %1007, %731 : vector<4x40xf32>
    %1009 = arith.mulf %1008, %731 : vector<4x40xf32>
    %1010 = arith.addf %1006, %1009 : vector<4x40xf32>
    %cst_399 = arith.constant dense<0.000000e+00> : vector<4xf32>
    %1011 = vector.multi_reduction <add>, %1010, %cst_399 [1] : vector<4x40xf32> to vector<4xf32>
    %1012 = vector.shape_cast %1011 : vector<4xf32> to vector<4x1xf32>
    %cst_400 = arith.constant dense<0.000000e+00> : vector<1xf32>
    %1013 = vector.multi_reduction <add>, %1012, %cst_400 [0] : vector<4x1xf32> to vector<1xf32>
    %1014 = vector.shape_cast %1013 : vector<1xf32> to vector<1x1xf32>
    %cst_401 = arith.constant 6.250000e-03 : f32
    %1015 = vector.broadcast %cst_401 : f32 to vector<1x1xf32>
    %1016 = arith.mulf %1014, %1015 : vector<1x1xf32>
    %1017 = arith.cmpf one, %1016, %1016 : vector<1x1xf32>
    %cst_402 = arith.constant 0x7F800000 : f32
    %1018 = vector.broadcast %cst_402 : f32 to vector<1x1xf32>
    %1019 = arith.select %1017, %1018, %1016 : vector<1x1xi1>, vector<1x1xf32>
    %c0_403 = arith.constant 0 : index
    %c0_404 = arith.constant 0 : index
    %1020 = vector.load %arg7[%c0_403, %c0_404] : memref<136x32xf32, #tpu.memory_space<vmem>>, vector<1x32xf32>
    %c1_405 = arith.constant 1 : index
    %c0_406 = arith.constant 0 : index
    %1021 = vector.load %arg7[%c1_405, %c0_406] : memref<136x32xf32, #tpu.memory_space<vmem>>, vector<1x32xf32>
    %c2_407 = arith.constant 2 : index
    %c0_408 = arith.constant 0 : index
    %1022 = vector.load %arg7[%c2_407, %c0_408] : memref<136x32xf32, #tpu.memory_space<vmem>>, vector<1x32xf32>
    %c3_409 = arith.constant 3 : index
    %c0_410 = arith.constant 0 : index
    %1023 = vector.load %arg7[%c3_409, %c0_410] : memref<136x32xf32, #tpu.memory_space<vmem>>, vector<1x32xf32>
    %c4_411 = arith.constant 4 : index
    %c0_412 = arith.constant 0 : index
    %1024 = vector.load %arg7[%c4_411, %c0_412] : memref<136x32xf32, #tpu.memory_space<vmem>>, vector<1x32xf32>
    %c5_413 = arith.constant 5 : index
    %c0_414 = arith.constant 0 : index
    %1025 = vector.load %arg7[%c5_413, %c0_414] : memref<136x32xf32, #tpu.memory_space<vmem>>, vector<1x32xf32>
    %c6_415 = arith.constant 6 : index
    %c0_416 = arith.constant 0 : index
    %1026 = vector.load %arg7[%c6_415, %c0_416] : memref<136x32xf32, #tpu.memory_space<vmem>>, vector<1x2xf32>
    %c8_417 = arith.constant 8 : index
    %c0_418 = arith.constant 0 : index
    %1027 = vector.load %arg7[%c8_417, %c0_418] : memref<136x32xf32, #tpu.memory_space<vmem>>, vector<64x32xf32>
    %c72 = arith.constant 72 : index
    %c0_419 = arith.constant 0 : index
    %1028 = vector.load %arg7[%c72, %c0_419] : memref<136x32xf32, #tpu.memory_space<vmem>>, vector<32x32xf32>
    %c104_420 = arith.constant 104 : index
    %c0_421 = arith.constant 0 : index
    %1029 = vector.load %arg7[%c104_420, %c0_421] : memref<136x32xf32, #tpu.memory_space<vmem>>, vector<32x2xf32>
    %cst_422 = arith.constant dense<0.000000e+00> : vector<4x4xf32>
    %1030 = tpu.matmul %32, %542, %cst_422 {dimension_numbers = #tpu.dot_dimension_numbers<[1], [1], [0], [0], [0, 0, 1, 0], [], []>} : vector<4x32xf32>, vector<4x32xf32>, vector<4x4xf32> -> vector<4x4xf32>
    %cst_423 = arith.constant 0.176776692 : f32
    %1031 = vector.broadcast %cst_423 : f32 to vector<4x4xf32>
    %1032 = arith.mulf %1030, %1031 : vector<4x4xf32>
    %cst_424 = arith.constant dense<0xFF800000> : vector<4xf32>
    %1033 = vector.multi_reduction <maximumf>, %1032, %cst_424 [1] : vector<4x4xf32> to vector<4xf32>
    %1034 = vector.shape_cast %1033 : vector<4xf32> to vector<4x1xf32>
    %1035 = vector.broadcast %1034 : vector<4x1xf32> to vector<4x4xf32>
    %1036 = arith.subf %1032, %1035 : vector<4x4xf32>
    %1037 = math.exp %1036 : vector<4x4xf32>
    %cst_425 = arith.constant dense<0.000000e+00> : vector<4xf32>
    %1038 = vector.multi_reduction <add>, %1037, %cst_425 [1] : vector<4x4xf32> to vector<4xf32>
    %1039 = vector.shape_cast %1038 : vector<4xf32> to vector<4x1xf32>
    %1040 = tpu.reciprocal %1039 {approx = true} : vector<4x1xf32> -> vector<4x1xf32>
    %1041 = vector.broadcast %1040 : vector<4x1xf32> to vector<4x4xf32>
    %1042 = arith.mulf %1037, %1041 : vector<4x4xf32>
    %cst_426 = arith.constant dense<0.000000e+00> : vector<4x32xf32>
    %1043 = tpu.matmul %1042, %542, %cst_426 {dimension_numbers = #tpu.dot_dimension_numbers<[1], [0], [0], [1], [0, 0, 1, 1], [], []>} : vector<4x4xf32>, vector<4x32xf32>, vector<4x32xf32> -> vector<4x32xf32>
    %1044 = arith.addf %32, %1043 : vector<4x32xf32>
    %cst_427 = arith.constant dense<0.000000e+00> : vector<4xf32>
    %1045 = vector.multi_reduction <add>, %1044, %cst_427 [1] : vector<4x32xf32> to vector<4xf32>
    %1046 = vector.shape_cast %1045 : vector<4xf32> to vector<4x1xf32>
    %cst_428 = arith.constant 3.200000e+01 : f32
    %1047 = vector.broadcast %cst_428 : f32 to vector<4x1xf32>
    %1048 = arith.divf %1046, %1047 : vector<4x1xf32>
    %1049 = vector.broadcast %1048 : vector<4x1xf32> to vector<4x32xf32>
    %1050 = arith.subf %1044, %1049 : vector<4x32xf32>
    %1051 = vector.broadcast %1048 : vector<4x1xf32> to vector<4x32xf32>
    %1052 = arith.subf %1044, %1051 : vector<4x32xf32>
    %1053 = arith.mulf %1050, %1052 : vector<4x32xf32>
    %cst_429 = arith.constant dense<0.000000e+00> : vector<4xf32>
    %1054 = vector.multi_reduction <add>, %1053, %cst_429 [1] : vector<4x32xf32> to vector<4xf32>
    %1055 = vector.shape_cast %1054 : vector<4xf32> to vector<4x1xf32>
    %cst_430 = arith.constant 3.200000e+01 : f32
    %1056 = vector.broadcast %cst_430 : f32 to vector<4x1xf32>
    %1057 = arith.divf %1055, %1056 : vector<4x1xf32>
    %1058 = vector.broadcast %1048 : vector<4x1xf32> to vector<4x32xf32>
    %1059 = arith.subf %1044, %1058 : vector<4x32xf32>
    %cst_431 = arith.constant 9.99999974E-6 : f32
    %1060 = vector.broadcast %cst_431 : f32 to vector<4x1xf32>
    %1061 = arith.addf %1057, %1060 : vector<4x1xf32>
    %1062 = math.rsqrt %1061 : vector<4x1xf32>
    %1063 = vector.broadcast %1062 : vector<4x1xf32> to vector<4x32xf32>
    %1064 = arith.mulf %1059, %1063 : vector<4x32xf32>
    %1065 = vector.broadcast %1020 : vector<1x32xf32> to vector<4x32xf32>
    %1066 = arith.mulf %1064, %1065 : vector<4x32xf32>
    %1067 = vector.broadcast %1021 : vector<1x32xf32> to vector<4x32xf32>
    %1068 = arith.addf %1066, %1067 : vector<4x32xf32>
    %cst_432 = arith.constant dense<0.000000e+00> : vector<4x4xf32>
    %1069 = tpu.matmul %542, %32, %cst_432 {dimension_numbers = #tpu.dot_dimension_numbers<[1], [1], [0], [0], [0, 0, 1, 0], [], []>} : vector<4x32xf32>, vector<4x32xf32>, vector<4x4xf32> -> vector<4x4xf32>
    %cst_433 = arith.constant 0.176776692 : f32
    %1070 = vector.broadcast %cst_433 : f32 to vector<4x4xf32>
    %1071 = arith.mulf %1069, %1070 : vector<4x4xf32>
    %cst_434 = arith.constant dense<0xFF800000> : vector<4xf32>
    %1072 = vector.multi_reduction <maximumf>, %1071, %cst_434 [1] : vector<4x4xf32> to vector<4xf32>
    %1073 = vector.shape_cast %1072 : vector<4xf32> to vector<4x1xf32>
    %1074 = vector.broadcast %1073 : vector<4x1xf32> to vector<4x4xf32>
    %1075 = arith.subf %1071, %1074 : vector<4x4xf32>
    %1076 = math.exp %1075 : vector<4x4xf32>
    %cst_435 = arith.constant dense<0.000000e+00> : vector<4xf32>
    %1077 = vector.multi_reduction <add>, %1076, %cst_435 [1] : vector<4x4xf32> to vector<4xf32>
    %1078 = vector.shape_cast %1077 : vector<4xf32> to vector<4x1xf32>
    %1079 = tpu.reciprocal %1078 {approx = true} : vector<4x1xf32> -> vector<4x1xf32>
    %1080 = vector.broadcast %1079 : vector<4x1xf32> to vector<4x4xf32>
    %1081 = arith.mulf %1076, %1080 : vector<4x4xf32>
    %cst_436 = arith.constant dense<0.000000e+00> : vector<4x32xf32>
    %1082 = tpu.matmul %1081, %32, %cst_436 {dimension_numbers = #tpu.dot_dimension_numbers<[1], [0], [0], [1], [0, 0, 1, 1], [], []>} : vector<4x4xf32>, vector<4x32xf32>, vector<4x32xf32> -> vector<4x32xf32>
    %1083 = arith.addf %542, %1082 : vector<4x32xf32>
    %cst_437 = arith.constant dense<0.000000e+00> : vector<4xf32>
    %1084 = vector.multi_reduction <add>, %1083, %cst_437 [1] : vector<4x32xf32> to vector<4xf32>
    %1085 = vector.shape_cast %1084 : vector<4xf32> to vector<4x1xf32>
    %cst_438 = arith.constant 3.200000e+01 : f32
    %1086 = vector.broadcast %cst_438 : f32 to vector<4x1xf32>
    %1087 = arith.divf %1085, %1086 : vector<4x1xf32>
    %1088 = vector.broadcast %1087 : vector<4x1xf32> to vector<4x32xf32>
    %1089 = arith.subf %1083, %1088 : vector<4x32xf32>
    %1090 = vector.broadcast %1087 : vector<4x1xf32> to vector<4x32xf32>
    %1091 = arith.subf %1083, %1090 : vector<4x32xf32>
    %1092 = arith.mulf %1089, %1091 : vector<4x32xf32>
    %cst_439 = arith.constant dense<0.000000e+00> : vector<4xf32>
    %1093 = vector.multi_reduction <add>, %1092, %cst_439 [1] : vector<4x32xf32> to vector<4xf32>
    %1094 = vector.shape_cast %1093 : vector<4xf32> to vector<4x1xf32>
    %cst_440 = arith.constant 3.200000e+01 : f32
    %1095 = vector.broadcast %cst_440 : f32 to vector<4x1xf32>
    %1096 = arith.divf %1094, %1095 : vector<4x1xf32>
    %1097 = vector.broadcast %1087 : vector<4x1xf32> to vector<4x32xf32>
    %1098 = arith.subf %1083, %1097 : vector<4x32xf32>
    %cst_441 = arith.constant 9.99999974E-6 : f32
    %1099 = vector.broadcast %cst_441 : f32 to vector<4x1xf32>
    %1100 = arith.addf %1096, %1099 : vector<4x1xf32>
    %1101 = math.rsqrt %1100 : vector<4x1xf32>
    %1102 = vector.broadcast %1101 : vector<4x1xf32> to vector<4x32xf32>
    %1103 = arith.mulf %1098, %1102 : vector<4x32xf32>
    %1104 = vector.broadcast %1022 : vector<1x32xf32> to vector<4x32xf32>
    %1105 = arith.mulf %1103, %1104 : vector<4x32xf32>
    %1106 = vector.broadcast %1023 : vector<1x32xf32> to vector<4x32xf32>
    %1107 = arith.addf %1105, %1106 : vector<4x32xf32>
    %1108 = arith.mulf %1068, %1068 : vector<4x32xf32>
    %cst_442 = arith.constant dense<0.000000e+00> : vector<4xf32>
    %1109 = vector.multi_reduction <add>, %1108, %cst_442 [1] : vector<4x32xf32> to vector<4xf32>
    %1110 = vector.shape_cast %1109 : vector<4xf32> to vector<4x1xf32>
    %1111 = math.sqrt %1110 : vector<4x1xf32>
    %cst_443 = arith.constant 9.99999996E-13 : f32
    %1112 = vector.broadcast %cst_443 : f32 to vector<4x1xf32>
    %1113 = arith.maximumf %1111, %1112 : vector<4x1xf32>
    %1114 = tpu.reciprocal %1113 {approx = true} : vector<4x1xf32> -> vector<4x1xf32>
    %1115 = vector.broadcast %1114 : vector<4x1xf32> to vector<4x32xf32>
    %1116 = arith.mulf %1068, %1115 : vector<4x32xf32>
    %1117 = arith.mulf %1107, %1107 : vector<4x32xf32>
    %cst_444 = arith.constant dense<0.000000e+00> : vector<4xf32>
    %1118 = vector.multi_reduction <add>, %1117, %cst_444 [1] : vector<4x32xf32> to vector<4xf32>
    %1119 = vector.shape_cast %1118 : vector<4xf32> to vector<4x1xf32>
    %1120 = math.sqrt %1119 : vector<4x1xf32>
    %cst_445 = arith.constant 9.99999996E-13 : f32
    %1121 = vector.broadcast %cst_445 : f32 to vector<4x1xf32>
    %1122 = arith.maximumf %1120, %1121 : vector<4x1xf32>
    %1123 = tpu.reciprocal %1122 {approx = true} : vector<4x1xf32> -> vector<4x1xf32>
    %1124 = vector.broadcast %1123 : vector<4x1xf32> to vector<4x32xf32>
    %1125 = arith.mulf %1107, %1124 : vector<4x32xf32>
    %cst_446 = arith.constant dense<0.000000e+00> : vector<4x4xf32>
    %1126 = tpu.matmul %1116, %1125, %cst_446 {dimension_numbers = #tpu.dot_dimension_numbers<[1], [1], [0], [0], [0, 0, 1, 0], [], []>} : vector<4x32xf32>, vector<4x32xf32>, vector<4x4xf32> -> vector<4x4xf32>
    %cst_447 = arith.constant 2.000000e+00 : f32
    %1127 = vector.broadcast %cst_447 : f32 to vector<4x4xf32>
    %1128 = arith.mulf %1126, %1127 : vector<4x4xf32>
    %cst_448 = arith.constant dense<0xFF800000> : vector<4xf32>
    %1129 = vector.multi_reduction <maximumf>, %1128, %cst_448 [1] : vector<4x4xf32> to vector<4xf32>
    %1130 = vector.shape_cast %1129 : vector<4xf32> to vector<4x1xf32>
    %1131 = vector.broadcast %1130 : vector<4x1xf32> to vector<4x4xf32>
    %1132 = arith.subf %1128, %1131 : vector<4x4xf32>
    %1133 = math.exp %1132 : vector<4x4xf32>
    %cst_449 = arith.constant dense<0.000000e+00> : vector<4xf32>
    %1134 = vector.multi_reduction <add>, %1133, %cst_449 [1] : vector<4x4xf32> to vector<4xf32>
    %1135 = vector.shape_cast %1134 : vector<4xf32> to vector<4x1xf32>
    %1136 = math.log %1135 : vector<4x1xf32>
    %1137 = arith.addf %1136, %1130 : vector<4x1xf32>
    %cst_450 = arith.constant dense<0xFF800000> : vector<4xf32>
    %1138 = vector.multi_reduction <maximumf>, %1128, %cst_450 [0] : vector<4x4xf32> to vector<4xf32>
    %1139 = vector.shape_cast %1138 : vector<4xf32> to vector<1x4xf32>
    %1140 = vector.broadcast %1139 : vector<1x4xf32> to vector<4x4xf32>
    %1141 = arith.subf %1128, %1140 : vector<4x4xf32>
    %1142 = math.exp %1141 : vector<4x4xf32>
    %cst_451 = arith.constant dense<0.000000e+00> : vector<4xf32>
    %1143 = vector.multi_reduction <add>, %1142, %cst_451 [0] : vector<4x4xf32> to vector<4xf32>
    %1144 = vector.shape_cast %1143 : vector<4xf32> to vector<1x4xf32>
    %1145 = math.log %1144 : vector<1x4xf32>
    %1146 = arith.addf %1145, %1139 : vector<1x4xf32>
    %1147 = tpu.iota {dimensions = array<i32: 0>} : vector<4x4xi32>
    %1148 = tpu.iota {dimensions = array<i32: 1>} : vector<4x4xi32>
    %1149 = arith.cmpi eq, %1147, %1148 : vector<4x4xi32>
    %cst_452 = arith.constant 0.000000e+00 : f32
    %1150 = vector.broadcast %cst_452 : f32 to vector<4x4xf32>
    %1151 = arith.select %1149, %1128, %1150 : vector<4x4xi1>, vector<4x4xf32>
    %cst_453 = arith.constant dense<0.000000e+00> : vector<4xf32>
    %1152 = vector.multi_reduction <add>, %1151, %cst_453 [1] : vector<4x4xf32> to vector<4xf32>
    %1153 = vector.shape_cast %1152 : vector<4xf32> to vector<4x1xf32>
    %cst_454 = arith.constant dense<0.000000e+00> : vector<1xf32>
    %1154 = vector.multi_reduction <add>, %1137, %cst_454 [0] : vector<4x1xf32> to vector<1xf32>
    %1155 = vector.shape_cast %1154 : vector<1xf32> to vector<1x1xf32>
    %cst_455 = arith.constant dense<0.000000e+00> : vector<1xf32>
    %1156 = vector.multi_reduction <add>, %1146, %cst_455 [1] : vector<1x4xf32> to vector<1xf32>
    %1157 = vector.shape_cast %1156 : vector<1xf32> to vector<1x1xf32>
    %1158 = arith.addf %1155, %1157 : vector<1x1xf32>
    %cst_456 = arith.constant 1.250000e-01 : f32
    %1159 = vector.broadcast %cst_456 : f32 to vector<1x1xf32>
    %1160 = arith.mulf %1158, %1159 : vector<1x1xf32>
    %cst_457 = arith.constant dense<0.000000e+00> : vector<1xf32>
    %1161 = vector.multi_reduction <add>, %1153, %cst_457 [0] : vector<4x1xf32> to vector<1xf32>
    %1162 = vector.shape_cast %1161 : vector<1xf32> to vector<1x1xf32>
    %cst_458 = arith.constant 2.500000e-01 : f32
    %1163 = vector.broadcast %cst_458 : f32 to vector<1x1xf32>
    %1164 = arith.mulf %1162, %1163 : vector<1x1xf32>
    %1165 = arith.subf %1160, %1164 : vector<1x1xf32>
    %1166 = vector.extract_strided_slice %1027 {offsets = [0, 0], sizes = [32, 32], strides = [1, 1]} : vector<64x32xf32> to vector<32x32xf32>
    %1167 = vector.extract_strided_slice %1027 {offsets = [32, 0], sizes = [32, 32], strides = [1, 1]} : vector<64x32xf32> to vector<32x32xf32>
    %c0_459 = arith.constant 0 : index
    %c0_460 = arith.constant 0 : index
    %1168 = vector.load %arg8[%c0_459, %c0_460] : memref<12x10xf32, #tpu.memory_space<vmem>>, vector<12x4xf32>
    %cst_461 = arith.constant dense<0.000000e+00> : vector<12x32xf32>
    %1169 = tpu.matmul %1168, %1068, %cst_461 {dimension_numbers = #tpu.dot_dimension_numbers<[1], [0], [0], [1], [0, 0, 1, 1], [], []>} : vector<12x4xf32>, vector<4x32xf32>, vector<12x32xf32> -> vector<12x32xf32>
    %c0_462 = arith.constant 0 : index
    %c4_463 = arith.constant 4 : index
    %1170 = vector.load %arg8[%c0_462, %c4_463] : memref<12x10xf32, #tpu.memory_space<vmem>>, vector<12x4xf32>
    %cst_464 = arith.constant dense<0.000000e+00> : vector<12x32xf32>
    %1171 = tpu.matmul %1170, %1107, %cst_464 {dimension_numbers = #tpu.dot_dimension_numbers<[1], [0], [0], [1], [0, 0, 1, 1], [], []>} : vector<12x4xf32>, vector<4x32xf32>, vector<12x32xf32> -> vector<12x32xf32>
    %c0_465 = arith.constant 0 : index
    %c8_466 = arith.constant 8 : index
    %1172 = vector.load %arg8[%c0_465, %c8_466] : memref<12x10xf32, #tpu.memory_space<vmem>>, vector<12x2xf32>
    %cst_467 = arith.constant dense<0.000000e+00> : vector<12x32xf32>
    %1173 = tpu.matmul %1169, %1166, %cst_467 {dimension_numbers = #tpu.dot_dimension_numbers<[1], [0], [0], [1], [0, 0, 1, 1], [], []>} : vector<12x32xf32>, vector<32x32xf32>, vector<12x32xf32> -> vector<12x32xf32>
    %cst_468 = arith.constant dense<0.000000e+00> : vector<12x32xf32>
    %1174 = tpu.matmul %1171, %1167, %cst_468 {dimension_numbers = #tpu.dot_dimension_numbers<[1], [0], [0], [1], [0, 0, 1, 1], [], []>} : vector<12x32xf32>, vector<32x32xf32>, vector<12x32xf32> -> vector<12x32xf32>
    %1175 = arith.addf %1173, %1174 : vector<12x32xf32>
    %1176 = vector.broadcast %1024 : vector<1x32xf32> to vector<12x32xf32>
    %1177 = arith.addf %1175, %1176 : vector<12x32xf32>
    %cst_469 = arith.constant 0.000000e+00 : f32
    %1178 = vector.broadcast %cst_469 : f32 to vector<12x32xf32>
    %1179 = arith.maximumf %1177, %1178 : vector<12x32xf32>
    %cst_470 = arith.constant dense<0.000000e+00> : vector<12x32xf32>
    %1180 = tpu.matmul %1179, %1028, %cst_470 {dimension_numbers = #tpu.dot_dimension_numbers<[1], [0], [0], [1], [0, 0, 1, 1], [], []>} : vector<12x32xf32>, vector<32x32xf32>, vector<12x32xf32> -> vector<12x32xf32>
    %1181 = vector.broadcast %1025 : vector<1x32xf32> to vector<12x32xf32>
    %1182 = arith.addf %1180, %1181 : vector<12x32xf32>
    %cst_471 = arith.constant 0.000000e+00 : f32
    %1183 = vector.broadcast %cst_471 : f32 to vector<12x32xf32>
    %1184 = arith.maximumf %1182, %1183 : vector<12x32xf32>
    %cst_472 = arith.constant dense<0.000000e+00> : vector<12x2xf32>
    %1185 = tpu.matmul %1184, %1029, %cst_472 {dimension_numbers = #tpu.dot_dimension_numbers<[1], [0], [0], [1], [0, 0, 1, 1], [], []>} : vector<12x32xf32>, vector<32x2xf32>, vector<12x2xf32> -> vector<12x2xf32>
    %1186 = vector.broadcast %1026 : vector<1x2xf32> to vector<12x2xf32>
    %1187 = arith.addf %1185, %1186 : vector<12x2xf32>
    %cst_473 = arith.constant dense<0xFF800000> : vector<12xf32>
    %1188 = vector.multi_reduction <maximumf>, %1187, %cst_473 [1] : vector<12x2xf32> to vector<12xf32>
    %1189 = vector.shape_cast %1188 : vector<12xf32> to vector<12x1xf32>
    %1190 = vector.broadcast %1189 : vector<12x1xf32> to vector<12x2xf32>
    %1191 = arith.subf %1187, %1190 : vector<12x2xf32>
    %1192 = math.exp %1191 : vector<12x2xf32>
    %cst_474 = arith.constant dense<0.000000e+00> : vector<12xf32>
    %1193 = vector.multi_reduction <add>, %1192, %cst_474 [1] : vector<12x2xf32> to vector<12xf32>
    %1194 = vector.shape_cast %1193 : vector<12xf32> to vector<12x1xf32>
    %1195 = tpu.reciprocal %1194 {approx = true} : vector<12x1xf32> -> vector<12x1xf32>
    %1196 = vector.broadcast %1195 : vector<12x1xf32> to vector<12x2xf32>
    %1197 = arith.mulf %1192, %1196 : vector<12x2xf32>
    %cst_475 = arith.constant dense<0xFF800000> : vector<12xf32>
    %1198 = vector.multi_reduction <maximumf>, %1197, %cst_475 [1] : vector<12x2xf32> to vector<12xf32>
    %1199 = vector.shape_cast %1198 : vector<12xf32> to vector<12x1xf32>
    %1200 = vector.broadcast %1199 : vector<12x1xf32> to vector<12x2xf32>
    %1201 = arith.subf %1197, %1200 : vector<12x2xf32>
    %1202 = math.exp %1201 : vector<12x2xf32>
    %cst_476 = arith.constant dense<0.000000e+00> : vector<12xf32>
    %1203 = vector.multi_reduction <add>, %1202, %cst_476 [1] : vector<12x2xf32> to vector<12xf32>
    %1204 = vector.shape_cast %1203 : vector<12xf32> to vector<12x1xf32>
    %1205 = math.log %1204 : vector<12x1xf32>
    %1206 = arith.addf %1205, %1199 : vector<12x1xf32>
    %1207 = arith.mulf %1172, %1197 : vector<12x2xf32>
    %cst_477 = arith.constant dense<0.000000e+00> : vector<12xf32>
    %1208 = vector.multi_reduction <add>, %1207, %cst_477 [1] : vector<12x2xf32> to vector<12xf32>
    %1209 = vector.shape_cast %1208 : vector<12xf32> to vector<12x1xf32>
    %1210 = arith.subf %1206, %1209 : vector<12x1xf32>
    %cst_478 = arith.constant dense<0.000000e+00> : vector<1xf32>
    %1211 = vector.multi_reduction <add>, %1210, %cst_478 [0] : vector<12x1xf32> to vector<1xf32>
    %1212 = vector.shape_cast %1211 : vector<1xf32> to vector<1x1xf32>
    %cst_479 = arith.constant 0.0833333358 : f32
    %1213 = vector.broadcast %cst_479 : f32 to vector<1x1xf32>
    %1214 = arith.mulf %1212, %1213 : vector<1x1xf32>
    %cst_480 = arith.constant dense<0.000000e+00> : vector<4x32xf32>
    %1215 = tpu.matmul %1068, %1166, %cst_480 {dimension_numbers = #tpu.dot_dimension_numbers<[1], [0], [0], [1], [0, 0, 1, 1], [], []>} : vector<4x32xf32>, vector<32x32xf32>, vector<4x32xf32> -> vector<4x32xf32>
    %cst_481 = arith.constant dense<0.000000e+00> : vector<4x32xf32>
    %1216 = tpu.matmul %1107, %1167, %cst_481 {dimension_numbers = #tpu.dot_dimension_numbers<[1], [0], [0], [1], [0, 0, 1, 1], [], []>} : vector<4x32xf32>, vector<32x32xf32>, vector<4x32xf32> -> vector<4x32xf32>
    %1217 = arith.addf %1215, %1216 : vector<4x32xf32>
    %1218 = vector.broadcast %1024 : vector<1x32xf32> to vector<4x32xf32>
    %1219 = arith.addf %1217, %1218 : vector<4x32xf32>
    %cst_482 = arith.constant 0.000000e+00 : f32
    %1220 = vector.broadcast %cst_482 : f32 to vector<4x32xf32>
    %1221 = arith.maximumf %1219, %1220 : vector<4x32xf32>
    %cst_483 = arith.constant dense<0.000000e+00> : vector<4x32xf32>
    %1222 = tpu.matmul %1221, %1028, %cst_483 {dimension_numbers = #tpu.dot_dimension_numbers<[1], [0], [0], [1], [0, 0, 1, 1], [], []>} : vector<4x32xf32>, vector<32x32xf32>, vector<4x32xf32> -> vector<4x32xf32>
    %1223 = vector.broadcast %1025 : vector<1x32xf32> to vector<4x32xf32>
    %1224 = arith.addf %1222, %1223 : vector<4x32xf32>
    %cst_484 = arith.constant 0.000000e+00 : f32
    %1225 = vector.broadcast %cst_484 : f32 to vector<4x32xf32>
    %1226 = arith.maximumf %1224, %1225 : vector<4x32xf32>
    %1227 = tpu.iota {dimensions = array<i32: 1>} : vector<1x128xi32>
    %c0_i32_485 = arith.constant 0 : i32
    %1228 = vector.broadcast %c0_i32_485 : i32 to vector<1x128xi32>
    %1229 = arith.cmpi eq, %1227, %1228 : vector<1x128xi32>
    %cst_486 = arith.constant 0.000000e+00 : f32
    %1230 = vector.shape_cast %509 : vector<1x1xf32> to vector<1x1xf32>
    %1231 = vector.broadcast %1230 : vector<1x1xf32> to vector<1x128xf32>
    %1232 = vector.broadcast %cst_486 : f32 to vector<1x128xf32>
    %1233 = arith.select %1229, %1231, %1232 : vector<1x128xi1>, vector<1x128xf32>
    %c1_i32_487 = arith.constant 1 : i32
    %1234 = vector.broadcast %c1_i32_487 : i32 to vector<1x128xi32>
    %1235 = arith.cmpi eq, %1227, %1234 : vector<1x128xi32>
    %cst_488 = arith.constant 0.000000e+00 : f32
    %1236 = vector.shape_cast %1019 : vector<1x1xf32> to vector<1x1xf32>
    %1237 = vector.broadcast %1236 : vector<1x1xf32> to vector<1x128xf32>
    %1238 = vector.broadcast %cst_488 : f32 to vector<1x128xf32>
    %1239 = arith.select %1235, %1237, %1238 : vector<1x128xi1>, vector<1x128xf32>
    %1240 = arith.addf %1233, %1239 : vector<1x128xf32>
    %c2_i32 = arith.constant 2 : i32
    %1241 = vector.broadcast %c2_i32 : i32 to vector<1x128xi32>
    %1242 = arith.cmpi eq, %1227, %1241 : vector<1x128xi32>
    %cst_489 = arith.constant 0.000000e+00 : f32
    %1243 = vector.shape_cast %176 : vector<1x1xf32> to vector<1x1xf32>
    %1244 = vector.broadcast %1243 : vector<1x1xf32> to vector<1x128xf32>
    %1245 = vector.broadcast %cst_489 : f32 to vector<1x128xf32>
    %1246 = arith.select %1242, %1244, %1245 : vector<1x128xi1>, vector<1x128xf32>
    %1247 = arith.addf %1240, %1246 : vector<1x128xf32>
    %c3_i32 = arith.constant 3 : i32
    %1248 = vector.broadcast %c3_i32 : i32 to vector<1x128xi32>
    %1249 = arith.cmpi eq, %1227, %1248 : vector<1x128xi32>
    %cst_490 = arith.constant 0.000000e+00 : f32
    %1250 = vector.shape_cast %686 : vector<1x1xf32> to vector<1x1xf32>
    %1251 = vector.broadcast %1250 : vector<1x1xf32> to vector<1x128xf32>
    %1252 = vector.broadcast %cst_490 : f32 to vector<1x128xf32>
    %1253 = arith.select %1249, %1251, %1252 : vector<1x128xi1>, vector<1x128xf32>
    %1254 = arith.addf %1247, %1253 : vector<1x128xf32>
    %c4_i32_491 = arith.constant 4 : i32
    %1255 = vector.broadcast %c4_i32_491 : i32 to vector<1x128xi32>
    %1256 = arith.cmpi eq, %1227, %1255 : vector<1x128xi32>
    %cst_492 = arith.constant 0.000000e+00 : f32
    %1257 = vector.shape_cast %1165 : vector<1x1xf32> to vector<1x1xf32>
    %1258 = vector.broadcast %1257 : vector<1x1xf32> to vector<1x128xf32>
    %1259 = vector.broadcast %cst_492 : f32 to vector<1x128xf32>
    %1260 = arith.select %1256, %1258, %1259 : vector<1x128xi1>, vector<1x128xf32>
    %1261 = arith.addf %1254, %1260 : vector<1x128xf32>
    %c5_i32 = arith.constant 5 : i32
    %1262 = vector.broadcast %c5_i32 : i32 to vector<1x128xi32>
    %1263 = arith.cmpi eq, %1227, %1262 : vector<1x128xi32>
    %cst_493 = arith.constant 0.000000e+00 : f32
    %1264 = vector.shape_cast %1214 : vector<1x1xf32> to vector<1x1xf32>
    %1265 = vector.broadcast %1264 : vector<1x1xf32> to vector<1x128xf32>
    %1266 = vector.broadcast %cst_493 : f32 to vector<1x128xf32>
    %1267 = arith.select %1263, %1265, %1266 : vector<1x128xi1>, vector<1x128xf32>
    %1268 = arith.addf %1261, %1267 : vector<1x128xf32>
    %cst_494 = arith.constant 0.000000e+00 : f32
    %1269 = vector.broadcast %cst_494 : f32 to vector<4x96xf32>
    %1270 = tpu.concatenate %1226, %1269 in 1 : vector<4x32xf32>, vector<4x96xf32> -> vector<4x128xf32>
    %cst_495 = arith.constant 0.000000e+00 : f32
    %1271 = vector.broadcast %cst_495 : f32 to vector<3x128xf32>
    %1272 = tpu.concatenate %1270, %1268, %1271 in 0 : vector<4x128xf32>, vector<1x128xf32>, vector<3x128xf32> -> vector<8x128xf32>
    %c0_496 = arith.constant 0 : index
    %c0_497 = arith.constant 0 : index
    %1273 = vector.load %arg9[%c0_496, %c0_497] : memref<8x128xf32, #tpu.memory_space<vmem>>, vector<8x128xf32>
    tpu.vector_store %arg9[%c0_496, %c0_497], %1272 {strides = array<i32>} : memref<8x128xf32, #tpu.memory_space<vmem>>, vector<8x128xf32>,
    return
  }
  func.func @transform_0(%arg0: i32) -> (i32, i32) {
    %c0_i32 = arith.constant 0 : i32
    %c0_i32_0 = arith.constant 0 : i32
    %c0_i32_1 = arith.constant 0 : i32
    return %c0_i32, %c0_i32_0 : i32, i32
  }
  func.func @transform_1(%arg0: i32) -> (i32, i32) {
    %c0_i32 = arith.constant 0 : i32
    %c0_i32_0 = arith.constant 0 : i32
    %c0_i32_1 = arith.constant 0 : i32
    return %c0_i32, %c0_i32_0 : i32, i32
  }
  func.func @transform_2(%arg0: i32) -> (i32, i32) {
    %c0_i32 = arith.constant 0 : i32
    %c0_i32_0 = arith.constant 0 : i32
    %c0_i32_1 = arith.constant 0 : i32
    return %c0_i32, %c0_i32_0 : i32, i32
  }
  func.func @transform_3(%arg0: i32) -> (i32, i32) {
    %c0_i32 = arith.constant 0 : i32
    %c0_i32_0 = arith.constant 0 : i32
    %c0_i32_1 = arith.constant 0 : i32
    return %c0_i32, %c0_i32_0 : i32, i32
  }
  func.func @transform_4(%arg0: i32) -> (i32, i32) {
    %c0_i32 = arith.constant 0 : i32
    %c0_i32_0 = arith.constant 0 : i32
    %c0_i32_1 = arith.constant 0 : i32
    return %c0_i32, %c0_i32_0 : i32, i32
  }
  func.func @transform_5(%arg0: i32) -> (i32, i32) {
    %c0_i32 = arith.constant 0 : i32
    %c0_i32_0 = arith.constant 0 : i32
    %c0_i32_1 = arith.constant 0 : i32
    return %c0_i32, %c0_i32_0 : i32, i32
  }
  func.func @transform_6(%arg0: i32) -> (i32, i32) {
    %c0_i32 = arith.constant 0 : i32
    %c0_i32_0 = arith.constant 0 : i32
    %c0_i32_1 = arith.constant 0 : i32
    return %c0_i32, %c0_i32_0 : i32, i32
  }
  func.func @transform_7(%arg0: i32) -> (i32, i32) {
    %c0_i32 = arith.constant 0 : i32
    %c0_i32_0 = arith.constant 0 : i32
    %c0_i32_1 = arith.constant 0 : i32
    return %c0_i32, %c0_i32_0 : i32, i32
  }
  func.func @transform_8(%arg0: i32) -> (i32, i32) {
    %c0_i32 = arith.constant 0 : i32
    %c0_i32_0 = arith.constant 0 : i32
    %c0_i32_1 = arith.constant 0 : i32
    return %c0_i32, %c0_i32_0 : i32, i32
  }
}

</mosaic_0001>

<bundles_post_ra>
// kernel: contrastive_forward.1
= control target key start
LH: loop header
LB: loop body
LE: loop exit
PB: predicated region body
PF: predicated region fallthrough
CT: control target
= control target key end

     0   :  { %13 = vsyncpa [#allocation3], 0  ;;  %s4022_s0 = inlined_call_operand.vmem [shape: f32[20,48], index: 0, kind: input, shape index: {}]   ;;  %s4023_s1 = inlined_call_operand.vmem [shape: f32[20,40], index: 1, kind: input, shape index: {}]   ;;  %s4024_s2 = inlined_call_operand.hbm [shape: f32[736,128], index: 2, kind: input, shape index: {}]   ;;  %s4025_s3 = inlined_call_operand.vmem [shape: f32[16,128], index: 3, kind: input, shape index: {}]   ;;  %s4026_s4 = inlined_call_operand.hbm [shape: f32[704,128], index: 4, kind: input, shape index: {}]   ;;  %s4027_s5 = inlined_call_operand.vmem [shape: f32[16,128], index: 5, kind: input, shape index: {}]   ;;  %s4028_s6 = inlined_call_operand.vmem [shape: f32[136,32], index: 6, kind: input, shape index: {}]   ;;  %s4029_s7 = inlined_call_operand.vmem [shape: f32[12,10], index: 7, kind: input, shape index: {}]   ;;  %s4030_s8 = inlined_call_operand.vmem [shape: f32[8,128], index: 8, kind: output, shape index: {}]  }
   0x1   :  { %s23_s29 = sshll.u32 %s4024_s2, 4  ;;  %s24_s29 = int_to_ptr.hbm [resolvable:$true] %s23_s29 }
   0x2   :  { %14 = vsyncpa [#allocation5], 0  ;;  %s3264_s30 = smov [#allocation2]   ;;  %s38_s12 = sshll.u32 %s4026_s4, 4  ;;  %s39_s12 = int_to_ptr.hbm [resolvable:$true] %s38_s12 }
   0x3   :  { %s25_s9 = sshll.u32 %s3264_s30, 4  ;;  %s3265_s13 = smov 128   ;;  %s26_s9 = int_to_ptr.vmem [resolvable:$true] %s25_s9 }
   0x4   :  { %s3266_s14 = smov 8   ;;  %s3267_s15 = smov [#allocation4]  }
   0x5   :  { %31 = dma.hbm_to_vmem [thread:$0]  %s24_s29, 11776, %s26_s9, [#allocation3], %s3265_s13, %s3265_s13, %s3266_s14  }
   0x6   :  { %s40_s16 = sshll.u32 %s3267_s15, 4  ;;  %s41_s16 = int_to_ptr.vmem [resolvable:$true] %s40_s16 }
   0x7   :  { %46 = dma.hbm_to_vmem [thread:$0]  %s39_s12, 11264, %s41_s16, [#allocation5], %s3265_s13, %s3265_s13, %s3266_s14  }
   0x8   :  { %3260 = dma.done.wait [#allocation3], 11776  }
   0x9   :  { %3261 = vsyncadd [#allocation3], 4294955520 }
   0xa   :  { %3262 = dma.done.wait [#allocation5], 11264  }
   0xb   :  { %3263 = vsyncadd [#allocation5], 4294956032  ;;  %v70_v0 = vld [vmem:[#allocation2 + $0x28] sm:$0xff]  ;;  %v69_v1 = vld [vmem:[#allocation2 + $0x20] sm:$0xff]  ;;  %vm73_vm0 = vcmask 392192   ;;  %vm115_vm1 = vcmask 523264  }
   0xc   :  { %90 = vmatpush.msra.mxu0 %v70_v0  ;;  %v68_v2 = vld [vmem:[#allocation2 + $0x18] sm:$0xff]  ;;  %v112_v3 = vld [vmem:[#allocation2 + $0x68] sm:$0xff]  ;;  %v111_v4 = vld [vmem:[#allocation2 + $0x60] sm:$0xff]  ;;  %vm192_vm2 = vcmask 261120   ;;  %s3268_s29 = smov 72   ;;  %s3269_s30 = smov 120  }
   0xd   :  { %v67_v5 = vld [vmem:[#allocation2 + $0x10] sm:$0xff]  ;;  %130 = vmatpush.msra.mxu1 %v112_v3  ;;  %v110_v6 = vld [vmem:[#allocation2 + $0x58] sm:$0xff]  ;;  %v66_v7 = vld [vmem:[#allocation2 + $0x8] sm:$0xff]  ;;  %s3270_s9 = smov 96   ;;  %s3271_s10 = smov 112   ;;  %vm286_vm3 = vcmask 64512  }
   0xe   :  { %91 = vmatpush.msra.mxu0 %v69_v1  ;;  %v109_v8 = vld [vmem:[#allocation2 + $0x50] sm:$0xff]  ;;  %v65_v9 = vld [vmem:[#allocation2] sm:$0xff]  ;;  %v108_v10 = vld [vmem:[#allocation2 + $0x48] sm:$0xff]  ;;  %s3272_s11 = smov 80   ;;  %s3273_s12 = smov 88   ;;  %vm564_vm5 = vcmask 130048  }
   0xf   :  { %131 = vmatpush.msra.mxu1 %v111_v4  ;;  %v61_v11 = vld [vmem:[%s4022_s0] sm:$0xff]  ;;  %v106_v13 = vld [vmem:[#allocation2 + $0x38] sm:$0xff]  ;;  %v62_v14 = vld [vmem:[%s4022_s0 + $0x8] sm:$0xf]  ;;  %s3274_s13 = smov 104   ;;  %s3276_s15 = smov 64  }
  0x10   :  { %92 = vmatpush.msra.mxu0 %v68_v2  ;;  %v107_v12 = vld [vmem:[#allocation2 + $0x40] sm:$0xff]  ;;  %v105_v15 = vld [vmem:[#allocation2 + $0x30] sm:$0xff]  ;;  %v152_v16 = vld [vmem:[#allocation2 + $0x98] sm:$0xff]  ;;  %v253_v2 = vlaneseq  ;;  %s3277_s16 = smov 40   ;;  %s3278_s2 = smov 56   ;;  %vm566_vm6 = vcmask 195584  }
  0x11   :  { %132 = vmatpush.msra.mxu1 %v110_v6  ;;  %v151_v17 = vld [vmem:[#allocation2 + $0x90] sm:$0xff]  ;;  %171 = vmatpush.msra.mxu2 %v152_v16  ;;  %v2921_v18 = vld [vmem:[%s4025_s3] ss:$0 sm:$0xff]  ;;  %v150_v22 = vld [vmem:[#allocation2 + $0x88] sm:$0xff]  ;;  %s3279_s4 = smov 48   ;;  %s3280_s17 = smov 16  }
  0x12   :  { %93 = vmatpush.msra.mxu0 %v67_v5  ;;  %v149_v25 = vld [vmem:[#allocation2 + $0x80] sm:$0xff]  ;;  %v148_v27 = vld [vmem:[#allocation2 + $0x78] sm:$0xff]  ;;  %v147_v28 = vld [vmem:[#allocation2 + $0x70] sm:$0xff]  ;;  %v3397_v3 = vshrl.u32 %v253_v2, 7  ;;  %v3399_v4 = vand.u32 127, %v253_v2  ;;  %s3281_s18 = smov 24  }
  0x13   :  { %133 = vmatpush.msra.mxu1 %v109_v8  ;;  %172 = vmatpush.msra.mxu2 %v151_v17  ;;  %v2922_v29 = vld [vmem:[%s4025_s3 + $0x1] ss:$0 sm:$0xff]  ;;  %v189_v33 = vld [vmem:[#allocation2 + $0xb8] sm:$0xff]  ;;  %v188_v37 = vld [vmem:[#allocation2 + $0xb0] sm:$0xff]  ;;  %v3275_v8 = vmov -1e+30  }
  0x14   :  { %94 = vmatpush.msra.mxu0 %v66_v7  ;;  %211 = vmatpush.msra.mxu3 %v189_v33  ;;  %v187_v38 = vld [vmem:[#allocation2 + $0xa8] sm:$0xff]  ;;  %v186_v39 = vld [vmem:[#allocation2 + $0xa0] sm:$0xff]  ;;  %v227_v44 = vld [vmem:[#allocation2 + $0x218] sm:$0xff]  ;;  %v261_v5 = vand.u32 3, %v3397_v3  ;;  %v273_v6 = vand.u32 3, %v3399_v4  ;;  %vm1118_vm7 = vcmask 326656  }
  0x15   :  { %134 = vmatpush.msra.mxu1 %v108_v10  ;;  %173 = vmatpush.msra.mxu2 %v150_v22  ;;  %v2923_v40 = vld [vmem:[%s4025_s3 + $0x2] ss:$0 sm:$0xff]  ;;  %v226_v48 = vld [vmem:[#allocation2 + $0x210] sm:$0xff]  ;;  %v225_v49 = vld [vmem:[#allocation2 + $0x208] sm:$0xff]  ;;  %vm675_vm10 = vcmask 1043456   ;;  %vm2156_vm11 = vcmask 27648  }
  0x16   :  { %95 = vmatpush.msra.mxu0 %v65_v9  ;;  %212 = vmatpush.msra.mxu3 %v188_v37  ;;  %v224_v50 = vld [vmem:[#allocation2 + $0x200] sm:$0xff]  ;;  %v2925_v56 = vld [vmem:[%s4025_s3 + $0xb] ss:$0 sm:$0xff]  ;;  %vm281_vm4 = vcmp.eq.s32.totalorder %v261_v5, %v273_v6  ;;  %vm2168_vm12 = vcmask 31744   ;;  %vm671_vm13 = vcmask 257024   ;;  %s3283_s26 = smov 124  }
  0x17   :  { %2808 = vmatmul.msk.f32.vlgmr.msra.gmra.mxu0 %vm73_vm0, %v61_v11  ;;  %135 = vmatpush.msra.mxu1 %v107_v12  ;;  %v3363_v51 = vld [vmem:[%s4025_s3 + $0x3] ss:$0 sm:$0xff]  ;;  %v3403_v9 = vsel %vm281_vm4, 0.0, %v3275_v8 }
  0x18   :  { %174 = vmatpush.msra.mxu2 %v149_v25  ;;  %213 = vmatpush.msra.mxu3 %v187_v38  ;;  %v684_v2 = vld [vmem:[#allocation2 + $0xc0] sm:$0xff] }
  0x19   :  { %136 = vmatpush.msra.mxu1 %v106_v13 }
  0x1a   :  { %175 = vmatpush.msra.mxu2 %v148_v27  ;;  %214 = vmatpush.msra.mxu3 %v186_v39 }
  0x1b   :  { %137 = vmatpush.msra.mxu1 %v105_v15 }
  0x1c   :  { %176 = vmatpush.msra.mxu2 %v147_v28  ;;  %245 = vmatpush.msrb.mxu3 %v227_v44 }
  0x1e   :  { %246 = vmatpush.msrb.mxu3 %v226_v48 }
  0x1f   :  { %2809 = vmatmul.msk.f32.gmra.mxu0 %vm73_vm0, %v62_v14 }
  0x20   :  { %247 = vmatpush.msrb.mxu3 %v225_v49 }
  0x22   :  { %248 = vmatpush.msrb.mxu3 %v224_v50 }
  0x94   :  { %v97_v19 = vpop.f32.mrf.mxu0 }
  0x95   :  { %v98_v20 = vadd.f32 %v2921_v18, %v97_v19 }
  0x97   :  { %v103_v21 = vmax.f32 %v98_v20, 0.0 }
  0x99   :  { %2810 = vmatmul.msk.f32.vlgmr.msra.gmra.mxu1 %vm115_vm1, %v103_v21 }
  0x9c   :  { %v100_v23 = vpop.f32.mrf.mxu0 }
  0x9d   :  { %v101_v24 = vadd.f32 %v2921_v18, %v100_v23 }
  0x9f   :  { %v104_v26 = vmax.f32 %v101_v24, 0.0 }
  0xa1   :  { %2811 = vmatmul.msk.f32.gmra.mxu1 %vm115_vm1, %v104_v26 }
 0x116   :  { %v139_v30 = vpop.f32.mrf.mxu1 }
 0x117   :  { %v140_v31 = vadd.f32 %v2922_v29, %v139_v30 }
 0x119   :  { %v145_v32 = vmax.f32 %v140_v31, 0.0 }
 0x11b   :  { %2812 = vmatmul.msk.f32.vlgmr.msra.gmra.mxu2 %vm73_vm0, %v145_v32 }
 0x11e   :  { %v142_v34 = vpop.f32.mrf.mxu1 }
 0x11f   :  { %v143_v35 = vadd.f32 %v2922_v29, %v142_v34 }
 0x121   :  { %v146_v36 = vmax.f32 %v143_v35, 0.0 }
 0x123   :  { %2813 = vmatmul.msk.f32.gmra.mxu2 %vm73_vm0, %v146_v36 }
 0x19e   :  { %v178_v41 = vpop.f32.mrf.mxu2 }
 0x19f   :  { %v179_v42 = vadd.f32 %v2923_v40, %v178_v41 }
 0x1a1   :  { %v184_v43 = vmax.f32 %v179_v42, 0.0 }
 0x1a3   :  { %2814 = vmatmul.msk.f32.vlgmr.msra.gmra.mxu3 %vm192_vm2, %v184_v43 }
 0x1a6   :  { %v181_v45 = vpop.f32.mrf.mxu2 }
 0x1a7   :  { %v182_v46 = vadd.f32 %v2923_v40, %v181_v45 }
 0x1a9   :  { %v185_v47 = vmax.f32 %v182_v46, 0.0 }
 0x1ab   :  { %2815 = vmatmul.msk.f32.gmra.mxu3 %vm192_vm2, %v185_v47 }
 0x226   :  { %v216_v52 = vpop.f32.mrf.mxu3 }
 0x227   :  { %v217_v53 = vadd.f32 %v3363_v51, %v216_v52 }
 0x229   :  { %v222_v54 = vmax.f32 %v217_v53, 0.0 }
 0x22b   :  { %2816 = vmatmul.msk.f32.vlgmr.msrb.gmra.mxu3 %vm192_vm2, %v222_v54 }
 0x22e   :  { %v3367_v55 = vpop.f32.mrf.mxu3 }
 0x22f   :  { %v220_v5 = vadd.f32 %v3363_v51, %v3367_v55  ;;  %v569_v51 = vld [vmem:[#allocation2 + $0x228] sm:$0xff]  ;;  %v568_v55 = vld [vmem:[#allocation2 + $0x220] sm:$0xff] }
 0x231   :  { %v3431_v6 = vmax.f32 %v220_v5, 0.0  ;;  %v780_v5 = vld [vmem:[#allocation2 + $0x150] sm:$0xff] }
 0x2ae   :  { %v250_v57 = vpop.f32.mrf.mxu3 }
 0x2af   :  { %v3372_v58 = vadd.f32 %v2925_v56, %v250_v57 }
 0x2b1   :  { %486 = vrot.lane.b32.xlu2 %v3372_v58, %s3268_s29  ;;  %350 = vrot.lane.b32.xlu1 %v3372_v58, %s3269_s30 }
 0x2b2   :  { %284 = vrot.lane.b32.xlu0 %v3372_v58, %s3270_s9 }
 0x2b9   :  { %417 = vrot.lane.b32.xlu2 %v3372_v58, %s3271_s10  ;;  %419 = vrot.lane.b32.xlu1 %v3372_v58, %s3272_s11 }
 0x2ba   :  { %352 = vrot.lane.b32.xlu0 %v3372_v58, %s3273_s12 }
 0x2c2   :  { %484 = vrot.lane.b32.xlu0 %v3372_v58, %s3274_s13 }
 0x30b   :  { %v487_v61 = vpop.permute.xlu2 %486 }
 0x313   :  { %v418_v0 = vpop.permute.xlu2 %417 }
 0x323   :  { %v351_v59 = vpop.permute.xlu1 %350 }
 0x324   :  { %v285_v60 = vpop.permute.xlu0 %284 }
 0x325   :  { %2817 = vmatpush.xpose.msk.msrb.mxu0 %vm286_vm3, %v285_v60  ;;  %v687_v60 = vld [vmem:[#allocation2 + $0xd8] sm:$0xff] }
 0x328   :  { %2818 = vmatmul.msk.f32.vlgmr.msrb.gmra.mxu0 %vm286_vm3, %v3372_v58 }
 0x32b   :  { %v420_v62 = vpop.permute.xlu1 %419 }
 0x32c   :  { %v353_v63 = vpop.permute.xlu0 %352  ;;  %2823 = vmatpush.xpose.msk.msra.mxu0 %vm286_vm3, %v420_v62  ;;  %v686_v62 = vld [vmem:[#allocation2 + $0xd0] sm:$0xff] }
 0x32d   :  { %2820 = vmatpush.xpose.msk.msrb.mxu1 %vm286_vm3, %v353_v63 }
 0x330   :  { %2821 = vmatmul.msk.f32.vlgmr.msrb.gmra.mxu1 %vm286_vm3, %v351_v59  ;;  %2824 = vmatmul.msk.f32.vlgmr.msra.gmra.mxu0 %vm286_vm3, %v418_v0  ;;  %v685_v0 = vld [vmem:[#allocation2 + $0xc8] sm:$0xff] }
 0x331   :  { %2826 = vmatpush.xpose.msk.msra.mxu1 %vm286_vm3, %v487_v61 }
 0x334   :  { %v485_v1 = vpop.permute.xlu0 %484 }
 0x338   :  { %2827 = vmatmul.msk.f32.vlgmr.msra.gmra.mxu1 %vm286_vm3, %v485_v1 }
 0x3a5   :  { %v308_v7 = vpop.f32.mrf.mxu0 }
 0x3a6   :  { %v311_v10 = vmul.f32 0.35355338, %v308_v7 }
 0x3a8   :  { %v312_v11 = vadd.f32 %v311_v10, %v3403_v9 }
 0x3aa   :  { %v313_v12 = vsel %vm286_vm3, %v312_v11, -inf }
 0x3ab   :  { %314 = vmax.xlane.f32.xlu1 %v313_v12  ;;  %v571_v12 = vld [vmem:[#allocation2 + $0x238] sm:$0xff] }
 0x3ac   :  { %589 = vmatpush.msrb.mxu0 %v571_v12  ;;  %v776_v12 = vld [vmem:[#allocation2 + $0x130] sm:$0xff] }
 0x3ad   :  { %v375_v13 = vpop.f32.mrf.mxu1  ;;  %v442_v14 = vpop.f32.mrf.mxu0 }
 0x3ae   :  { %v378_v15 = vmul.f32 0.35355338, %v375_v13  ;;  %v445_v16 = vmul.f32 0.35355338, %v442_v14  ;;  %v570_v13 = vld [vmem:[#allocation2 + $0x230] sm:$0xff]  ;;  %v717_v14 = vld [vmem:[#allocation2 + $0xf8] sm:$0xff] }
 0x3af   :  { %590 = vmatpush.msrb.mxu0 %v570_v13  ;;  %v1115_v13 = vld [vmem:[#allocation4 + $0x20] sm:$0xff] }
 0x3b0   :  { %v446_v17 = vadd.f32 %v445_v16, %v3403_v9  ;;  %v379_v18 = vadd.f32 %v378_v15, %v3403_v9  ;;  %v716_v15 = vld [vmem:[#allocation2 + $0xf0] sm:$0xff]  ;;  %v715_v16 = vld [vmem:[#allocation2 + $0xe8] sm:$0xff] }
 0x3b1   :  { %591 = vmatpush.msrb.mxu0 %v569_v51  ;;  %v1114_v51 = vld [vmem:[#allocation4 + $0x18] sm:$0xff] }
 0x3b2   :  { %v447_v19 = vsel %vm286_vm3, %v446_v17, -inf  ;;  %v380_v20 = vsel %vm286_vm3, %v379_v18, -inf }
 0x3b3   :  { %448 = vmax.xlane.f32.xlu0 %v447_v19  ;;  %381 = vmax.xlane.f32.xlu2 %v380_v20  ;;  %v603_v19 = vld [vmem:[#allocation2 + $0x250] sm:$0xff] }
 0x3b4   :  { %592 = vmatpush.msrb.mxu0 %v568_v55  ;;  %v1113_v55 = vld [vmem:[#allocation4 + $0x10] sm:$0xff] }
 0x3b5   :  { %v509_v21 = vpop.f32.mrf.mxu1 }
 0x3b6   :  { %v512_v22 = vmul.f32 0.35355338, %v509_v21  ;;  %735 = vmatpush.msra.mxu0 %v717_v14  ;;  %v1112_v14 = vld [vmem:[#allocation4 + $0x8] sm:$0xff] }
 0x3b8   :  { %v513_v23 = vadd.f32 %v512_v22, %v3403_v9  ;;  %736 = vmatpush.msra.mxu0 %v716_v15  ;;  %v1111_v15 = vld [vmem:[#allocation4] sm:$0xff] }
 0x3ba   :  { %v514_v24 = vsel %vm286_vm3, %v513_v23, -inf  ;;  %737 = vmatpush.msra.mxu0 %v715_v16  ;;  %v2929_v16 = vld [vmem:[%s4025_s3 + $0xd] ss:$0 sm:$0xff] }
 0x3bb   :  { %515 = vmax.xlane.f32.xlu2 %v514_v24 }
 0x3c4   :  { %324 = vrot.lane.b32.xlu1 %v3372_v58, %s3276_s15 }
 0x41e   :  { %v315_v25 = vpop.xlane.xlu1 %314 }
 0x41f   :  { %v316_v26 = vsub.f32 %v312_v11, %v315_v25 }
 0x421   :  { %v317_v27 = vmul.f32 1.442695, %v316_v26 }
 0x423   :  { %2958 = vpow2.f32 %v317_v27 }
 0x426   :  { %v382_v28 = vpop.xlane.xlu2 %381  ;;  %v449_v29 = vpop.xlane.xlu0 %448 }
 0x427   :  { %v383_v30 = vsub.f32 %v379_v18, %v382_v28  ;;  %v450_v31 = vsub.f32 %v446_v17, %v449_v29  ;;  %v714_v17 = vld [vmem:[#allocation2 + $0xe0] sm:$0xff]  ;;  %v604_v18 = vld [vmem:[#allocation2 + $0x258] sm:$0xff] }
 0x428   :  { %738 = vmatpush.msra.mxu0 %v714_v17 }
 0x429   :  { %v2959_v32 = vpop.eup %2958  ;;  %v384_v33 = vmul.f32 1.442695, %v383_v30  ;;  %v451_v34 = vmul.f32 1.442695, %v450_v31  ;;  %v602_v30 = vld [vmem:[#allocation2 + $0x248] sm:$0xff]  ;;  %v601_v31 = vld [vmem:[#allocation2 + $0x240] sm:$0xff] }
 0x42a   :  { %v319_v35 = vsel %vm286_vm3, %v2959_v32, 0.0 }
 0x42b   :  { %2960 = vpow2.f32 %v384_v33  ;;  %320 = vadd.xlane.f32.xlu1 %v319_v35  ;;  %v748_v33 = vld [vmem:[#allocation2 + $0x120] sm:$0xff]  ;;  %v746_v35 = vld [vmem:[#allocation2 + $0x110] sm:$0xff] }
 0x42c   :  { %2962 = vpow2.f32 %v451_v34  ;;  %v747_v34 = vld [vmem:[#allocation2 + $0x118] sm:$0xff] }
 0x42e   :  { %v516_v36 = vpop.xlane.xlu2 %515 }
 0x42f   :  { %v517_v37 = vsub.f32 %v513_v23, %v516_v36  ;;  %v2926_v23 = vld [vmem:[%s4025_s3 + $0x4] ss:$0 sm:$0xff]  ;;  %v745_v36 = vld [vmem:[#allocation2 + $0x108] sm:$0xff] }
 0x431   :  { %v2961_v38 = vpop.eup %2960  ;;  %v518_v39 = vmul.f32 1.442695, %v517_v37  ;;  %v744_v37 = vld [vmem:[#allocation2 + $0x100] sm:$0xff] }
 0x432   :  { %v2963_v40 = vpop.eup %2962  ;;  %v386_v41 = vsel %vm286_vm3, %v2961_v38, 0.0 }
 0x433   :  { %2964 = vpow2.f32 %v518_v39  ;;  %387 = vadd.xlane.f32.xlu2 %v386_v41  ;;  %v453_v42 = vsel %vm286_vm3, %v2963_v40, 0.0  ;;  %v645_v39 = vld [vmem:[#allocation2 + $0x2d0] sm:$0xff]  ;;  %v643_v41 = vld [vmem:[#allocation2 + $0x2c0] sm:$0xff] }
 0x434   :  { %454 = vadd.xlane.f32.xlu0 %v453_v42  ;;  %v783_v42 = vld [vmem:[#allocation2 + $0x168] sm:$0xff] }
 0x436   :  { %v325_v43 = vpop.permute.xlu1 %324 }
 0x437   :  { %345 = vmatpush.msrb.mxu2 %v325_v43  ;;  %v782_v43 = vld [vmem:[#allocation2 + $0x160] sm:$0xff] }
 0x439   :  { %v2965_v44 = vpop.eup %2964 }
 0x43a   :  { %v520_v45 = vsel %vm286_vm3, %v2965_v44, 0.0 }
 0x43b   :  { %521 = vadd.xlane.f32.xlu2 %v520_v45  ;;  %v641_v45 = vld [vmem:[#allocation2 + $0x2b0] sm:$0xff] }
 0x444   :  { %525 = vrot.lane.b32.xlu1 %v3372_v58, %s3277_s16 }
 0x448   :  { %391 = vrot.lane.b32.xlu0 %v3372_v58, %s3278_s2 }
 0x453   :  { %458 = vrot.lane.b32.xlu2 %v3372_v58, %s3279_s4 }
 0x49e   :  { %v321_v46 = vpop.xlane.xlu1 %320 }
 0x49f   :  { %2966 = vrcp.f32 %v321_v46  ;;  %v640_v46 = vld [vmem:[#allocation2 + $0x2a8] sm:$0xff] }
 0x4a5   :  { %v2967_v47 = vpop.eup %2966 }
 0x4a6   :  { %v388_v48 = vpop.xlane.xlu2 %387  ;;  %v323_v49 = vmul.f32 %v2967_v47, %v2959_v32  ;;  %v749_v32 = vld [vmem:[#allocation2 + $0x128] sm:$0xff]  ;;  %v639_v47 = vld [vmem:[#allocation2 + $0x2a0] sm:$0xff] }
 0x4a7   :  { %v455_v50 = vpop.xlane.xlu0 %454 }
 0x4a8   :  { %2819 = vmatmul.msk.f32.vlgmr.msrb.gmra.mxu2 %vm286_vm3, %v323_v49  ;;  %2968 = vrcp.f32 %v455_v50  ;;  %v638_v49 = vld [vmem:[#allocation2 + $0x298] sm:$0xff]  ;;  %v637_v50 = vld [vmem:[#allocation2 + $0x290] sm:$0xff] }
 0x4a9   :  { %2970 = vrcp.f32 %v388_v48  ;;  %v2927_v48 = vld [vmem:[%s4025_s3 + $0xc] ss:$0 sm:$0xff] }
 0x4ae   :  { %v522_v52 = vpop.xlane.xlu2 %521  ;;  %v2969_v53 = vpop.eup %2968 }
 0x4af   :  { %v457_v54 = vmul.f32 %v2969_v53, %v2963_v40  ;;  %v2971_v57 = vpop.eup %2970  ;;  %2972 = vrcp.f32 %v522_v52  ;;  %v644_v40 = vld [vmem:[#allocation2 + $0x2c8] sm:$0xff] }
 0x4b0   :  { %v390_v58 = vmul.f32 %v2971_v57, %v2961_v38  ;;  %v646_v38 = vld [vmem:[#allocation2 + $0x2d8] sm:$0xff]  ;;  %v635_v57 = vld [vmem:[#allocation2 + $0x280] sm:$0xff] }
 0x4b1   :  { %649 = vmatpush.msrb.mxu1 %v646_v38  ;;  %v810_v38 = vld [vmem:[#allocation2 + $0x170] sm:$0xff] }
 0x4b3   :  { %650 = vmatpush.msrb.mxu1 %v645_v39  ;;  %v886_v39 = vld [vmem:[#allocation2 + $0x1f8] sm:$0xff] }
 0x4b5   :  { %v2973_v63 = vpop.eup %2972  ;;  %651 = vmatpush.msrb.mxu1 %v644_v40  ;;  %v1155_v40 = vld [vmem:[#allocation4 + $0x50] sm:$0xff] }
 0x4b6   :  { %v459_v56 = vpop.permute.xlu2 %458  ;;  %v526_v61 = vpop.permute.xlu1 %525  ;;  %v524_v1 = vmul.f32 %v2973_v63, %v2965_v44  ;;  %v642_v44 = vld [vmem:[#allocation2 + $0x2b8] sm:$0xff] }
 0x4b7   :  { %479 = vmatpush.msra.mxu2 %v459_v56  ;;  %652 = vmatpush.msrb.mxu1 %v643_v41  ;;  %v885_v41 = vld [vmem:[#allocation2 + $0x1f0] sm:$0xff] }
 0x4b8   :  { %2825 = vmatmul.msk.f32.vlgmr.msra.gmra.mxu2 %vm286_vm3, %v457_v54  ;;  %v636_v54 = vld [vmem:[#allocation2 + $0x288] sm:$0xff] }
 0x4b9   :  { %622 = vmatpush.msrb.mxu2 %v604_v18  ;;  %653 = vmatpush.msrb.mxu1 %v642_v44  ;;  %v1153_v44 = vld [vmem:[#allocation4 + $0x40] sm:$0xff] }
 0x4ba   :  { %v392_v59 = vpop.permute.xlu0 %391 }
 0x4bb   :  { %412 = vmatpush.msra.mxu3 %v392_v59  ;;  %623 = vmatpush.msrb.mxu2 %v603_v19  ;;  %v2928_v59 = vld [vmem:[%s4025_s3 + $0x5] ss:$0 sm:$0xff] }
 0x4bc   :  { %2822 = vmatmul.msk.f32.vlgmr.msra.gmra.mxu3 %vm286_vm3, %v390_v58  ;;  %654 = vmatpush.msrb.mxu1 %v641_v45  ;;  %v883_v45 = vld [vmem:[#allocation2 + $0x1e0] sm:$0xff] }
 0x4bd   :  { %546 = vmatpush.msrb.mxu3 %v526_v61  ;;  %624 = vmatpush.msrb.mxu2 %v602_v30  ;;  %v853_v30 = vld [vmem:[#allocation2 + $0x1b0] sm:$0xff] }
 0x4be   :  { %655 = vmatpush.msrb.mxu1 %v640_v46  ;;  %v1152_v46 = vld [vmem:[#allocation4 + $0x38] sm:$0xff] }
 0x4bf   :  { %705 = vmatpush.msra.mxu3 %v687_v60  ;;  %625 = vmatpush.msrb.mxu2 %v601_v31  ;;  %v634_v60 = vld [vmem:[#allocation2 + $0x278] sm:$0xff]  ;;  %v813_v31 = vld [vmem:[#allocation2 + $0x188] sm:$0xff] }
 0x4c0   :  { %656 = vmatpush.msrb.mxu1 %v639_v47  ;;  %v882_v47 = vld [vmem:[#allocation2 + $0x1d8] sm:$0xff] }
 0x4c1   :  { %706 = vmatpush.msra.mxu3 %v686_v62  ;;  %765 = vmatpush.msra.mxu2 %v749_v32  ;;  %v852_v32 = vld [vmem:[#allocation2 + $0x1a8] sm:$0xff] }
 0x4c2   :  { %657 = vmatpush.msrb.mxu1 %v638_v49  ;;  %v881_v49 = vld [vmem:[#allocation2 + $0x1d0] sm:$0xff] }
 0x4c3   :  { %707 = vmatpush.msra.mxu3 %v685_v0  ;;  %766 = vmatpush.msra.mxu2 %v748_v33  ;;  %v633_v0 = vld [vmem:[#allocation2 + $0x270] sm:$0xff]  ;;  %v812_v33 = vld [vmem:[#allocation2 + $0x180] sm:$0xff] }
 0x4c4   :  { %2828 = vmatmul.msk.f32.vlgmr.msrb.gmra.mxu3 %vm286_vm3, %v524_v1  ;;  %658 = vmatpush.msrb.mxu1 %v637_v50  ;;  %v781_v1 = vld [vmem:[#allocation2 + $0x158] sm:$0xff]  ;;  %v1150_v50 = vld [vmem:[#allocation4 + $0x28] sm:$0xff] }
 0x4c5   :  { %708 = vmatpush.msra.mxu3 %v684_v2  ;;  %767 = vmatpush.msra.mxu2 %v747_v34  ;;  %v632_v2 = vld [vmem:[#allocation2 + $0x268] sm:$0xff]  ;;  %v851_v34 = vld [vmem:[#allocation2 + $0x1a0] sm:$0xff] }
 0x4c6   :  { %659 = vmatpush.msrb.mxu1 %v636_v54 }
 0x4c7   :  { %768 = vmatpush.msra.mxu2 %v746_v35  ;;  %797 = vmatpush.msrb.mxu3 %v783_v42  ;;  %v811_v35 = vld [vmem:[#allocation2 + $0x178] sm:$0xff]  ;;  %v1154_v42 = vld [vmem:[#allocation4 + $0x48] sm:$0xff] }
 0x4c8   :  { %660 = vmatpush.msrb.mxu1 %v635_v57  ;;  %v3473_v57 = vld [vmem:[%s4027_s5] ss:$0 sm:$0xff] }
 0x4c9   :  { %769 = vmatpush.msra.mxu2 %v745_v36  ;;  %798 = vmatpush.msrb.mxu3 %v782_v43  ;;  %v1157_v36 = vld [vmem:[#allocation4 + $0x60] sm:$0xff]  ;;  %v884_v43 = vld [vmem:[#allocation2 + $0x1e8] sm:$0xff] }
 0x4ca   :  { %661 = vmatpush.msrb.mxu1 %v634_v60 }
 0x4cb   :  { %770 = vmatpush.msra.mxu2 %v744_v37  ;;  %799 = vmatpush.msrb.mxu3 %v781_v1  ;;  %v1156_v37 = vld [vmem:[#allocation4 + $0x58] sm:$0xff]  ;;  %v1192_v1 = vld [vmem:[#allocation4 + $0x70] sm:$0xff] }
 0x4cc   :  { %2831 = vmatmul.msk.f32.vlgmr.msra.gmra.mxu3 %vm192_vm2, %v3431_v6  ;;  %662 = vmatpush.msrb.mxu1 %v633_v0  ;;  %v1193_v0 = vld [vmem:[#allocation4 + $0x78] sm:$0xff] }
 0x4cd   :  { %800 = vmatpush.msrb.mxu3 %v780_v5  ;;  %v3481_v5 = vld [vmem:[%s4022_s0 + $0xc] sm:$0xf] }
 0x4ce   :  { %663 = vmatpush.msrb.mxu1 %v632_v2  ;;  %v1191_v2 = vld [vmem:[#allocation4 + $0x68] sm:$0xff]  ;;  %vm1089_vm9 = vcmp.lt.f32.partialorder %v3481_v5, 1e-08 }
 0x52b   :  { %v347_v7 = vpop.f32.mrf.mxu2 }
 0x53b   :  { %v481_v8 = vpop.f32.mrf.mxu2 }
 0x53c   :  { %556 = vrot.lane.b32.xlu1 %v481_v8, %s3280_s17  ;;  %v779_v8 = vld [vmem:[#allocation2 + $0x148] sm:$0xff] }
 0x53d   :  { %801 = vmatpush.msrb.mxu3 %v779_v8 }
 0x53f   :  { %v414_v10 = vpop.f32.mrf.mxu3 }
 0x540   :  { %552 = vrot.lane.b32.xlu0 %v414_v10, %s3266_s14  ;;  %v778_v10 = vld [vmem:[#allocation2 + $0x140] sm:$0xff] }
 0x541   :  { %802 = vmatpush.msrb.mxu3 %v778_v10  ;;  %v2934_v10 = vld [vmem:[%s4025_s3 + $0x8] ss:$0 sm:$0xff] }
 0x547   :  { %v548_v11 = vpop.f32.mrf.mxu3 }
 0x548   :  { %560 = vrot.lane.b32.xlu0 %v548_v11, %s3281_s18  ;;  %v777_v11 = vld [vmem:[#allocation2 + $0x138] sm:$0xff] }
 0x549   :  { %803 = vmatpush.msrb.mxu3 %v777_v11 }
 0x54b   :  { %804 = vmatpush.msrb.mxu3 %v776_v12 }
 0x54d   :  { %1136 = vmatpush.msra.mxu3 %v1115_v13 }
 0x54f   :  { %v710_v26 = vpop.f32.mrf.mxu3  ;;  %1137 = vmatpush.msra.mxu3 %v1114_v51 }
 0x550   :  { %v711_v28 = vadd.f32 %v2926_v23, %v710_v26  ;;  %v855_v26 = vld [vmem:[#allocation2 + $0x1c0] sm:$0xff] }
 0x551   :  { %1138 = vmatpush.msra.mxu3 %v1113_v55 }
 0x552   :  { %v713_v29 = vmax.f32 %v711_v28, 0.0  ;;  %v854_v28 = vld [vmem:[#allocation2 + $0x1b8] sm:$0xff] }
 0x553   :  { %1139 = vmatpush.msra.mxu3 %v1112_v14  ;;  %v2935_v14 = vld [vmem:[%s4025_s3 + $0x9] ss:$0 sm:$0xff] }
 0x555   :  { %1140 = vmatpush.msra.mxu3 %v1111_v15 }
 0x5ae   :  { %v557_v22 = vpop.permute.xlu1 %556 }
 0x5b2   :  { %v553_v20 = vpop.permute.xlu0 %552 }
 0x5b3   :  { %v563_v21 = vsel %vm286_vm3, %v347_v7, %v553_v20  ;;  %v631_v7 = vld [vmem:[#allocation2 + $0x260] sm:$0xff] }
 0x5b4   :  { %v565_v24 = vsel %vm564_vm5, %v563_v21, %v557_v22  ;;  %664 = vmatpush.msrb.mxu1 %v631_v7  ;;  %v2930_v20 = vld [vmem:[%s4025_s3 + $0x6] ss:$0 sm:$0xff]  ;;  %v3484_v7 = vmax.f32 %v3481_v5, 0.0001 }
 0x5b6   :  { %v961_v8 = vadd.f32 1.0, %v3484_v7 }
 0x5b8   :  { %v3490_v11 = vadd.f32 -1.0, %v961_v8 }
 0x5ba   :  { %v561_v25 = vpop.permute.xlu0 %560  ;;  %v963_v51 = vadd.f32 1.0, %v3490_v11  ;;  %v991_v8 = vadd.f32 8.0, %v3490_v11 }
 0x5bb   :  { %v567_v27 = vsel %vm566_vm6, %v565_v24, %v561_v25  ;;  %v1107_v24 = vld [vmem:[%s4023_s1] sm:$0xff]  ;;  %v856_v25 = vld [vmem:[#allocation2 + $0x1c8] sm:$0xff] }
 0x5bc   :  { %2829 = vmatmul.msk.f32.vlgmr.msrb.gmra.mxu0 %vm192_vm2, %v567_v27  ;;  %v815_v27 = vld [vmem:[#allocation2 + $0x198] sm:$0xff]  ;;  %2974 = vrcp.f32 %v963_v51 }
 0x5bd   :  { %831 = vmatpush.msrb.mxu0 %v815_v27  ;;  %v3504_v27 = vld [vmem:[%s4027_s5 + $0x1] ss:$0 sm:$0xff] }
 0x5c4   :  { %2832 = vmatmul.msk.f32.vlgmr.msra.gmra.mxu0 %vm192_vm2, %v713_v29  ;;  %v814_v29 = vld [vmem:[#allocation2 + $0x190] sm:$0xff] }
 0x5c5   :  { %832 = vmatpush.msrb.mxu0 %v814_v29 }
 0x5c7   :  { %833 = vmatpush.msrb.mxu0 %v813_v31 }
 0x5c9   :  { %834 = vmatpush.msrb.mxu0 %v812_v33 }
 0x5cb   :  { %835 = vmatpush.msrb.mxu0 %v811_v35 }
 0x5cd   :  { %836 = vmatpush.msrb.mxu0 %v810_v38 }
 0x5cf   :  { %899 = vmatpush.msra.mxu0 %v886_v39 }
 0x5d1   :  { %900 = vmatpush.msra.mxu0 %v885_v41 }
 0x5d3   :  { %901 = vmatpush.msra.mxu0 %v884_v43 }
 0x5d5   :  { %902 = vmatpush.msra.mxu0 %v883_v45 }
 0x5d7   :  { %903 = vmatpush.msra.mxu0 %v882_v47 }
 0x5d9   :  { %904 = vmatpush.msra.mxu0 %v881_v49  ;;  %v64_v49 = vld [vmem:[%s4022_s0 + $0x10] sm:$0xf] }
 0x639   :  { %v594_v52 = vpop.f32.mrf.mxu0 }
 0x63a   :  { %v595_v53 = vadd.f32 %v2927_v48, %v594_v52  ;;  %v1151_v48 = vld [vmem:[#allocation4 + $0x30] sm:$0xff]  ;;  %v2932_v52 = vld [vmem:[%s4025_s3 + $0x7] ss:$0 sm:$0xff] }
 0x63c   :  { %v598_v56 = vrot.slane %v595_v53, 4 }
 0x63e   :  { %v600_v58 = vmax.f32 %v595_v53, %v598_v56 }
 0x640   :  { %2830 = vmatmul.msk.f32.vlgmr.msrb.gmra.mxu2 %vm192_vm2, %v600_v58 }
 0x641   :  { %v740_v61 = vpop.f32.mrf.mxu0  ;;  %869 = vmatpush.msrb.mxu2 %v856_v25 }
 0x642   :  { %v741_v62 = vadd.f32 %v2928_v59, %v740_v61  ;;  %v1196_v61 = vld [vmem:[#allocation4 + $0x90] sm:$0xff] }
 0x643   :  { %870 = vmatpush.msrb.mxu2 %v855_v26  ;;  %1215 = vmatpush.msra.mxu1 %v1196_v61 }
 0x644   :  { %v743_v63 = vmax.f32 %v741_v62, 0.0  ;;  %v1195_v62 = vld [vmem:[#allocation4 + $0x88] sm:$0xff] }
 0x645   :  { %871 = vmatpush.msrb.mxu2 %v854_v28  ;;  %1216 = vmatpush.msra.mxu1 %v1195_v62 }
 0x647   :  { %872 = vmatpush.msrb.mxu2 %v853_v30  ;;  %v975_v30 = vadd.f32 4.0, %v3490_v11 }
 0x648   :  { %2833 = vmatmul.msk.f32.vlgmr.msra.gmra.mxu2 %vm73_vm0, %v743_v63  ;;  %v1194_v63 = vld [vmem:[#allocation4 + $0x80] sm:$0xff] }
 0x649   :  { %873 = vmatpush.msrb.mxu2 %v852_v32  ;;  %1217 = vmatpush.msra.mxu1 %v1194_v63  ;;  %v987_v63 = vadd.f32 7.0, %v3490_v11 }
 0x64b   :  { %874 = vmatpush.msrb.mxu2 %v851_v34  ;;  %1218 = vmatpush.msra.mxu1 %v1193_v0 }
 0x64d   :  { %1174 = vmatpush.msra.mxu2 %v1157_v36  ;;  %1219 = vmatpush.msra.mxu1 %v1192_v1 }
 0x64f   :  { %1175 = vmatpush.msra.mxu2 %v1156_v37  ;;  %1220 = vmatpush.msra.mxu1 %v1191_v2  ;;  %v979_v37 = vadd.f32 5.0, %v3490_v11 }
 0x651   :  { %1176 = vmatpush.msra.mxu2 %v1155_v40  ;;  %v1233_v40 = vld [vmem:[#allocation4 + $0xb0] sm:$0xff] }
 0x653   :  { %1177 = vmatpush.msra.mxu2 %v1154_v42 }
 0x655   :  { %1178 = vmatpush.msra.mxu2 %v1153_v44 }
 0x657   :  { %1179 = vmatpush.msra.mxu2 %v1152_v46 }
 0x659   :  { %1180 = vmatpush.msra.mxu2 %v1151_v48 }
 0x65b   :  { %1181 = vmatpush.msra.mxu2 %v1150_v50 }
 0x6c3   :  { %v627_v17 = vpop.f32.mrf.mxu2 }
 0x6c4   :  { %v628_v18 = vadd.f32 %v2929_v16, %v627_v17  ;;  %v2936_v16 = vld [vmem:[%s4025_s3 + $0xa] ss:$0 sm:$0xff] }
 0x6c6   :  { %v630_v19 = vmax.f32 %v628_v18, 0.0  ;;  %v967_v18 = vadd.f32 2.0, %v3490_v11 }
 0x6c8   :  { %665 = vmatmul.f32.vlgmr.msrb.gmra.mxu1 %v630_v19 }
 0x6cb   :  { %v772_v21 = vpop.f32.mrf.mxu2 }
 0x6cc   :  { %v773_v22 = vadd.f32 %v2930_v20, %v772_v21 }
 0x6ce   :  { %v775_v23 = vmax.f32 %v773_v22, 0.0 }
 0x6d0   :  { %2834 = vmatmul.msk.f32.vlgmr.msrb.gmra.mxu3 %vm115_vm1, %v775_v23  ;;  %v971_v23 = vadd.f32 3.0, %v3490_v11 }
 0x6d8   :  { %2841 = vmatmul.msk.f32.vlgmr.msra.gmra.mxu3 %vm1118_vm7, %v1107_v24  ;;  %v2975_v24 = vpop.eup %2974 }
 0x6d9   :  { %v965_v33 = vmul.f32 676.5204, %v2975_v24 }
 0x6db   :  { %v966_v41 = vadd.f32 1.0, %v965_v33 }
 0x745   :  { %v3581_v5 = vpop.f32.mrf.mxu1 }
 0x753   :  { %v806_v53 = vpop.f32.mrf.mxu3 }
 0x754   :  { %v807_v54 = vadd.f32 %v2932_v52, %v806_v53  ;;  %v983_v53 = vadd.f32 6.0, %v3490_v11 }
 0x756   :  { %v809_v56 = vmax.f32 %v807_v54, 0.0 }
 0x758   :  { %2835 = vmatmul.msk.f32.vlgmr.msrb.gmra.mxu0 %vm73_vm0, %v809_v56  ;;  %2836 = vmatmul.msk.f32.vlgmr.msrb.gmra.mxu2 %vm73_vm0, %v809_v56 }
 0x759   :  { %1254 = vmatpush.msrb.mxu0 %v1233_v40 }
 0x75b   :  { %v1142_v58 = vpop.f32.mrf.mxu3 }
 0x75c   :  { %v1143_v59 = vadd.f32 %v3473_v57, %v1142_v58 }
 0x75e   :  { %v1148_v60 = vmax.f32 %v1143_v59, 0.0 }
 0x760   :  { %2837 = vmatmul.msk.f32.vlgmr.msra.gmra.mxu0 %vm73_vm0, %v809_v56  ;;  %2843 = vmatmul.msk.f32.vlgmr.msra.gmra.mxu2 %vm115_vm1, %v1148_v60 }
 0x7d5   :  { %v838_v12 = vpop.f32.mrf.mxu0 }
 0x7d6   :  { %v839_v13 = vadd.f32 %v2934_v10, %v838_v12 }
 0x7d8   :  { %v841_v55 = vsub.f32 0.0, %v839_v13 }
 0x7da   :  { %v842_v15 = vmul.f32 1.442695, %v841_v55 }
 0x7db   :  { %v876_v17 = vpop.f32.mrf.mxu2 }
 0x7dc   :  { %2976 = vpow2.f32 %v842_v15  ;;  %v877_v19 = vadd.f32 %v2935_v14, %v876_v17 }
 0x7dd   :  { %v906_v20 = vpop.f32.mrf.mxu0  ;;  %2978 = vrcp.f32 %v967_v18 }
 0x7de   :  { %v879_v21 = vmax.f32 %v877_v19, 0.0001  ;;  %v907_v22 = vadd.f32 %v2936_v16, %v906_v20 }
 0x7e0   :  { %v880_v25 = vmin.f32 %v879_v21, 10000.0  ;;  %v909_v26 = vmul.f32 1.442695, %v907_v22 }
 0x7e2   :  { %v2977_v28 = vpop.eup %2976  ;;  %v3506_v29 = vmin.f32 %v880_v25, 1000000.0  ;;  %2980 = vpow2.f32 %v909_v26 }
 0x7e3   :  { %v844_v31 = vadd.f32 1.0, %v2977_v28  ;;  %v1183_v32 = vpop.f32.mrf.mxu2  ;;  %2982 = vrcp.f32 %v971_v23  ;;  %v2979_v36 = vpop.eup %2978 }
 0x7e4   :  { %v3510_v34 = vadd.f32 1e-08, %v3506_v29  ;;  %v1184_v35 = vadd.f32 %v3504_v27, %v1183_v32  ;;  %2984 = vrcp.f32 %v975_v30  ;;  %v969_v46 = vmul.f32 -1259.1392, %v2979_v36 }
 0x7e5   :  { %2986 = vrcp.f32 %v844_v31  ;;  %v3528_v54 = vadd.f32 %v3506_v29, %v3484_v7 }
 0x7e6   :  { %v3515_v38 = vadd.f32 -1.0, %v3510_v34  ;;  %v1189_v39 = vmax.f32 %v1184_v35, 0.0  ;;  %2988 = vrcp.f32 %v979_v37  ;;  %v970_v59 = vadd.f32 %v969_v46, %v966_v41 }
 0x7e7   :  { %v1007_v10 = vadd.f32 1e-08, %v3528_v54  ;;  %v3543_v35 = vadd.f32 0.5, %v987_v63 }
 0x7e8   :  { %v2981_v42 = vpop.eup %2980  ;;  %2845 = vmatmul.msk.f32.vlgmr.msra.gmra.mxu1 %vm73_vm0, %v1189_v39  ;;  %v919_v43 = vadd.f32 1.0, %v3515_v38  ;;  %v923_v44 = vadd.f32 2.0, %v3515_v38  ;;  %v927_v45 = vadd.f32 3.0, %v3515_v38  ;;  %v931_v50 = vadd.f32 4.0, %v3515_v38 }
 0x7e9   :  { %v2983_v47 = vpop.eup %2982  ;;  %v911_v48 = vmax.f32 %v2981_v42, 1e-05  ;;  %v935_v58 = vadd.f32 5.0, %v3515_v38  ;;  %v939_v0 = vadd.f32 6.0, %v3515_v38  ;;  %v943_v17 = vadd.f32 7.0, %v3515_v38 }
 0x7ea   :  { %2990 = vrcp.f32 %v919_v43  ;;  %v2985_v56 = vpop.eup %2984  ;;  %v973_v60 = vmul.f32 771.3234, %v2983_v47  ;;  %v3540_v22 = vadd.f32 -1.0, %v1007_v10  ;;  %v947_v32 = vadd.f32 8.0, %v3515_v38 }
 0x7eb   :  { %v912_v52 = vmin.f32 %v911_v48, 1000000.0  ;;  %2992 = vrcp.f32 %v923_v44  ;;  %v2987_v61 = vpop.eup %2986  ;;  %v977_v55 = vmul.f32 -176.61504, %v2985_v56 }
 0x7ec   :  { %2994 = vrcp.f32 %v927_v45  ;;  %v2989_v1 = vpop.eup %2988  ;;  %v846_v13 = vsub.f32 0.0, %v2987_v61  ;;  %v974_v51 = vadd.f32 %v973_v60, %v970_v59  ;;  %v1009_v40 = vadd.f32 1.0, %v3540_v22 }
 0x7ed   :  { %v913_v62 = vmul.f32 %v912_v52, %v64_v49  ;;  %2996 = vrcp.f32 %v931_v50  ;;  %v981_v26 = vmul.f32 12.507343, %v2989_v1  ;;  %v1013_v44 = vadd.f32 2.0, %v3540_v22 }
 0x7ee   :  { %2998 = vrcp.f32 %v983_v53  ;;  %v847_v24 = vmul.f32 1.442695, %v846_v13  ;;  %v978_v25 = vadd.f32 %v977_v55, %v974_v51  ;;  %v1017_v47 = vadd.f32 3.0, %v3540_v22 }
 0x7ef   :  { %v3533_v2 = vmax.f32 %v913_v62, 0.0  ;;  %3000 = vrcp.f32 %v935_v58  ;;  %v1021_v49 = vadd.f32 4.0, %v3540_v22  ;;  %v3551_v58 = vadd.f32 0.5, %v943_v17 }
 0x7f0   :  { %v2991_v12 = vpop.eup %2990  ;;  %3002 = vrcp.f32 %v987_v63  ;;  %v982_v42 = vadd.f32 %v981_v26, %v978_v25  ;;  %v1029_v13 = vadd.f32 6.0, %v3540_v22 }
 0x7f1   :  { %v2993_v14 = vpop.eup %2992  ;;  %v1074_v15 = vadd.f32 %v3506_v29, %v3533_v2  ;;  %v921_v16 = vmul.f32 676.5204, %v2991_v12  ;;  %3004 = vrcp.f32 %v939_v0  ;;  %v1025_v0 = vadd.f32 5.0, %v3540_v22 }
 0x7f2   :  { %v2995_v18 = vpop.eup %2994  ;;  %v925_v21 = vmul.f32 -1259.1392, %v2993_v14  ;;  %3006 = vrcp.f32 %v991_v8  ;;  %v1033_v8 = vadd.f32 7.0, %v3540_v22  ;;  %v1060_v55 = vadd.f32 1e-08, %v3533_v2 }
 0x7f3   :  { %v1075_v19 = vadd.f32 1e-08, %v1074_v15  ;;  %v922_v20 = vadd.f32 1.0, %v921_v16  ;;  %v2997_v23 = vpop.eup %2996  ;;  %v929_v31 = vmul.f32 771.3234, %v2995_v18  ;;  %3008 = vrcp.f32 %v943_v17 }
 0x7f4   :  { %v2999_v28 = vpop.eup %2998  ;;  %v933_v39 = vmul.f32 -176.61504, %v2997_v23 }
 0x7f5   :  { %v926_v30 = vadd.f32 %v925_v21, %v922_v20  ;;  %v3001_v33 = vpop.eup %3000  ;;  %3010 = vrcp.f32 %v1075_v19  ;;  %v985_v43 = vmul.f32 -0.1385711, %v2999_v28  ;;  %v3559_v20 = vadd.f32 0.5, %v1033_v8 }
 0x7f6   :  { %v3003_v36 = vpop.eup %3002  ;;  %3012 = vrcp.f32 %v3510_v34  ;;  %v937_v46 = vmul.f32 12.507343, %v3001_v33 }
 0x7f7   :  { %v930_v37 = vadd.f32 %v929_v31, %v926_v30  ;;  %v3005_v41 = vpop.eup %3004  ;;  %3014 = vpow2.f32 %v847_v24  ;;  %v986_v59 = vadd.f32 %v985_v43, %v982_v42  ;;  %v989_v60 = vmul.f32 9.984369e-06, %v3003_v36 }
 0x7f8   :  { %3016 = vrcp.f32 %v947_v32  ;;  %v3007_v48 = vpop.eup %3006  ;;  %v941_v53 = vmul.f32 -0.1385711, %v3005_v41  ;;  %v1037_v24 = vadd.f32 8.0, %v3540_v22  ;;  %v996_v43 = vadd.f32 0.5, %v3490_v11 }
 0x7f9   :  { %v934_v45 = vadd.f32 %v933_v39, %v930_v37  ;;  %3018 = vlog2.f32 %v3543_v35  ;;  %v3009_v50 = vpop.eup %3008  ;;  %v990_v16 = vadd.f32 %v989_v60, %v986_v59  ;;  %v993_v17 = vmul.f32 1.5056327e-07, %v3007_v48 }
 0x7fa   :  { %3020 = vrcp.f32 %v1009_v40  ;;  %v945_v12 = vmul.f32 9.984369e-06, %v3009_v50  ;;  %v952_v60 = vadd.f32 0.5, %v3515_v38 }
 0x7fb   :  { %v938_v52 = vadd.f32 %v937_v46, %v934_v45  ;;  %v3011_v56 = vpop.eup %3010  ;;  %3022 = vrcp.f32 %v1013_v44  ;;  %v994_v36 = vadd.f32 %v993_v17, %v990_v16 }
 0x7fc   :  { %v3013_v61 = vpop.eup %3012  ;;  %v1077_v62 = vmul.f32 %v3011_v56, %v3506_v29  ;;  %3024 = vrcp.f32 %v1017_v47 }
 0x7fd   :  { %v942_v63 = vadd.f32 %v941_v53, %v938_v52  ;;  %v3015_v1 = vpop.eup %3014  ;;  %3026 = vrcp.f32 %v1021_v49  ;;  %v1053_v32 = vmul.f32 %v3013_v61, %v3533_v2 }
 0x7fe   :  { %v3017_v10 = vpop.eup %3016  ;;  %3028 = vlog2.f32 %v1077_v62  ;;  %v849_v26 = vadd.f32 1.0, %v3015_v1 }
 0x7ff   :  { %v3019_v51 = vpop.eup %3018  ;;  %3030 = vlog2.f32 %v3551_v58  ;;  %v946_v15 = vadd.f32 %v945_v12, %v942_v63  ;;  %v949_v23 = vmul.f32 1.5056327e-07, %v3017_v10  ;;  %v1054_v48 = vadd.f32 1.0, %v1053_v32 }
 0x800   :  { %v3021_v14 = vpop.eup %3020  ;;  %3032 = vrcp.f32 %v1025_v0  ;;  %v998_v44 = vmul.f32 0.6931472, %v3019_v51 }
 0x801   :  { %v3023_v18 = vpop.eup %3022  ;;  %v1011_v19 = vmul.f32 676.5204, %v3021_v14  ;;  %3034 = vrcp.f32 %v1029_v13  ;;  %v950_v33 = vadd.f32 %v949_v23, %v946_v15 }
 0x802   :  { %v3025_v21 = vpop.eup %3024  ;;  %3036 = vlog2.f32 %v1060_v55  ;;  %v1015_v30 = vmul.f32 -1259.1392, %v3023_v18  ;;  %v999_v11 = vmul.f32 %v998_v44, %v996_v43 }
 0x803   :  { %v3027_v25 = vpop.eup %3026  ;;  %v1012_v28 = vadd.f32 1.0, %v1011_v19  ;;  %3038 = vrcp.f32 %v1033_v8  ;;  %v1019_v41 = vmul.f32 771.3234, %v3025_v21 }
 0x804   :  { %v3029_v31 = vpop.eup %3028  ;;  %3040 = vlog2.f32 %v3559_v20  ;;  %v1023_v46 = vmul.f32 -176.61504, %v3027_v25  ;;  %v1000_v13 = vadd.f32 0.9189385, %v999_v11 }
 0x805   :  { %v3031_v37 = vpop.eup %3030  ;;  %v1079_v39 = vmul.f32 0.6931472, %v3029_v31  ;;  %v1016_v40 = vadd.f32 %v1015_v30, %v1012_v28  ;;  %3042 = vrcp.f32 %v1037_v24 }
 0x806   :  { %v3033_v42 = vpop.eup %3032  ;;  %3044 = vrcp.f32 %v849_v26  ;;  %v954_v49 = vmul.f32 0.6931472, %v3031_v37  ;;  %v1001_v26 = vsub.f32 %v1000_v13, %v3543_v35  ;;  %v1269_v13 = vld [vmem:[#allocation4 + $0x1f0] sm:$0xff] }
 0x807   :  { %v1020_v45 = vadd.f32 %v1019_v41, %v1016_v40  ;;  %v1080_v47 = vmul.f32 %v1079_v39, %v3506_v29  ;;  %v3035_v2 = vpop.eup %3034  ;;  %3046 = vlog2.f32 %v994_v36  ;;  %v1027_v53 = vmul.f32 12.507343, %v3033_v42 }
 0x808   :  { %v3037_v50 = vpop.eup %3036  ;;  %3048 = vlog2.f32 %v950_v33  ;;  %v1031_v63 = vmul.f32 -0.1385711, %v3035_v2  ;;  %v955_v0 = vmul.f32 %v954_v49, %v952_v60 }
 0x809   :  { %v1024_v52 = vadd.f32 %v1023_v46, %v1020_v45  ;;  %v1081_v56 = vmul.f32 1.442695, %v1080_v47  ;;  %v3039_v59 = vpop.eup %3038  ;;  %3050 = vlog2.f32 %v3510_v34  ;;  %v1042_v34 = vadd.f32 0.5, %v3540_v22 }
 0x80a   :  { %v3041_v61 = vpop.eup %3040  ;;  %v1035_v10 = vmul.f32 9.984369e-06, %v3039_v59  ;;  %v956_v16 = vadd.f32 0.9189385, %v955_v0  ;;  %v1062_v19 = vmul.f32 0.6931472, %v3037_v50 }
 0x80b   :  { %v1028_v62 = vadd.f32 %v1027_v53, %v1024_v52  ;;  %3052 = vpow2.f32 %v1081_v56  ;;  %v3043_v29 = vpop.eup %3042  ;;  %v1044_v51 = vmul.f32 0.6931472, %v3041_v61  ;;  %v1270_v0 = vld [vmem:[#allocation4 + $0x1f8] sm:$0xff] }
 0x80c   :  { %3054 = vlog2.f32 %v1054_v48  ;;  %v3045_v1 = vpop.eup %3044  ;;  %v1039_v15 = vmul.f32 1.5056327e-07, %v3043_v29  ;;  %v957_v32 = vsub.f32 %v956_v16, %v3551_v58  ;;  %v1108_v29 = vld [vmem:[%s4023_s1 + $0x8] sm:$0xf]  ;;  %1288 = vmatpush.msrb.mxu3 %v1270_v0  ;;  %v3595_v16 = vld [vmem:[%s4027_s5 + $0x3] ss:$0 sm:$0xff] }
 0x80d   :  { %v1032_v8 = vadd.f32 %v1031_v63, %v1028_v62  ;;  %v3047_v12 = vpop.eup %3046  ;;  %v1069_v17 = vsub.f32 1.0, %v3045_v1  ;;  %v1045_v28 = vmul.f32 %v1044_v51, %v1042_v34  ;;  %v1091_v11 = vmul.f32 %v3045_v1, %v3045_v1  ;;  %v1232_v62 = vld [vmem:[#allocation4 + $0xa8] sm:$0xff]  ;;  %v1230_v63 = vld [vmem:[#allocation4 + $0x98] sm:$0xff]  ;;  %2842 = vmatmul.msk.f32.gmra.mxu3 %vm1118_vm7, %v1108_v29 }
 0x80e   :  { %v3049_v55 = vpop.eup %3048  ;;  %v1003_v21 = vmul.f32 0.6931472, %v3047_v12  ;;  %1255 = vmatpush.msrb.mxu0 %v1232_v62  ;;  %1289 = vmatpush.msrb.mxu3 %v1269_v13  ;;  %v1268_v51 = vld [vmem:[#allocation4 + $0x1e8] sm:$0xff] }
 0x80f   :  { %v1036_v14 = vadd.f32 %v1035_v10, %v1032_v8  ;;  %v3051_v38 = vpop.eup %3050  ;;  %v959_v25 = vmul.f32 0.6931472, %v3049_v55  ;;  %v1070_v39 = vadd.f32 1e-08, %v1069_v17  ;;  %v1046_v41 = vadd.f32 0.9189385, %v1045_v28 }
 0x810   :  { %v1059_v31 = vmul.f32 0.6931472, %v3051_v38  ;;  %v1004_v40 = vadd.f32 %v1003_v21, %v1001_v26  ;;  %1290 = vmatpush.msrb.mxu3 %v1268_v51  ;;  %v1267_v55 = vld [vmem:[#allocation4 + $0x1e0] sm:$0xff] }
 0x811   :  { %v3053_v18 = vpop.eup %3052  ;;  %v1040_v23 = vadd.f32 %v1039_v15, %v1036_v14  ;;  %v960_v22 = vadd.f32 %v959_v25, %v957_v32  ;;  %v1047_v45 = vsub.f32 %v1046_v41, %v3559_v20  ;;  %v1656_v32 = vld [vmem:[#allocation4 + $0x2b8] sm:$0xff]  ;;  %v1651_v41 = vld [vmem:[#allocation4 + $0x290] sm:$0xff] }
 0x812   :  { %v3055_v24 = vpop.eup %3054  ;;  %v1083_v30 = vmul.f32 %v3053_v18, %v1069_v17  ;;  %v1063_v37 = vsub.f32 %v1059_v31, %v1062_v19  ;;  %1291 = vmatpush.msrb.mxu3 %v1267_v55  ;;  %v2940_v19 = vld [vmem:[%s4027_s5 + $0xb] ss:$0 sm:$0xff] }
 0x813   :  { %3056 = vlog2.f32 %v1040_v23  ;;  %v1056_v36 = vmul.f32 0.6931472, %v3055_v24  ;;  %v1005_v35 = vadd.f32 %v1004_v40, %v960_v22  ;;  %v1653_v22 = vld [vmem:[#allocation4 + $0x2a0] sm:$0xff]  ;;  %v1652_v40 = vld [vmem:[#allocation4 + $0x298] sm:$0xff] }
 0x814   :  { %v1084_v33 = vadd.f32 %v3045_v1, %v1083_v30  ;;  %v1064_v47 = vmul.f32 %v1063_v37, %v3484_v7  ;;  %v1231_v7 = vld [vmem:[#allocation4 + $0xa0] sm:$0xff] }
 0x815   :  { %v1057_v44 = vmul.f32 %v1056_v36, %v3528_v54  ;;  %1256 = vmatpush.msrb.mxu0 %v1231_v7  ;;  %v3586_v1 = vld [vmem:[%s4027_s5 + $0x2] ss:$0 sm:$0xff]  ;;  %v1655_v36 = vld [vmem:[#allocation4 + $0x2b0] sm:$0xff] }
 0x816   :  { %v1085_v42 = vadd.f32 1e-08, %v1084_v33 }
 0x817   :  { %v1065_v49 = vadd.f32 %v1064_v47, %v1057_v44  ;;  %1257 = vmatpush.msrb.mxu0 %v1230_v63  ;;  %v1648_v44 = vld [vmem:[#allocation4 + $0x278] sm:$0xff] }
 0x818   :  { %3058 = vlog2.f32 %v1085_v42  ;;  %v1650_v42 = vld [vmem:[#allocation4 + $0x288] sm:$0xff]  ;;  %v1644_v47 = vld [vmem:[#allocation4 + $0x258] sm:$0xff] }
 0x819   :  { %v3057_v43 = vpop.eup %3056  ;;  %3060 = vlog2.f32 %v1070_v39  ;;  %v1654_v39 = vld [vmem:[#allocation4 + $0x2a8] sm:$0xff] }
 0x81a   :  { %v1049_v46 = vmul.f32 0.6931472, %v3057_v43  ;;  %v1649_v43 = vld [vmem:[#allocation4 + $0x280] sm:$0xff] }
 0x81c   :  { %v1050_v58 = vadd.f32 %v1049_v46, %v1047_v45  ;;  %v1646_v45 = vld [vmem:[#allocation4 + $0x268] sm:$0xff]  ;;  %v1645_v46 = vld [vmem:[#allocation4 + $0x260] sm:$0xff] }
 0x81e   :  { %v3059_v2 = vpop.eup %3058  ;;  %v1051_v48 = vsub.f32 %v1005_v35, %v1050_v58  ;;  %v1647_v35 = vld [vmem:[#allocation4 + $0x270] sm:$0xff] }
 0x81f   :  { %v3061_v50 = vpop.eup %3060  ;;  %v1087_v52 = vmul.f32 0.6931472, %v3059_v2  ;;  %v1643_v58 = vld [vmem:[#allocation4 + $0x250] sm:$0xff]  ;;  %v1642_v2 = vld [vmem:[#allocation4 + $0x248] sm:$0xff] }
 0x820   :  { %v1066_v53 = vadd.f32 %v1065_v49, %v1051_v48  ;;  %v1072_v56 = vmul.f32 0.6931472, %v3061_v50  ;;  %v1641_v48 = vld [vmem:[#allocation4 + $0x240] sm:$0xff] }
 0x821   :  { %v1088_v59 = vsub.f32 0.0, %v1087_v52 }
 0x822   :  { %vm1067_vm8 = vcmp.ne.f32.partialorder %v1066_v53, %v1066_v53 }
 0x823   :  { %v1068_v60 = vsel %vm1067_vm8, inf, %v1066_v53 }
 0x824   :  { %v1073_v54 = vsub.f32 %v1068_v60, %v1072_v56 }
 0x826   :  { %v1090_v61 = vsel %vm1089_vm9, %v1088_v59, %v1073_v54 }
 0x827   :  { %v3575_v20 = vadd.f32 %v1091_v11, %v1090_v61 }
 0x865   :  { %v1222_v8 = vpop.f32.mrf.mxu1 }
 0x866   :  { %v1223_v10 = vadd.f32 %v3586_v1, %v1222_v8 }
 0x868   :  { %v1228_v12 = vmax.f32 %v1223_v10, 0.0 }
 0x86a   :  { %2847 = vmatmul.msk.f32.vlgmr.msrb.gmra.mxu0 %vm192_vm2, %v1228_v12 }
 0x890   :  { %v1145_v14 = vpop.f32.mrf.mxu3 }
 0x891   :  { %v1146_v15 = vadd.f32 %v3473_v57, %v1145_v14 }
 0x893   :  { %v1149_v38 = vmax.f32 %v1146_v15, 0.0 }
 0x895   :  { %2844 = vmatmul.msk.f32.gmra.mxu2 %vm115_vm1, %v1149_v38 }
 0x8e7   :  { %v1259_v34 = vpop.f32.mrf.mxu0 }
 0x8e8   :  { %v1260_v17 = vadd.f32 %v3595_v16, %v1259_v34 }
 0x8ea   :  { %v1265_v18 = vmax.f32 %v1260_v17, 0.0 }
 0x8ec   :  { %2849 = vmatmul.msk.f32.vlgmr.msrb.gmra.mxu3 %vm192_vm2, %v1265_v18 }
 0x918   :  { %v1186_v23 = vpop.f32.mrf.mxu2 }
 0x919   :  { %v1187_v24 = vadd.f32 %v3504_v27, %v1186_v23 }
 0x91b   :  { %v1190_v25 = vmax.f32 %v1187_v24, 0.0 }
 0x91d   :  { %2846 = vmatmul.msk.f32.gmra.mxu1 %vm73_vm0, %v1190_v25 }
 0x96f   :  { %v1293_v21 = vpop.f32.mrf.mxu3 }
 0x970   :  { %v3602_v57 = vadd.f32 %v2940_v19, %v1293_v21 }
 0x972   :  { %1362 = vrot.lane.b32.xlu0 %v3602_v57, %s3269_s30  ;;  %1364 = vrot.lane.b32.xlu1 %v3602_v57, %s3273_s12 }
 0x973   :  { %1297 = vrot.lane.b32.xlu2 %v3602_v57, %s3270_s9 }
 0x97a   :  { %1429 = vrot.lane.b32.xlu0 %v3602_v57, %s3271_s10  ;;  %1498 = vrot.lane.b32.xlu1 %v3602_v57, %s3268_s29 }
 0x97b   :  { %1431 = vrot.lane.b32.xlu2 %v3602_v57, %s3272_s11 }
 0x983   :  { %1496 = vrot.lane.b32.xlu2 %v3602_v57, %s3274_s13 }
 0x99a   :  { %v1225_v49 = vpop.f32.mrf.mxu1 }
 0x99b   :  { %v1226_v50 = vadd.f32 %v3586_v1, %v1225_v49 }
 0x99d   :  { %v1229_v52 = vmax.f32 %v1226_v50, 0.0 }
 0x99f   :  { %2848 = vmatmul.msk.f32.gmra.mxu0 %vm192_vm2, %v1229_v52 }
 0x9cd   :  { %v1298_v26 = vpop.permute.xlu2 %1297 }
 0x9ce   :  { %2850 = vmatpush.xpose.msk.msra.mxu3 %vm286_vm3, %v1298_v26 }
 0x9d1   :  { %2851 = vmatmul.msk.f32.vlgmr.msra.gmra.mxu3 %vm286_vm3, %v3602_v57 }
 0x9d5   :  { %v1432_v28 = vpop.permute.xlu2 %1431 }
 0x9d6   :  { %2856 = vmatpush.xpose.msk.msrb.mxu3 %vm286_vm3, %v1432_v28 }
 0x9dd   :  { %v1497_v37 = vpop.permute.xlu2 %1496 }
 0x9e4   :  { %v1363_v30 = vpop.permute.xlu0 %1362  ;;  %v1365_v31 = vpop.permute.xlu1 %1364 }
 0x9e5   :  { %2853 = vmatpush.xpose.msk.msrb.mxu1 %vm286_vm3, %v1365_v31 }
 0x9e8   :  { %2854 = vmatmul.msk.f32.vlgmr.msrb.gmra.mxu1 %vm286_vm3, %v1363_v30 }
 0x9ec   :  { %v1430_v27 = vpop.permute.xlu0 %1429  ;;  %v1499_v33 = vpop.permute.xlu1 %1498 }
 0x9ed   :  { %2857 = vmatmul.msk.f32.vlgmr.msrb.gmra.mxu3 %vm286_vm3, %v1430_v27  ;;  %2859 = vmatpush.xpose.msk.msra.mxu1 %vm286_vm3, %v1499_v33 }
 0x9f0   :  { %2860 = vmatmul.msk.f32.vlgmr.msra.gmra.mxu1 %vm286_vm3, %v1497_v37 }
 0x9f1   :  { %1659 = vmatpush.msrb.mxu1 %v1656_v32 }
 0x9f3   :  { %1660 = vmatpush.msrb.mxu1 %v1655_v36 }
 0x9f5   :  { %1661 = vmatpush.msrb.mxu1 %v1654_v39 }
 0x9f7   :  { %1662 = vmatpush.msrb.mxu1 %v1653_v22 }
 0x9f9   :  { %1663 = vmatpush.msrb.mxu1 %v1652_v40 }
 0x9fb   :  { %1664 = vmatpush.msrb.mxu1 %v1651_v41 }
 0x9fd   :  { %1665 = vmatpush.msrb.mxu1 %v1650_v42 }
 0x9ff   :  { %1666 = vmatpush.msrb.mxu1 %v1649_v43 }
 0xa01   :  { %1667 = vmatpush.msrb.mxu1 %v1648_v44  ;;  %v1695_v44 = vld [vmem:[#allocation4 + $0xd0] sm:$0xff] }
 0xa03   :  { %1668 = vmatpush.msrb.mxu1 %v1647_v35 }
 0xa05   :  { %1669 = vmatpush.msrb.mxu1 %v1646_v45  ;;  %v1694_v45 = vld [vmem:[#allocation4 + $0xc8] sm:$0xff] }
 0xa07   :  { %1670 = vmatpush.msrb.mxu1 %v1645_v46  ;;  %v1693_v46 = vld [vmem:[#allocation4 + $0xc0] sm:$0xff] }
 0xa09   :  { %1671 = vmatpush.msrb.mxu1 %v1644_v47  ;;  %v1692_v47 = vld [vmem:[#allocation4 + $0xb8] sm:$0xff] }
 0xa0b   :  { %1672 = vmatpush.msrb.mxu1 %v1643_v58 }
 0xa0d   :  { %1673 = vmatpush.msrb.mxu1 %v1642_v2 }
 0xa0f   :  { %1674 = vmatpush.msrb.mxu1 %v1641_v48 }
 0xa11   :  { %2878 = vmatpush.xpose.msk.msra.mxu1 %vm192_vm2, %v3431_v6 }
 0xa1c   :  { %v1262_v35 = vpop.f32.mrf.mxu0 }
 0xa54   :  { %v1320_v53 = vpop.f32.mrf.mxu3 }
 0xa55   :  { %v1323_v56 = vmul.f32 0.35355338, %v1320_v53 }
 0xa57   :  { %v1324_v59 = vadd.f32 %v1323_v56, %v3403_v9 }
 0xa59   :  { %v1325_v60 = vsel %vm286_vm3, %v1324_v59, -inf }
 0xa5a   :  { %1326 = vmax.xlane.f32.xlu0 %v1325_v60 }
 0xa65   :  { %v1387_v54 = vpop.f32.mrf.mxu1 }
 0xa66   :  { %v1390_v11 = vmul.f32 0.35355338, %v1387_v54  ;;  %v1581_v54 = vld [vmem:[#allocation4 + $0x218] sm:$0xff] }
 0xa67   :  { %1599 = vmatpush.msra.mxu3 %v1581_v54 }
 0xa68   :  { %v1391_v61 = vadd.f32 %v1390_v11, %v3403_v9  ;;  %v1580_v11 = vld [vmem:[#allocation4 + $0x210] sm:$0xff] }
 0xa69   :  { %1600 = vmatpush.msra.mxu3 %v1580_v11  ;;  %v2945_v11 = vld [vmem:[%s4027_s5 + $0x6] ss:$0 sm:$0xff] }
 0xa6a   :  { %v1392_v62 = vsel %vm286_vm3, %v1391_v61, -inf }
 0xa6b   :  { %1393 = vmax.xlane.f32.xlu1 %v1392_v62  ;;  %v1578_v62 = vld [vmem:[#allocation4 + $0x200] sm:$0xff] }
 0xa6d   :  { %v1521_v7 = vpop.f32.mrf.mxu1 }
 0xa6e   :  { %1403 = vrot.lane.b32.xlu0 %v3602_v57, %s3278_s2  ;;  %v1524_v63 = vmul.f32 0.35355338, %v1521_v7  ;;  %v1725_v7 = vld [vmem:[#allocation4 + $0xf0] sm:$0xff] }
 0xa70   :  { %v1454_v29 = vpop.f32.mrf.mxu3  ;;  %v1525_v0 = vadd.f32 %v1524_v63, %v3403_v9  ;;  %v1724_v63 = vld [vmem:[#allocation4 + $0xe8] sm:$0xff] }
 0xa71   :  { %v1457_v1 = vmul.f32 0.35355338, %v1454_v29  ;;  %v1723_v29 = vld [vmem:[#allocation4 + $0xe0] sm:$0xff] }
 0xa72   :  { %v1526_v8 = vsel %vm286_vm3, %v1525_v0, -inf }
 0xa73   :  { %1527 = vmax.xlane.f32.xlu2 %v1526_v8  ;;  %v1458_v10 = vadd.f32 %v1457_v1, %v3403_v9  ;;  %v1614_v1 = vld [vmem:[#allocation4 + $0x238] sm:$0xff]  ;;  %v1613_v8 = vld [vmem:[#allocation4 + $0x230] sm:$0xff] }
 0xa75   :  { %v1459_v12 = vsel %vm286_vm3, %v1458_v10, -inf }
 0xa76   :  { %1460 = vmax.xlane.f32.xlu1 %v1459_v12  ;;  %v1611_v12 = vld [vmem:[#allocation4 + $0x220] sm:$0xff] }
 0xacd   :  { %v1327_v13 = vpop.xlane.xlu0 %1326 }
 0xace   :  { %v1328_v51 = vsub.f32 %v1324_v59, %v1327_v13  ;;  %v1757_v13 = vld [vmem:[#allocation4 + $0x120] sm:$0xff] }
 0xad0   :  { %v1329_v55 = vmul.f32 1.442695, %v1328_v51  ;;  %v1756_v51 = vld [vmem:[#allocation4 + $0x118] sm:$0xff] }
 0xad2   :  { %3062 = vpow2.f32 %v1329_v55 }
 0xad8   :  { %v3063_v14 = vpop.eup %3062 }
 0xad9   :  { %v1331_v15 = vsel %vm286_vm3, %v3063_v14, 0.0 }
 0xada   :  { %1332 = vadd.xlane.f32.xlu2 %v1331_v15 }
 0xade   :  { %v1394_v38 = vpop.xlane.xlu1 %1393 }
 0xadf   :  { %v1395_v34 = vsub.f32 %v1391_v61, %v1394_v38  ;;  %v1579_v61 = vld [vmem:[#allocation4 + $0x208] sm:$0xff]  ;;  %v2941_v38 = vld [vmem:[%s4027_s5 + $0x4] ss:$0 sm:$0xff] }
 0xae0   :  { %v1404_v17 = vpop.permute.xlu0 %1403  ;;  %1601 = vmatpush.msra.mxu3 %v1579_v61 }
 0xae1   :  { %v1396_v18 = vmul.f32 1.442695, %v1395_v34  ;;  %1424 = vmatpush.msrb.mxu2 %v1404_v17 }
 0xae2   :  { %1602 = vmatpush.msra.mxu3 %v1578_v62 }
 0xae3   :  { %3064 = vpow2.f32 %v1396_v18  ;;  %v1822_v18 = vld [vmem:[#allocation4 + $0x188] sm:$0xff] }
 0xae4   :  { %1743 = vmatpush.msrb.mxu3 %v1725_v7 }
 0xae6   :  { %v1528_v19 = vpop.xlane.xlu2 %1527  ;;  %1744 = vmatpush.msrb.mxu3 %v1724_v63  ;;  %v1891_v63 = vld [vmem:[#allocation4 + $0x1d8] sm:$0xff] }
 0xae7   :  { %v1529_v21 = vsub.f32 %v1525_v0, %v1528_v19  ;;  %v1722_v0 = vld [vmem:[#allocation4 + $0xd8] sm:$0xff] }
 0xae8   :  { %1745 = vmatpush.msrb.mxu3 %v1723_v29  ;;  %v1890_v29 = vld [vmem:[#allocation4 + $0x1d0] sm:$0xff] }
 0xae9   :  { %v3065_v9 = vpop.eup %3064  ;;  %v1530_v23 = vmul.f32 1.442695, %v1529_v21  ;;  %v1461_v24 = vpop.xlane.xlu1 %1460 }
 0xaea   :  { %v1462_v25 = vsub.f32 %v1458_v10, %v1461_v24  ;;  %v1398_v26 = vsel %vm286_vm3, %v3065_v9, 0.0  ;;  %1746 = vmatpush.msrb.mxu3 %v1722_v0  ;;  %v1612_v10 = vld [vmem:[#allocation4 + $0x228] sm:$0xff]  ;;  %v1820_v24 = vld [vmem:[#allocation4 + $0x178] sm:$0xff] }
 0xaeb   :  { %3066 = vpow2.f32 %v1530_v23  ;;  %1399 = vadd.xlane.f32.xlu0 %v1398_v26  ;;  %v1889_v0 = vld [vmem:[#allocation4 + $0x1c8] sm:$0xff] }
 0xaec   :  { %v1463_v28 = vmul.f32 1.442695, %v1462_v25  ;;  %v1819_v25 = vld [vmem:[#allocation4 + $0x170] sm:$0xff] }
 0xaee   :  { %3068 = vpow2.f32 %v1463_v28  ;;  %v1818_v28 = vld [vmem:[#allocation4 + $0x168] sm:$0xff] }
 0xaf1   :  { %v3067_v30 = vpop.eup %3066 }
 0xaf2   :  { %v1532_v31 = vsel %vm286_vm3, %v3067_v30, 0.0 }
 0xaf3   :  { %1533 = vadd.xlane.f32.xlu1 %v1532_v31  ;;  %v1754_v31 = vld [vmem:[#allocation4 + $0x108] sm:$0xff] }
 0xaf4   :  { %v3069_v32 = vpop.eup %3068 }
 0xaf5   :  { %v1465_v27 = vsel %vm286_vm3, %v3069_v32, 0.0 }
 0xaf6   :  { %1466 = vadd.xlane.f32.xlu2 %v1465_v27  ;;  %v1752_v27 = vld [vmem:[#allocation4 + $0xf8] sm:$0xff] }
 0xaff   :  { %1470 = vrot.lane.b32.xlu0 %v3602_v57, %s3279_s4 }
 0xb0c   :  { %1336 = vrot.lane.b32.xlu1 %v3602_v57, %s3276_s15 }
 0xb0e   :  { %1537 = vrot.lane.b32.xlu2 %v3602_v57, %s3277_s16  ;;  %v1263_v57 = vadd.f32 %v3595_v16, %v1262_v35 }
 0xb10   :  { %v3656_v58 = vmax.f32 %v1263_v57, 0.0  ;;  %v1859_v57 = vld [vmem:[#allocation4 + $0x198] sm:$0xff] }
 0xb4d   :  { %v1333_v36 = vpop.xlane.xlu2 %1332 }
 0xb5e   :  { %v1400_v33 = vpop.xlane.xlu0 %1399 }
 0xb5f   :  { %3070 = vrcp.f32 %v1400_v33  ;;  %v1791_v33 = vld [vmem:[#allocation4 + $0x160] sm:$0xff] }
 0xb65   :  { %v3071_v37 = vpop.eup %3070 }
 0xb66   :  { %v1402_v39 = vmul.f32 %v3071_v37, %v3065_v9  ;;  %v1534_v22 = vpop.xlane.xlu1 %1533  ;;  %v1821_v9 = vld [vmem:[#allocation4 + $0x180] sm:$0xff] }
 0xb67   :  { %3072 = vrcp.f32 %v1534_v22 }
 0xb68   :  { %2855 = vmatmul.msk.f32.vlgmr.msrb.gmra.mxu2 %vm286_vm3, %v1402_v39  ;;  %3074 = vrcp.f32 %v1333_v36  ;;  %v2942_v36 = vld [vmem:[%s4027_s5 + $0xc] ss:$0 sm:$0xff] }
 0xb69   :  { %v1467_v40 = vpop.xlane.xlu2 %1466 }
 0xb6a   :  { %3076 = vrcp.f32 %v1467_v40 }
 0xb6d   :  { %v3073_v41 = vpop.eup %3072 }
 0xb6e   :  { %v1536_v42 = vmul.f32 %v3073_v41, %v3067_v30  ;;  %v3075_v2 = vpop.eup %3074  ;;  %v1755_v30 = vld [vmem:[#allocation4 + $0x110] sm:$0xff] }
 0xb6f   :  { %v1335_v48 = vmul.f32 %v3075_v2, %v3063_v14  ;;  %v1862_v41 = vld [vmem:[#allocation4 + $0x1b0] sm:$0xff]  ;;  %v1790_v2 = vld [vmem:[#allocation4 + $0x158] sm:$0xff] }
 0xb70   :  { %v3077_v16 = vpop.eup %3076 }
 0xb71   :  { %v1538_v43 = vpop.permute.xlu2 %1537  ;;  %v1471_v50 = vpop.permute.xlu0 %1470  ;;  %v1469_v52 = vmul.f32 %v3077_v16, %v3069_v32  ;;  %v1753_v32 = vld [vmem:[#allocation4 + $0x100] sm:$0xff]  ;;  %v1786_v16 = vld [vmem:[#allocation4 + $0x138] sm:$0xff] }
 0xb72   :  { %1558 = vmatpush.msra.mxu2 %v1538_v43  ;;  %v1861_v43 = vld [vmem:[#allocation4 + $0x1a8] sm:$0xff] }
 0xb73   :  { %2861 = vmatmul.msk.f32.vlgmr.msra.gmra.mxu2 %vm286_vm3, %v1536_v42  ;;  %v2943_v42 = vld [vmem:[%s4027_s5 + $0x5] ss:$0 sm:$0xff] }
 0xb74   :  { %1713 = vmatpush.msrb.mxu2 %v1695_v44 }
 0xb76   :  { %1714 = vmatpush.msrb.mxu2 %v1694_v45  ;;  %v1860_v45 = vld [vmem:[#allocation4 + $0x1a0] sm:$0xff] }
 0xb78   :  { %1715 = vmatpush.msrb.mxu2 %v1693_v46 }
 0xb7a   :  { %1716 = vmatpush.msrb.mxu2 %v1692_v47  ;;  %v1858_v47 = vld [vmem:[#allocation4 + $0x190] sm:$0xff] }
 0xb7b   :  { %2864 = vmatmul.msk.f32.vlgmr.msrb.gmra.mxu2 %vm192_vm2, %v3656_v58 }
 0xb7c   :  { %1805 = vmatpush.msra.mxu2 %v1791_v33 }
 0xb7e   :  { %v1337_v49 = vpop.permute.xlu1 %1336  ;;  %1806 = vmatpush.msra.mxu2 %v1790_v2 }
 0xb7f   :  { %1357 = vmatpush.msra.mxu0 %v1337_v49  ;;  %v1788_v49 = vld [vmem:[#allocation4 + $0x148] sm:$0xff] }
 0xb80   :  { %2852 = vmatmul.msk.f32.vlgmr.msra.gmra.mxu0 %vm286_vm3, %v1335_v48  ;;  %v1789_v48 = vld [vmem:[#allocation4 + $0x150] sm:$0xff] }
 0xb81   :  { %1491 = vmatpush.msrb.mxu0 %v1471_v50  ;;  %1807 = vmatpush.msra.mxu2 %v1789_v48  ;;  %v1787_v50 = vld [vmem:[#allocation4 + $0x140] sm:$0xff] }
 0xb83   :  { %1632 = vmatpush.msra.mxu0 %v1614_v1  ;;  %1808 = vmatpush.msra.mxu2 %v1788_v49  ;;  %v1888_v1 = vld [vmem:[#allocation4 + $0x1c0] sm:$0xff] }
 0xb85   :  { %1633 = vmatpush.msra.mxu0 %v1613_v8  ;;  %1809 = vmatpush.msra.mxu2 %v1787_v50  ;;  %v1887_v8 = vld [vmem:[#allocation4 + $0x1b8] sm:$0xff] }
 0xb87   :  { %1634 = vmatpush.msra.mxu0 %v1612_v10  ;;  %1810 = vmatpush.msra.mxu2 %v1786_v16 }
 0xb88   :  { %2858 = vmatmul.msk.f32.vlgmr.msrb.gmra.mxu0 %vm286_vm3, %v1469_v52  ;;  %v1785_v52 = vld [vmem:[#allocation4 + $0x130] sm:$0xff] }
 0xb89   :  { %1635 = vmatpush.msra.mxu0 %v1611_v12  ;;  %1811 = vmatpush.msra.mxu2 %v1785_v52 }
 0xb8b   :  { %1773 = vmatpush.msrb.mxu0 %v1757_v13 }
 0xb8d   :  { %1774 = vmatpush.msrb.mxu0 %v1756_v51 }
 0xb8f   :  { %1775 = vmatpush.msrb.mxu0 %v1755_v30 }
 0xb91   :  { %1776 = vmatpush.msrb.mxu0 %v1754_v31 }
 0xb93   :  { %1777 = vmatpush.msrb.mxu0 %v1753_v32 }
 0xb95   :  { %1778 = vmatpush.msrb.mxu0 %v1752_v27 }
 0xbeb   :  { %v1426_v53 = vpop.f32.mrf.mxu2 }
 0xbec   :  { %1564 = vrot.lane.b32.xlu0 %v1426_v53, %s3266_s14  ;;  %v1784_v53 = vld [vmem:[#allocation4 + $0x128] sm:$0xff] }
 0xbed   :  { %1812 = vmatpush.msra.mxu2 %v1784_v53 }
 0xbef   :  { %1905 = vmatpush.msrb.mxu2 %v1891_v63  ;;  %v3725_v63 = vld [vmem:[%s4029_s7] sm:$0xff] }
 0xbf1   :  { %1906 = vmatpush.msrb.mxu2 %v1890_v29 }
 0xbf3   :  { %1907 = vmatpush.msrb.mxu2 %v1889_v0 }
 0xbf5   :  { %1908 = vmatpush.msrb.mxu2 %v1888_v1 }
 0xbf6   :  { %v1560_v56 = vpop.f32.mrf.mxu2 }
 0xbf7   :  { %1572 = vrot.lane.b32.xlu2 %v1560_v56, %s3281_s18  ;;  %v2944_v56 = vld [vmem:[%s4027_s5 + $0xd] ss:$0 sm:$0xff]  ;;  %1909 = vmatpush.msrb.mxu2 %v1887_v8 }
 0xbfd   :  { %v1359_v59 = vpop.f32.mrf.mxu0 }
 0xbfe   :  { %v1718_v19 = vpop.f32.mrf.mxu2 }
 0xbff   :  { %v1719_v23 = vadd.f32 %v2941_v38, %v1718_v19 }
 0xc01   :  { %v1721_v26 = vmax.f32 %v1719_v23, 0.0 }
 0xc05   :  { %v1493_v60 = vpop.f32.mrf.mxu0 }
 0xc06   :  { %1568 = vrot.lane.b32.xlu1 %v1493_v60, %s3280_s17 }
 0xc51   :  { %v1573_v34 = vpop.permute.xlu2 %1572 }
 0xc5e   :  { %v1565_v55 = vpop.permute.xlu0 %1564 }
 0xc5f   :  { %v1575_v14 = vsel %vm286_vm3, %v1359_v59, %v1565_v55  ;;  %v2947_v55 = vld [vmem:[%s4027_s5 + $0x7] ss:$0 sm:$0xff] }
 0xc78   :  { %v1569_v15 = vpop.permute.xlu1 %1568 }
 0xc79   :  { %v1576_v17 = vsel %vm564_vm5, %v1575_v14, %v1569_v15 }
 0xc7a   :  { %v1577_v21 = vsel %vm566_vm6, %v1576_v17, %v1573_v34 }
 0xc7b   :  { %2862 = vmatmul.msk.f32.vlgmr.msra.gmra.mxu3 %vm192_vm2, %v1577_v21 }
 0xc7c   :  { %1839 = vmatpush.msra.mxu3 %v1822_v18 }
 0xc7e   :  { %1840 = vmatpush.msra.mxu3 %v1821_v9 }
 0xc80   :  { %1841 = vmatpush.msra.mxu3 %v1820_v24 }
 0xc82   :  { %1842 = vmatpush.msra.mxu3 %v1819_v25 }
 0xc83   :  { %2865 = vmatmul.msk.f32.vlgmr.msrb.gmra.mxu3 %vm192_vm2, %v1721_v26 }
 0xc84   :  { %1843 = vmatpush.msra.mxu3 %v1818_v28 }
 0xc86   :  { %2874 = vmatpush.xpose.msk.msrb.mxu3 %vm192_vm2, %v3656_v58 }
 0xcfe   :  { %v1604_v37 = vpop.f32.mrf.mxu3 }
 0xcff   :  { %v1605_v39 = vadd.f32 %v2942_v36, %v1604_v37 }
 0xd01   :  { %v1608_v22 = vrot.slane %v1605_v39, 4 }
 0xd03   :  { %v1610_v40 = vmax.f32 %v1605_v39, %v1608_v22 }
 0xd05   :  { %2863 = vmatmul.msk.f32.vlgmr.msra.gmra.mxu0 %vm192_vm2, %v1610_v40 }
 0xd06   :  { %1876 = vmatpush.msra.mxu0 %v1862_v41  ;;  %v1748_v44 = vpop.f32.mrf.mxu3 }
 0xd07   :  { %v1749_v35 = vadd.f32 %v2943_v42, %v1748_v44 }
 0xd08   :  { %1877 = vmatpush.msra.mxu0 %v1861_v43  ;;  %v3282_v43 = vmov 32.0  }
 0xd09   :  { %v1751_v46 = vmax.f32 %v1749_v35, 0.0 }
 0xd0a   :  { %1878 = vmatpush.msra.mxu0 %v1860_v45 }
 0xd0c   :  { %1879 = vmatpush.msra.mxu0 %v1859_v57 }
 0xd0d   :  { %2866 = vmatmul.msk.f32.vlgmr.msrb.gmra.mxu0 %vm73_vm0, %v1751_v46 }
 0xd0e   :  { %1880 = vmatpush.msra.mxu0 %v1858_v47 }
 0xd10   :  { %2876 = vmatpush.msk.msrb.mxu0 %vm675_vm10, %v3656_v58 }
 0xd82   :  { %v1637_v59 = vpop.f32.mrf.mxu0 }
 0xd83   :  { %v1638_v60 = vadd.f32 %v2944_v56, %v1637_v59 }
 0xd85   :  { %v1640_v54 = vmax.f32 %v1638_v60, 0.0 }
 0xd87   :  { %1675 = vmatmul.f32.vlgmr.msrb.gmra.mxu1 %v1640_v54 }
 0xd8a   :  { %v1780_v61 = vpop.f32.mrf.mxu0 }
 0xd8b   :  { %v1781_v62 = vadd.f32 %v2945_v11, %v1780_v61 }
 0xd8d   :  { %v1783_v7 = vmax.f32 %v1781_v62, 0.0 }
 0xd8f   :  { %2867 = vmatmul.msk.f32.vlgmr.msra.gmra.mxu2 %vm115_vm1, %v1783_v7  ;;  %2879 = vmatmul.msk.f32.vlgmr.msra.gmra.mxu1 %vm192_vm2, %v3656_v58 }
 0xe04   :  { %v3694_v10 = vpop.f32.mrf.mxu1 }
 0xe0c   :  { %v2245_v12 = vpop.f32.mrf.mxu1 }
 0xe0d   :  { %v2248_v13 = vmul.f32 0.17677669, %v2245_v12 }
 0xe0f   :  { %v2249_v51 = vsel %vm2156_vm11, %v2248_v13, -inf }
 0xe10   :  { %2250 = vmax.xlane.f32.xlu0 %v2249_v51  ;;  %v3731_v51 = vld [vmem:[%s4029_s7 + $0x8] sm:$0xf] }
 0xe12   :  { %v1814_v14 = vpop.f32.mrf.mxu2 }
 0xe13   :  { %v1815_v15 = vadd.f32 %v2947_v55, %v1814_v14 }
 0xe15   :  { %v1817_v38 = vmax.f32 %v1815_v15, 0.0  ;;  %v2951_v15 = vld [vmem:[%s4028_s6 + $0x2] ss:$0 sm:$0xff] }
 0xe17   :  { %2868 = vmatmul.msk.f32.vlgmr.msra.gmra.mxu3 %vm1118_vm7, %v1817_v38  ;;  %2869 = vmatmul.msk.f32.vlgmr.msra.gmra.mxu0 %vm1118_vm7, %v1817_v38 }
 0xe18   :  { %2870 = vmatmul.msk.f32.vlgmr.msrb.gmra.mxu2 %vm1118_vm7, %v1817_v38  ;;  %2880 = vmatpush.msk.msra.mxu3 %vm675_vm10, %v3431_v6 }
 0xe1f   :  { %2875 = vmatmul.msk.f32.vlgmr.msrb.gmra.mxu3 %vm192_vm2, %v3431_v6 }
 0xe83   :  { %v2251_v34 = vpop.xlane.xlu0 %2250 }
 0xe84   :  { %v2252_v17 = vsub.f32 %v2248_v13, %v2251_v34 }
 0xe86   :  { %v2253_v18 = vmul.f32 1.442695, %v2252_v17  ;;  %v2952_v17 = vld [vmem:[%s4028_s6 + $0x3] ss:$0 sm:$0xff] }
 0xe88   :  { %3078 = vpow2.f32 %v2253_v18 }
 0xe8e   :  { %v3079_v19 = vpop.eup %3078 }
 0xe8f   :  { %v2255_v21 = vsel %vm2156_vm11, %v3079_v19, 0.0 }
 0xe90   :  { %2256 = vadd.xlane.f32.xlu2 %v2255_v21 }
 0xe94   :  { %v3716_v46 = vpop.f32.mrf.mxu0 }
 0xe9a   :  { %v3708_v9 = vpop.f32.mrf.mxu3 }
 0xea2   :  { %v2152_v23 = vpop.f32.mrf.mxu3 }
 0xea3   :  { %v2155_v24 = vmul.f32 0.17677669, %v2152_v23 }
 0xea5   :  { %v2157_v25 = vsel %vm2156_vm11, %v2155_v24, -inf }
 0xea6   :  { %2158 = vmax.xlane.f32.xlu1 %v2157_v25 }
 0xf03   :  { %v2257_v26 = vpop.xlane.xlu2 %2256 }
 0xf04   :  { %3080 = vrcp.f32 %v2257_v26 }
 0xf0a   :  { %v3081_v28 = vpop.eup %3080 }
 0xf0b   :  { %v2259_v30 = vmul.f32 %v3081_v28, %v3079_v19 }
 0xf0d   :  { %2881 = vmatmul.msk.f32.vlgmr.msra.gmra.mxu3 %vm2168_vm12, %v2259_v30 }
 0xf19   :  { %v2159_v31 = vpop.xlane.xlu1 %2158 }
 0xf1a   :  { %v2160_v32 = vsub.f32 %v2155_v24, %v2159_v31 }
 0xf1c   :  { %v2161_v27 = vmul.f32 1.442695, %v2160_v32 }
 0xf1e   :  { %3082 = vpow2.f32 %v2161_v27 }
 0xf24   :  { %v3083_v33 = vpop.eup %3082 }
 0xf25   :  { %v2163_v36 = vsel %vm2156_vm11, %v3083_v33, 0.0 }
 0xf26   :  { %2164 = vadd.xlane.f32.xlu0 %v2163_v36 }
 0xf90   :  { %v2282_v37 = vpop.f32.mrf.mxu3 }
 0xf91   :  { %v2285_v39 = vadd.f32 %v2282_v37, %v3656_v58 }
 0xf93   :  { %v2286_v22 = vsel %vm671_vm13, %v2285_v39, 0.0 }
 0xf94   :  { %2287 = vadd.xlane.f32.xlu2 %v2286_v22 }
 0xf99   :  { %v2165_v40 = vpop.xlane.xlu0 %2164 }
 0xf9a   :  { %3084 = vrcp.f32 %v2165_v40 }
 0xf9b   :  { %3086 = vrcp.f32 %v3282_v43 }
 0xfa0   :  { %v3085_v41 = vpop.eup %3084 }
 0xfa1   :  { %v2167_v42 = vmul.f32 %v3085_v41, %v3083_v33  ;;  %v3087_v44 = vpop.eup %3086  ;;  %v2954_v41 = vld [vmem:[%s4028_s6 + $0x1] ss:$0 sm:$0xff] }
 0xfa2   :  { %v2199_v35 = vmul.f32 32.0, %v3087_v44  ;;  %vm2203_vm14 = vweird.f32 %v3087_v44 }
 0xfa3   :  { %2877 = vmatmul.msk.f32.vlgmr.msrb.gmra.mxu0 %vm2168_vm12, %v2167_v42 }
 0xfa4   :  { %v2200_v45 = vsub.f32 1.0, %v2199_v35 }
 0xfa6   :  { %v2201_v57 = vmul.f32 %v3087_v44, %v2200_v45 }
 0xfa8   :  { %v2202_v47 = vadd.f32 %v3087_v44, %v2201_v57  ;;  %v2126_v57 = vld [vmem:[%s4028_s6 + $0x40] sm:$0xff] }
 0xfa9   :  { %2520 = vmatpush.msrb.mxu3 %v2126_v57 }
 0xfaa   :  { %v2204_v2 = vsel %vm2203_vm14, %v3087_v44, %v2202_v47  ;;  %v2125_v47 = vld [vmem:[%s4028_s6 + $0x38] sm:$0xff]  ;;  %vm2627_vm14 = vcmask 15360  }
 0xfab   :  { %2521 = vmatpush.msrb.mxu3 %v2125_v47 }
 0xfac   :  { %2468 = vrot.lane.b32.xlu2 %v3725_v63, %s3283_s26 }
0x1007   :  { %v2288_v48 = vpop.xlane.xlu2 %2287 }
0x1008   :  { %v2289_v49 = vmul.f32 %v2288_v48, %v2204_v2 }
0x100a   :  { %v2290_v52 = vsub.f32 %v2285_v39, %v2289_v49  ;;  %v2953_v39 = vld [vmem:[%s4028_s6] ss:$0 sm:$0xff] }
0x100c   :  { %v2291_v56 = vmul.f32 %v2290_v52, %v2290_v52 }
0x100e   :  { %v2292_v59 = vsel %vm671_vm13, %v2291_v56, 0.0 }
0x100f   :  { %v2469_v24 = vpop.permute.xlu2 %2468 }
0x1020   :  { %v2191_v50 = vpop.f32.mrf.mxu0 }
0x1021   :  { %v2194_v16 = vadd.f32 %v2191_v50, %v3431_v6 }
0x1023   :  { %v2195_v53 = vsel %vm671_vm13, %v2194_v16, 0.0 }
0x1024   :  { %2196 = vadd.xlane.f32.xlu1 %v2195_v53 }
0x102c   :  { %2293 = vadd.xlane.f32.xlu1 %v2292_v59 }
0x1097   :  { %v2197_v60 = vpop.xlane.xlu1 %2196 }
0x1098   :  { %v2205_v54 = vmul.f32 %v2204_v2, %v2197_v60 }
0x109a   :  { %v2206_v11 = vsub.f32 %v2194_v16, %v2205_v54 }
0x109c   :  { %v2207_v61 = vmul.f32 %v2206_v11, %v2206_v11 }
0x109e   :  { %v2208_v62 = vsel %vm671_vm13, %v2207_v61, 0.0 }
0x109f   :  { %2209 = vadd.xlane.f32.xlu0 %v2208_v62  ;;  %v2294_v7 = vpop.xlane.xlu1 %2293 }
0x10a0   :  { %v2295_v29 = vmul.f32 %v2294_v7, %v2204_v2  ;;  %v2123_v7 = vld [vmem:[%s4028_s6 + $0x28] sm:$0xff] }
0x10a2   :  { %v2296_v0 = vadd.f32 1e-05, %v2295_v29 }
0x10a4   :  { %3088 = vrsqrt.f32 %v2296_v0  ;;  %vm2303_vm0 = vweird.f32 %v2296_v0 }
0x10aa   :  { %v3089_v1 = vpop.eup %3088 }
0x10ab   :  { %v2298_v8 = vmul.f32 %v3089_v1, %v2296_v0  ;;  %vm2304_vm15 = vweird.f32 %v3089_v1 }
0x10ac   :  { %vm2305_vm1 = vmor %vm2303_vm0, %vm2304_vm15  ;;  %vm2631_vm15 = vcmask 11264  }
0x10ad   :  { %v2299_v12 = vmul.f32 %v3089_v1, %v2298_v8  ;;  %v2122_v8 = vld [vmem:[%s4028_s6 + $0x20] sm:$0xff] }
0x10af   :  { %v2300_v13 = vmul.f32 0.5, %v2299_v12  ;;  %v2121_v12 = vld [vmem:[%s4028_s6 + $0x18] sm:$0xff] }
0x10b1   :  { %v2301_v55 = vsub.f32 1.5, %v2300_v13  ;;  %v2120_v13 = vld [vmem:[%s4028_s6 + $0x10] sm:$0xff] }
0x10b3   :  { %v2302_v14 = vmul.f32 %v3089_v1, %v2301_v55  ;;  %2470 = vrot.lane.b32.xlu0 %v3731_v51, %s3283_s26  ;;  %v2119_v55 = vld [vmem:[%s4028_s6 + $0x8] sm:$0xff] }
0x10b5   :  { %v2306_v38 = vsel %vm2305_vm1, %v3089_v1, %v2302_v14  ;;  %vm1093_vm1 = vcmask 388096  }
0x10b6   :  { %v2307_v34 = vmul.f32 %v2306_v38, %v2290_v52 }
0x10b8   :  { %v2309_v18 = vmul.f32 %v2951_v15, %v2307_v34 }
0x10ba   :  { %v3740_v19 = vadd.f32 %v2952_v17, %v2309_v18 }
0x10bc   :  { %2887 = vmatpush.msk.msrb.mxu1 %vm675_vm10, %v3740_v19  ;;  %v2331_v21 = vmul.f32 %v3740_v19, %v3740_v19 }
0x10bd   :  { %2888 = vmatmul.msk.f32.vlgmr.msrb.gmra.mxu1 %vm2168_vm12, %v2469_v24 }
0x10be   :  { %v2332_v23 = vsel %vm671_vm13, %v2331_v21, 0.0 }
0x10bf   :  { %2333 = vadd.xlane.f32.xlu1 %v2332_v23 }
0x1112   :  { %v2210_v25 = vpop.xlane.xlu0 %2209 }
0x1113   :  { %v2211_v26 = vmul.f32 %v2210_v25, %v2204_v2  ;;  %v2124_v2 = vld [vmem:[%s4028_s6 + $0x30] sm:$0xff] }
0x1114   :  { %2522 = vmatpush.msrb.mxu3 %v2124_v2 }
0x1115   :  { %v2212_v28 = vadd.f32 1e-05, %v2211_v26 }
0x1116   :  { %2523 = vmatpush.msrb.mxu3 %v2123_v7 }
0x1117   :  { %3090 = vrsqrt.f32 %v2212_v28  ;;  %vm2219_vm4 = vweird.f32 %v2212_v28 }
0x1118   :  { %2724 = vmatpush.msra.mxu3 %v2126_v57 }
0x111a   :  { %2725 = vmatpush.msra.mxu3 %v2125_v47 }
0x111c   :  { %2726 = vmatpush.msra.mxu3 %v2124_v2 }
0x111d   :  { %v3091_v30 = vpop.eup %3090 }
0x111e   :  { %v2214_v31 = vmul.f32 %v3091_v30, %v2212_v28  ;;  %vm2220_vm3 = vweird.f32 %v3091_v30  ;;  %2727 = vmatpush.msra.mxu3 %v2123_v7 }
0x111f   :  { %vm2221_vm5 = vmor %vm2219_vm4, %vm2220_vm3  ;;  %vm2098_vm4 = vcmask 322560  }
0x1120   :  { %v2215_v32 = vmul.f32 %v3091_v30, %v2214_v31 }
0x1122   :  { %v2216_v27 = vmul.f32 0.5, %v2215_v32  ;;  %v2130_v32 = vld [vmem:[%s4028_s6 + $0x60] sm:$0xff] }
0x1124   :  { %v2217_v33 = vsub.f32 1.5, %v2216_v27  ;;  %v2129_v27 = vld [vmem:[%s4028_s6 + $0x58] sm:$0xff] }
0x1125   :  { %v2471_v36 = vpop.permute.xlu0 %2470 }
0x1126   :  { %v2218_v37 = vmul.f32 %v3091_v30, %v2217_v33  ;;  %2889 = vmatmul.msk.f32.gmra.mxu1 %vm2168_vm12, %v2471_v36  ;;  %v2128_v33 = vld [vmem:[%s4028_s6 + $0x50] sm:$0xff]  ;;  %v2127_v36 = vld [vmem:[%s4028_s6 + $0x48] sm:$0xff] }
0x1128   :  { %v2222_v22 = vsel %vm2221_vm5, %v3091_v30, %v2218_v37  ;;  %v1911_v37 = vpop.f32.mrf.mxu2  ;;  %vm2408_vm5 = vcmp.eq.s32.totalorder %v3397_v3, %v3399_v4 }
0x1129   :  { %v2223_v40 = vmul.f32 %v2222_v22, %v2206_v11 }
0x112b   :  { %v2225_v42 = vmul.f32 %v2953_v39, %v2223_v40  ;;  %v2134_v39 = vld [vmem:[%s4028_s6 + $0x80] sm:$0xff] }
0x112c   :  { %2616 = vmatpush.msra.mxu1 %v2134_v39 }
0x112d   :  { %v3755_v43 = vadd.f32 %v2954_v41, %v2225_v42  ;;  %v2955_v41 = vld [vmem:[%s4028_s6 + $0x4] ss:$0 sm:$0xff] }
0x112f   :  { %2884 = vmatpush.msk.msra.mxu0 %vm675_vm10, %v3755_v43  ;;  %v2312_v44 = vmul.f32 %v3755_v43, %v3755_v43 }
0x1130   :  { %2885 = vmatmul.msk.f32.vlgmr.msra.gmra.mxu0 %vm2168_vm12, %v3725_v63 }
0x1131   :  { %v2313_v35 = vsel %vm671_vm13, %v2312_v44, 0.0  ;;  %2584 = vmatpush.msrb.mxu0 %v2130_v32 }
0x1132   :  { %2314 = vadd.xlane.f32.xlu1 %v2313_v35  ;;  %v2334_v45 = vpop.xlane.xlu1 %2333 }
0x1133   :  { %3092 = vrsqrt.f32 %v2334_v45  ;;  %vm2342_vm6 = vcmp.eq.f32.partialorder %v2334_v45, inf  ;;  %v2345_v59 = vand.u32 2147483648, %v2334_v45  ;;  %vm2344_vm7 = vcmp.eq.f32.partialorder %v2334_v45, 0.0  ;;  %2585 = vmatpush.msrb.mxu0 %v2129_v27 }
0x1135   :  { %2586 = vmatpush.msrb.mxu0 %v2128_v33 }
0x1137   :  { %2587 = vmatpush.msrb.mxu0 %v2127_v36 }
0x1138   :  { %2886 = vmatmul.msk.f32.gmra.mxu0 %vm2168_vm12, %v3731_v51 }
0x1139   :  { %v3093_v48 = vpop.eup %3092 }
0x113a   :  { %v2336_v49 = vmul.f32 %v3093_v48, %v2334_v45  ;;  %v2496_v29 = vpop.f32.mrf.mxu1 }
0x113b   :  { %2890 = vmatmul.msk.f32.vlgmr.msrb.gmra.mxu3 %vm192_vm2, %v2496_v29 }
0x113c   :  { %v2337_v50 = vmul.f32 %v3093_v48, %v2336_v49  ;;  %2771 = vmatpush.msrb.mxu3 %v2130_v32 }
0x113e   :  { %v2338_v16 = vmul.f32 0.5, %v2337_v50  ;;  %2772 = vmatpush.msrb.mxu3 %v2129_v27 }
0x1140   :  { %v2339_v52 = vsub.f32 1.5, %v2338_v16  ;;  %2773 = vmatpush.msrb.mxu3 %v2128_v33 }
0x1142   :  { %v2340_v53 = vmul.f32 %v3093_v48, %v2339_v52  ;;  %2774 = vmatpush.msrb.mxu3 %v2127_v36 }
0x1144   :  { %v2341_v56 = vmul.f32 %v2340_v53, %v2334_v45 }
0x1146   :  { %v2343_v60 = vsel %vm2342_vm6, %v2334_v45, %v2341_v56  ;;  %v2133_v56 = vld [vmem:[%s4028_s6 + $0x78] sm:$0xff]  ;;  %vm2780_vm6 = vcmp.eq.s32.totalorder %v3399_v4, 0 }
0x1147   :  { %v2346_v54 = vsel %vm2344_vm7, %v2345_v59, %v2343_v60  ;;  %2617 = vmatpush.msra.mxu1 %v2133_v56  ;;  %v2132_v59 = vld [vmem:[%s4028_s6 + $0x70] sm:$0xff]  ;;  %v2131_v60 = vld [vmem:[%s4028_s6 + $0x68] sm:$0xff]  ;;  %vm2785_vm7 = vcmp.eq.s32.totalorder %v3399_v4, 2 }
0x1148   :  { %v2347_v11 = vmax.f32 %v2346_v54, 1e-12  ;;  %v3837_v54 = vld [vmem:[%s4028_s6 + $0x5] ss:$0 sm:$0xff] }
0x1149   :  { %2618 = vmatpush.msra.mxu1 %v2132_v59 }
0x114a   :  { %3094 = vrcp.f32 %v2347_v11 }
0x114b   :  { %2619 = vmatpush.msra.mxu1 %v2131_v60 }
0x1150   :  { %v3095_v61 = vpop.eup %3094 }
0x1151   :  { %v2349_v62 = vmul.f32 %v3095_v61, %v3740_v19 }
0x1153   :  { %2882 = vmatpush.xpose.msk.msra.mxu2 %vm192_vm2, %v2349_v62 }
0x1157   :  { %2549 = vmatpush.msrb.mxu2 %v2122_v8 }
0x1159   :  { %2550 = vmatpush.msrb.mxu2 %v2121_v12 }
0x115b   :  { %2551 = vmatpush.msrb.mxu2 %v2120_v13 }
0x115d   :  { %2552 = vmatpush.msrb.mxu2 %v2119_v55 }
0x11a3   :  { %v2499_v0 = vpop.f32.mrf.mxu1 }
0x11a4   :  { %2891 = vmatmul.msk.f32.gmra.mxu3 %vm192_vm2, %v2499_v0 }
0x11a5   :  { %v2315_v1 = vpop.xlane.xlu1 %2314 }
0x11a6   :  { %3096 = vrsqrt.f32 %v2315_v1  ;;  %vm2323_vm8 = vcmp.eq.f32.partialorder %v2315_v1, inf  ;;  %v2326_v23 = vand.u32 2147483648, %v2315_v1  ;;  %vm2325_vm9 = vcmp.eq.f32.partialorder %v2315_v1, 0.0 }
0x11ac   :  { %v3097_v14 = vpop.eup %3096  ;;  %2898 = vmatmul.msk.f32.vlgmr.msra.gmra.mxu3 %vm192_vm2, %v3740_v19 }
0x11ad   :  { %v2317_v15 = vmul.f32 %v3097_v14, %v2315_v1  ;;  %v2462_v19 = vpop.f32.mrf.mxu0 }
0x11af   :  { %v2318_v38 = vmul.f32 %v3097_v14, %v2317_v15 }
0x11b1   :  { %v2319_v34 = vmul.f32 0.5, %v2318_v38 }
0x11b3   :  { %v2320_v17 = vsub.f32 1.5, %v2319_v34 }
0x11b5   :  { %v2321_v18 = vmul.f32 %v3097_v14, %v2320_v17  ;;  %v2465_v31 = vpop.f32.mrf.mxu0 }
0x11b7   :  { %v2322_v21 = vmul.f32 %v2321_v18, %v2315_v1 }
0x11b9   :  { %v2324_v24 = vsel %vm2323_vm8, %v2315_v1, %v2322_v21  ;;  %v2931_v1 = vld [vmem:[%s4025_s3 + $0xe] ss:$0 sm:$0xff]  ;;  %v2948_v21 = vld [vmem:[%s4027_s5 + $0x9] ss:$0 sm:$0xff]  ;;  %vm2788_vm8 = vcmp.eq.s32.totalorder %v3399_v4, 3 }
0x11ba   :  { %v2327_v25 = vsel %vm2325_vm9, %v2326_v23, %v2324_v24  ;;  %v1883_v24 = vadd.f32 %v2948_v21, %v3716_v46  ;;  %vm2791_vm9 = vcmp.eq.s32.totalorder %v3399_v4, 4 }
0x11bb   :  { %v2328_v26 = vmax.f32 %v2327_v25, 1e-12 }
0x11bd   :  { %3098 = vrcp.f32 %v2328_v26  ;;  %v1885_v26 = vmax.f32 %v1883_v24, 0.0001 }
0x11be   :  { %v2525_v40 = vpop.f32.mrf.mxu3 }
0x11c3   :  { %v3099_v28 = vpop.eup %3098 }
0x11c4   :  { %v2330_v30 = vmul.f32 %v3099_v28, %v3755_v43  ;;  %v1886_v28 = vmin.f32 %v1885_v26, 10000.0 }
0x11c6   :  { %2883 = vmatmul.msk.f32.vlgmr.msra.gmra.mxu2 %vm192_vm2, %v2330_v30  ;;  %v2949_v30 = vld [vmem:[%s4027_s5 + $0x8] ss:$0 sm:$0xff]  ;;  %v3875_v32 = vmin.f32 %v1886_v28, 1000000.0 }
0x11c7   :  { %2746 = vmatpush.msra.mxu2 %v2122_v8  ;;  %v2957_v8 = vld [vmem:[%s4028_s6 + $0x6] ss:$0 sm:$0xff]  ;;  %v1846_v27 = vadd.f32 %v2949_v30, %v3708_v9 }
0x11c8   :  { %v3882_v36 = vadd.f32 1e-08, %v3875_v32 }
0x11c9   :  { %2747 = vmatpush.msra.mxu2 %v2121_v12  ;;  %v667_v12 = vadd.f32 %v2931_v1, %v3581_v5 }
0x11ca   :  { %v3893_v9 = vadd.f32 -1.0, %v3882_v36 }
0x11cb   :  { %2748 = vmatpush.msra.mxu2 %v2120_v13  ;;  %v669_v14 = vsub.f32 %v667_v12, %v3431_v6  ;;  %v2950_v6 = vld [vmem:[%s4027_s5 + $0xa] ss:$0 sm:$0xff] }
0x11cc   :  { %v1912_v23 = vadd.f32 %v2950_v6, %v1911_v37  ;;  %v1848_v37 = vsub.f32 0.0, %v1846_v27  ;;  %v1932_v56 = vadd.f32 3.0, %v3893_v9 }
0x11cd   :  { %2749 = vmatpush.msra.mxu2 %v2119_v55  ;;  %v670_v38 = vmul.f32 %v669_v14, %v669_v14 }
0x11ce   :  { %2892 = vmatmul.msk.f32.vlgmr.msrb.gmra.mxu2 %vm192_vm2, %v2462_v19  ;;  %v1914_v25 = vmul.f32 1.442695, %v1912_v23 }
0x11cf   :  { %v672_v5 = vsel %vm671_vm13, %v670_v38, 0.0  ;;  %v1940_v38 = vadd.f32 5.0, %v3893_v9 }
0x11d0   :  { %3100 = vpow2.f32 %v1914_v25 }
0x11d6   :  { %2893 = vmatmul.msk.f32.gmra.mxu2 %vm192_vm2, %v2465_v31  ;;  %v3101_v19 = vpop.eup %3100  ;;  %v3873_v31 = vld [vmem:[%s4023_s1 + $0xc] sm:$0xf] }
0x11d7   :  { %v1916_v33 = vmax.f32 %v3101_v19, 1e-05  ;;  %v3879_v46 = vmax.f32 %v3873_v31, 0.0001  ;;  %v1944_v19 = vadd.f32 6.0, %v3893_v9 }
0x11d8   :  { %vm2094_vm3 = vcmp.lt.f32.partialorder %v3873_v31, 1e-08 }
0x11d9   :  { %v1917_v39 = vmin.f32 %v1916_v33, 1000000.0 }
0x11de   :  { %2899 = vmatmul.msk.f32.vlgmr.msra.gmra.mxu2 %vm192_vm2, %v3755_v43 }
0x1227   :  { %v2528_v45 = vpop.f32.mrf.mxu3 }
0x122f   :  { %v2729_v49 = vpop.f32.mrf.mxu3 }
0x1249   :  { %v3817_v22 = vpop.f32.mrf.mxu2 }
0x1251   :  { %v2554_v42 = vpop.f32.mrf.mxu2 }
0x1252   :  { %v2555_v43 = vadd.f32 %v2554_v42, %v2525_v40  ;;  %v1966_v40 = vadd.f32 1.0, %v3879_v46  ;;  %v1110_v42 = vld [vmem:[%s4023_s1 + $0x10] sm:$0xf] }
0x1254   :  { %v2561_v44 = vadd.f32 %v2955_v41, %v2555_v43  ;;  %v1849_v43 = vmul.f32 1.442695, %v1848_v37 }
0x1256   :  { %v2563_v35 = vmax.f32 %v2561_v44, 0.0  ;;  %v1918_v44 = vmul.f32 %v1917_v39, %v1110_v42  ;;  %3102 = vpow2.f32 %v1849_v43 }
0x1258   :  { %2894 = vmatmul.msk.f32.vlgmr.msrb.gmra.mxu0 %vm192_vm2, %v2563_v35  ;;  %v3895_v35 = vadd.f32 -1.0, %v1966_v40 }
0x1259   :  { %v2557_v57 = vpop.f32.mrf.mxu2 }
0x125a   :  { %v2558_v47 = vadd.f32 %v2557_v57, %v2528_v45  ;;  %v1924_v57 = vadd.f32 1.0, %v3893_v9  ;;  %v1976_v59 = vadd.f32 3.0, %v3895_v35  ;;  %v1988_v37 = vadd.f32 6.0, %v3895_v35 }
0x125c   :  { %v2562_v2 = vadd.f32 %v2955_v41, %v2558_v47  ;;  %v3899_v47 = vmax.f32 %v1918_v44, 0.0  ;;  %3104 = vrcp.f32 %v1924_v57 }
0x125e   :  { %v2564_v48 = vmax.f32 %v2562_v2, 0.0  ;;  %v1968_v2 = vadd.f32 1.0, %v3895_v35 }
0x1260   :  { %2895 = vmatmul.msk.f32.gmra.mxu0 %vm192_vm2, %v2564_v48  ;;  %3106 = vrcp.f32 %v1968_v2 }
0x1261   :  { %v2751_v50 = vpop.f32.mrf.mxu2 }
0x1262   :  { %v2752_v16 = vadd.f32 %v2751_v50, %v2729_v49  ;;  %v1972_v49 = vadd.f32 2.0, %v3895_v35  ;;  %v2079_v50 = vadd.f32 %v3875_v32, %v3899_v47 }
0x1264   :  { %v2754_v52 = vadd.f32 %v2955_v41, %v2752_v16  ;;  %v3887_v41 = vadd.f32 %v3875_v32, %v3879_v46  ;;  %3108 = vrcp.f32 %v1972_v49  ;;  %v2080_v60 = vadd.f32 1e-08, %v2079_v50 }
0x1265   :  { %v1948_v50 = vadd.f32 7.0, %v3893_v9 }
0x1266   :  { %v2755_v53 = vmax.f32 %v2754_v52, 0.0  ;;  %v2012_v45 = vadd.f32 1e-08, %v3887_v41  ;;  %v1928_v52 = vadd.f32 2.0, %v3893_v9 }
0x1268   :  { %2900 = vmatmul.msk.f32.vlgmr.msrb.gmra.mxu3 %vm192_vm2, %v2755_v53  ;;  %v3902_v48 = vadd.f32 -1.0, %v2012_v45  ;;  %v3103_v53 = vpop.eup %3102 }
0x126a   :  { %v2014_v16 = vadd.f32 1.0, %v3902_v48  ;;  %v2022_v14 = vadd.f32 3.0, %v3902_v48  ;;  %v2026_v28 = vadd.f32 4.0, %v3902_v48  ;;  %v2030_v57 = vadd.f32 5.0, %v3902_v48 }
0x126c   :  { %3110 = vrcp.f32 %v2014_v16 }
0x126d   :  { %3112 = vrcp.f32 %v1928_v52 }
0x126e   :  { %3114 = vrcp.f32 %v1932_v56  ;;  %v1952_v56 = vadd.f32 8.0, %v3893_v9 }
0x126f   :  { %3116 = vrcp.f32 %v1976_v59  ;;  %v1992_v59 = vadd.f32 7.0, %v3895_v35 }
0x1270   :  { %3118 = vrcp.f32 %v2080_v60 }
0x12d5   :  { %v2589_v11 = vpop.f32.mrf.mxu0 }
0x12d6   :  { %v2590_v61 = vadd.f32 %v3837_v54, %v2589_v11  ;;  %v3105_v11 = vpop.eup %3104 }
0x12d8   :  { %v2595_v62 = vmax.f32 %v2590_v61, 0.0  ;;  %v1851_v61 = vadd.f32 1.0, %v3103_v53 }
0x12da   :  { %2896 = vmatmul.msk.f32.vlgmr.msra.gmra.mxu1 %vm192_vm2, %v2595_v62  ;;  %v3107_v62 = vpop.eup %3106  ;;  %3120 = vrcp.f32 %v1851_v61 }
0x12db   :  { %v3109_v1 = vpop.eup %3108  ;;  %v1970_v12 = vmul.f32 676.5204, %v3107_v62 }
0x12dc   :  { %v1974_v23 = vmul.f32 -1259.1392, %v3109_v1 }
0x12dd   :  { %v2592_v7 = vpop.f32.mrf.mxu0  ;;  %v1971_v21 = vadd.f32 1.0, %v1970_v12 }
0x12de   :  { %v2593_v29 = vadd.f32 %v3837_v54, %v2592_v7  ;;  %v2018_v7 = vadd.f32 2.0, %v3902_v48 }
0x12df   :  { %v1975_v40 = vadd.f32 %v1974_v23, %v1971_v21  ;;  %v2038_v21 = vadd.f32 7.0, %v3902_v48 }
0x12e0   :  { %v2596_v0 = vmax.f32 %v2593_v29, 0.0  ;;  %v1926_v29 = vmul.f32 676.5204, %v3105_v11  ;;  %3122 = vrcp.f32 %v2018_v7 }
0x12e2   :  { %2897 = vmatmul.msk.f32.gmra.mxu1 %vm192_vm2, %v2596_v0  ;;  %v1980_v0 = vadd.f32 4.0, %v3895_v35 }
0x12e4   :  { %3124 = vrcp.f32 %v1980_v0  ;;  %v2034_v0 = vadd.f32 6.0, %v3902_v48 }
0x1357   :  { %v2621_v13 = vpop.f32.mrf.mxu1 }
0x1358   :  { %v3850_v55 = vadd.f32 %v2957_v8, %v2621_v13  ;;  %v3111_v13 = vpop.eup %3110 }
0x1359   :  { %v2016_v24 = vmul.f32 676.5204, %v3111_v13 }
0x135a   :  { %v2628_v15 = vsel %vm2627_vm14, %v3850_v55, -inf }
0x135b   :  { %2629 = vmax.xlane.f32.xlu0 %v2628_v15  ;;  %v3113_v15 = vpop.eup %3112  ;;  %v2017_v43 = vadd.f32 1.0, %v2016_v24 }
0x135c   :  { %v1930_v26 = vmul.f32 -1259.1392, %v3113_v15 }
0x135f   :  { %v2624_v34 = vpop.f32.mrf.mxu1 }
0x1360   :  { %v3855_v17 = vadd.f32 %v2957_v8, %v2624_v34  ;;  %v1936_v8 = vadd.f32 4.0, %v3893_v9  ;;  %v3115_v34 = vpop.eup %3114 }
0x1361   :  { %v3117_v6 = vpop.eup %3116  ;;  %v1934_v45 = vmul.f32 771.3234, %v3115_v34 }
0x1362   :  { %v2632_v18 = vsel %vm2631_vm15, %v3855_v17, -inf  ;;  %3126 = vrcp.f32 %v1936_v8  ;;  %v3119_v25 = vpop.eup %3118  ;;  %v1978_v42 = vmul.f32 771.3234, %v3117_v6 }
0x1363   :  { %2633 = vmax.xlane.f32.xlu1 %v2632_v18  ;;  %673 = vadd.xlane.f32.xlu0 %v672_v5  ;;  %v1927_v18 = vadd.f32 1.0, %v1926_v29  ;;  %v1984_v5 = vadd.f32 5.0, %v3895_v35  ;;  %3128 = vrcp.f32 %v2022_v14  ;;  %v3121_v30 = vpop.eup %3120  ;;  %v2082_v39 = vmul.f32 %v3119_v25, %v3875_v32 }
0x1364   :  { %3130 = vrcp.f32 %v1940_v38  ;;  %v3123_v27 = vpop.eup %3122  ;;  %v1853_v49 = vsub.f32 0.0, %v3121_v30  ;;  %v1979_v11 = vadd.f32 %v1978_v42, %v1975_v40  ;;  %v1996_v14 = vadd.f32 8.0, %v3895_v35 }
0x1365   :  { %v1931_v33 = vadd.f32 %v1930_v26, %v1927_v18  ;;  %3132 = vrcp.f32 %v1984_v5  ;;  %v3125_v44 = vpop.eup %3124  ;;  %v2020_v16 = vmul.f32 -1259.1392, %v3123_v27  ;;  %v3928_v27 = vadd.f32 0.5, %v1992_v59 }
0x1366   :  { %3134 = vrcp.f32 %v2026_v28  ;;  %v1982_v61 = vmul.f32 -176.61504, %v3125_v44  ;;  %v1854_v1 = vmul.f32 1.442695, %v1853_v49  ;;  %v2042_v42 = vadd.f32 8.0, %v3902_v48 }
0x1367   :  { %3136 = vrcp.f32 %v1944_v19  ;;  %v1935_v53 = vadd.f32 %v1934_v45, %v1931_v33  ;;  %v2021_v62 = vadd.f32 %v2020_v16, %v2017_v43  ;;  %v3931_v44 = vadd.f32 0.5, %v1948_v50 }
0x1368   :  { %v3127_v2 = vpop.eup %3126  ;;  %3138 = vrcp.f32 %v1988_v37  ;;  %v1983_v38 = vadd.f32 %v1982_v61, %v1979_v11  ;;  %v3936_v61 = vadd.f32 0.5, %v2038_v21 }
0x1369   :  { %v3129_v52 = vpop.eup %3128  ;;  %3140 = vlog2.f32 %v2082_v39  ;;  %v1938_v29 = vmul.f32 -176.61504, %v3127_v2 }
0x136a   :  { %v3131_v60 = vpop.eup %3130  ;;  %3142 = vrcp.f32 %v2030_v57  ;;  %v2024_v8 = vmul.f32 771.3234, %v3129_v52 }
0x136b   :  { %v3133_v7 = vpop.eup %3132  ;;  %3144 = vrcp.f32 %v1948_v50  ;;  %v1939_v13 = vadd.f32 %v1938_v29, %v1935_v53  ;;  %v1942_v6 = vmul.f32 12.507343, %v3131_v60 }
0x136c   :  { %v3135_v12 = vpop.eup %3134  ;;  %3146 = vrcp.f32 %v1992_v59  ;;  %v1986_v34 = vmul.f32 12.507343, %v3133_v7  ;;  %v2025_v18 = vadd.f32 %v2024_v8, %v2021_v62 }
0x136d   :  { %v3137_v15 = vpop.eup %3136  ;;  %3148 = vrcp.f32 %v1952_v56  ;;  %v2028_v24 = vmul.f32 -176.61504, %v3135_v12  ;;  %v1943_v26 = vadd.f32 %v1942_v6, %v1939_v13  ;;  %v2065_v6 = vadd.f32 1e-08, %v3899_v47 }
0x136e   :  { %v3139_v5 = vpop.eup %3138  ;;  %3150 = vrcp.f32 %v2034_v0  ;;  %v1987_v30 = vadd.f32 %v1986_v34, %v1983_v38  ;;  %v1946_v40 = vmul.f32 -0.1385711, %v3137_v15 }
0x136f   :  { %v3141_v23 = vpop.eup %3140  ;;  %3152 = vpow2.f32 %v1854_v1  ;;  %v1990_v19 = vmul.f32 -0.1385711, %v3139_v5  ;;  %v2029_v33 = vadd.f32 %v2028_v24, %v2025_v18 }
0x1370   :  { %v3143_v25 = vpop.eup %3142  ;;  %3154 = vrcp.f32 %v1996_v14  ;;  %v2084_v39 = vmul.f32 0.6931472, %v3141_v23  ;;  %v1947_v2 = vadd.f32 %v1946_v40, %v1943_v26  ;;  %v1957_v40 = vadd.f32 0.5, %v3893_v9 }
0x1371   :  { %v3145_v28 = vpop.eup %3144  ;;  %3156 = vrcp.f32 %v2038_v21  ;;  %v2032_v45 = vmul.f32 12.507343, %v3143_v25  ;;  %v1991_v16 = vadd.f32 %v1990_v19, %v1987_v30  ;;  %v2001_v21 = vadd.f32 0.5, %v3895_v35 }
0x1372   :  { %v3147_v37 = vpop.eup %3146  ;;  %3158 = vlog2.f32 %v3928_v27  ;;  %v1950_v59 = vmul.f32 9.984369e-06, %v3145_v28  ;;  %v2085_v60 = vmul.f32 %v2084_v39, %v3875_v32 }
0x1373   :  { %v3149_v43 = vpop.eup %3148  ;;  %v1994_v52 = vmul.f32 9.984369e-06, %v3147_v37  ;;  %v2033_v53 = vadd.f32 %v2032_v45, %v2029_v33  ;;  %3160 = vrcp.f32 %v2042_v42 }
0x1374   :  { %v3151_v57 = vpop.eup %3150  ;;  %3162 = vlog2.f32 %v3931_v44  ;;  %v1951_v7 = vadd.f32 %v1950_v59, %v1947_v2  ;;  %v1954_v8 = vmul.f32 1.5056327e-07, %v3149_v43  ;;  %v2086_v12 = vmul.f32 1.442695, %v2085_v60 }
0x1375   :  { %v3153_v49 = vpop.eup %3152  ;;  %v2036_v11 = vmul.f32 -0.1385711, %v3151_v57  ;;  %3164 = vrcp.f32 %v3882_v36  ;;  %v1995_v29 = vadd.f32 %v1994_v52, %v1991_v16 }
0x1376   :  { %v3155_v56 = vpop.eup %3154  ;;  %v1856_v62 = vadd.f32 1.0, %v3153_v49  ;;  %3166 = vlog2.f32 %v3936_v61  ;;  %v1955_v15 = vadd.f32 %v1954_v8, %v1951_v7  ;;  %v2047_v49 = vadd.f32 0.5, %v3902_v48 }
0x1377   :  { %v3157_v50 = vpop.eup %3156  ;;  %v1998_v0 = vmul.f32 1.5056327e-07, %v3155_v56  ;;  %v2037_v1 = vadd.f32 %v2036_v11, %v2033_v53 }
0x1378   :  { %v3159_v13 = vpop.eup %3158  ;;  %v2040_v14 = vmul.f32 9.984369e-06, %v3157_v50  ;;  %3168 = vrcp.f32 %v1856_v62 }
0x1379   :  { %v3161_v32 = vpop.eup %3160  ;;  %v1999_v34 = vadd.f32 %v1998_v0, %v1995_v29  ;;  %v2003_v23 = vmul.f32 0.6931472, %v3159_v13  ;;  %3170 = vpow2.f32 %v2086_v12 }
0x137a   :  { %v3163_v38 = vpop.eup %3162  ;;  %v2041_v18 = vadd.f32 %v2040_v14, %v2037_v1  ;;  %v2044_v26 = vmul.f32 1.5056327e-07, %v3161_v32  ;;  %3172 = vlog2.f32 %v1955_v15 }
0x137b   :  { %v3165_v5 = vpop.eup %3164  ;;  %v1959_v30 = vmul.f32 0.6931472, %v3163_v38  ;;  %3174 = vlog2.f32 %v1999_v34  ;;  %v2004_v35 = vmul.f32 %v2003_v23, %v2001_v21 }
0x137c   :  { %v2058_v24 = vmul.f32 %v3165_v5, %v3899_v47  ;;  %v3167_v19 = vpop.eup %3166  ;;  %v2045_v33 = vadd.f32 %v2044_v26, %v2041_v18  ;;  %3176 = vlog2.f32 %v2065_v6 }
0x137d   :  { %3178 = vlog2.f32 %v3882_v36  ;;  %v1960_v43 = vmul.f32 %v1959_v30, %v1957_v40  ;;  %v2049_v45 = vmul.f32 0.6931472, %v3167_v19  ;;  %v2005_v2 = vadd.f32 0.9189385, %v2004_v35 }
0x137e   :  { %v3944_v37 = vpop.eup %3168  ;;  %v2059_v42 = vadd.f32 1.0, %v2058_v24  ;;  %v3960_v30 = vmul.f32 2.0, %v3817_v22  ;;  %v1094_v22 = vsel %vm1093_vm1, %v3575_v20, 0.0 }
0x137f   :  { %v3171_v47 = vpop.eup %3170  ;;  %v1961_v59 = vadd.f32 0.9189385, %v1960_v43  ;;  %v2050_v36 = vmul.f32 %v2049_v45, %v2047_v49  ;;  %v2006_v7 = vsub.f32 %v2005_v2, %v3928_v27  ;;  %v2096_v45 = vmul.f32 %v3944_v37, %v3944_v37  ;;  %v2946_v49 = vld [vmem:[%s4027_s5 + $0xe] ss:$0 sm:$0xff] }
0x1380   :  { %v3173_v57 = vpop.eup %3172  ;;  %v2377_v40 = vsel %vm2156_vm11, %v3960_v30, -inf  ;;  %v1677_v31 = vadd.f32 %v2946_v49, %v3694_v10 }
0x1381   :  { %v3175_v16 = vpop.eup %3174  ;;  %v1964_v62 = vmul.f32 0.6931472, %v3173_v57  ;;  %v1962_v12 = vsub.f32 %v1961_v59, %v3931_v44 }
0x1382   :  { %v3177_v9 = vpop.eup %3176  ;;  %v2008_v29 = vmul.f32 0.6931472, %v3175_v16 }
0x1383   :  { %v3179_v60 = vpop.eup %3178  ;;  %v2067_v8 = vmul.f32 0.6931472, %v3177_v9  ;;  %v1965_v14 = vadd.f32 %v1964_v62, %v1962_v12 }
0x1384   :  { %v2009_v32 = vadd.f32 %v2008_v29, %v2006_v7  ;;  %v2064_v38 = vmul.f32 0.6931472, %v3179_v60  ;;  %v2389_v60 = vrot.slane %v2377_v40, 4 }
0x1386   :  { %v2068_v5 = vsub.f32 %v2064_v38, %v2067_v8  ;;  %v2010_v23 = vadd.f32 %v2009_v32, %v1965_v14 }
0x1388   :  { %v2069_v26 = vmul.f32 %v2068_v5, %v3879_v46 }
0x13ce   :  { %v2630_v25 = vpop.xlane.xlu0 %2629 }
0x13cf   :  { %v2635_v28 = vsub.f32 %v3850_v55, %v2630_v25  ;;  %v2074_v55 = vsub.f32 1.0, %v3944_v37 }
0x13d1   :  { %v2637_v39 = vmul.f32 1.442695, %v2635_v28  ;;  %v2088_v53 = vmul.f32 %v3171_v47, %v2074_v55  ;;  %v2075_v6 = vadd.f32 1e-08, %v2074_v55 }
0x13d3   :  { %3180 = vpow2.f32 %v2637_v39  ;;  %v2089_v48 = vadd.f32 %v3944_v37, %v2088_v53  ;;  %v1679_v53 = vsub.f32 %v1677_v31, %v3656_v58  ;;  %v2409_v58 = vsel %vm2408_vm5, %v3960_v30, 0.0 }
0x13d4   :  { %3182 = vlog2.f32 %v2045_v33 }
0x13d5   :  { %3184 = vlog2.f32 %v2059_v42  ;;  %v2090_v34 = vadd.f32 1e-08, %v2089_v48  ;;  %v1680_v9 = vmul.f32 %v1679_v53, %v1679_v53 }
0x13d6   :  { %v2634_v52 = vpop.xlane.xlu1 %2633  ;;  %v674_v32 = vpop.xlane.xlu0 %673 }
0x13d7   :  { %v2636_v56 = vsub.f32 %v3855_v17, %v2634_v52  ;;  %v2051_v17 = vadd.f32 0.9189385, %v2050_v36  ;;  %v1681_v36 = vsel %vm671_vm13, %v1680_v9, 0.0  ;;  %vm2782_vm13 = vcmp.eq.s32.totalorder %v3399_v4, 1 }
0x13d9   :  { %v3181_v11 = vpop.eup %3180  ;;  %v2639_v50 = vmul.f32 1.442695, %v2636_v56  ;;  %v2052_v27 = vsub.f32 %v2051_v17, %v3936_v61 }
0x13da   :  { %v3183_v0 = vpop.eup %3182  ;;  %v2641_v1 = vsel %vm2627_vm14, %v3181_v11, 0.0 }
0x13db   :  { %3186 = vpow2.f32 %v2639_v50  ;;  %2642 = vadd.xlane.f32.xlu1 %v2641_v1  ;;  %v3185_v13 = vpop.eup %3184  ;;  %v2054_v15 = vmul.f32 0.6931472, %v3183_v0  ;;  %v2410_v50 = vsel %vm2156_vm11, %v2409_v58, 0.0  ;;  %v676_v58 = vsel %vm675_vm10, %v674_v32, 0.0 }
0x13dc   :  { %v2061_v18 = vmul.f32 0.6931472, %v3185_v13  ;;  %3188 = vlog2.f32 %v2090_v34 }
0x13dd   :  { %v2055_v24 = vadd.f32 %v2054_v15, %v2052_v27  ;;  %3190 = vlog2.f32 %v2075_v6 }
0x13de   :  { %v2062_v44 = vmul.f32 %v2061_v18, %v3887_v41 }
0x13df   :  { %v2056_v28 = vsub.f32 %v2010_v23, %v2055_v24 }
0x13e0   :  { %v2070_v19 = vadd.f32 %v2069_v26, %v2062_v44 }
0x13e1   :  { %v3187_v21 = vpop.eup %3186 }
0x13e2   :  { %v2644_v25 = vsel %vm2631_vm15, %v3187_v21, 0.0  ;;  %v3189_v61 = vpop.eup %3188  ;;  %v2071_v33 = vadd.f32 %v2070_v19, %v2056_v28 }
0x13e3   :  { %2645 = vadd.xlane.f32.xlu2 %v2644_v25  ;;  %v3191_v39 = vpop.eup %3190  ;;  %v2092_v35 = vmul.f32 0.6931472, %v3189_v61 }
0x13e4   :  { %vm2072_vm0 = vcmp.ne.f32.partialorder %v2071_v33, %v2071_v33  ;;  %v2077_v42 = vmul.f32 0.6931472, %v3191_v39 }
0x13e5   :  { %v2093_v41 = vsub.f32 0.0, %v2092_v35  ;;  %v2073_v47 = vsel %vm2072_vm0, inf, %v2071_v33 }
0x13e6   :  { %v2078_v46 = vsub.f32 %v2073_v47, %v2077_v42 }
0x13e8   :  { %v2095_v43 = vsel %vm2094_vm3, %v2093_v41, %v2078_v46 }
0x13e9   :  { %v2097_v55 = vadd.f32 %v2096_v45, %v2095_v43 }
0x13eb   :  { %2378 = vmax.xlane.f32.xlu2 %v2377_v40  ;;  %v2099_v57 = vsel %vm2098_vm4, %v2097_v55, 0.0 }
0x13f3   :  { %1095 = vadd.xlane.f32.xlu2 %v1094_v22 }
0x13fb   :  { %2100 = vadd.xlane.f32.xlu2 %v2099_v57 }
0x144e   :  { %v2643_v2 = vpop.xlane.xlu1 %2642 }
0x144f   :  { %3192 = vrcp.f32 %v2643_v2 }
0x1455   :  { %v3193_v16 = vpop.eup %3192 }
0x1456   :  { %v2646_v52 = vpop.xlane.xlu2 %2645  ;;  %v2649_v20 = vmul.f32 %v3193_v16, %v3181_v11  ;;  %v2390_v11 = vmax.f32 %v2377_v40, %v2389_v60 }
0x1457   :  { %3194 = vrcp.f32 %v2646_v52 }
0x1458   :  { %2677 = vrot.lane.b32.xlu1 %v2649_v20, %s3266_s14  ;;  %v2651_v37 = vsel %vm2627_vm14, %v2649_v20, -inf  ;;  %v2391_v62 = vrot.slane %v2390_v11, 2 }
0x1459   :  { %2652 = vmax.xlane.f32.xlu0 %v2651_v37 }
0x145a   :  { %v2392_v7 = vmax.f32 %v2390_v11, %v2391_v62 }
0x145c   :  { %v2393_v29 = vrot.slane %v2392_v7, 1 }
0x145d   :  { %v3195_v56 = vpop.eup %3194 }
0x145e   :  { %v2650_v59 = vmul.f32 %v3195_v56, %v3187_v21  ;;  %v2394_v0 = vmax.f32 %v2392_v7, %v2393_v29  ;;  %v2379_v19 = vpop.xlane.xlu2 %2378 }
0x145f   :  { %v2380_v61 = vsub.f32 %v3960_v30, %v2379_v19 }
0x1460   :  { %2679 = vrot.lane.b32.xlu1 %v2650_v59, %s3266_s14  ;;  %v2654_v10 = vsel %vm2631_vm15, %v2650_v59, -inf  ;;  %v2395_v1 = vsub.f32 %v3960_v30, %v2394_v0 }
0x1461   :  { %1682 = vadd.xlane.f32.xlu0 %v1681_v36  ;;  %v2381_v33 = vmul.f32 1.442695, %v2380_v61 }
0x1462   :  { %v2396_v48 = vmul.f32 1.442695, %v2395_v1 }
0x1464   :  { %3196 = vpow2.f32 %v2396_v48  ;;  %v677_v48 = vrot.slane %v676_v58, 4 }
0x1466   :  { %v1096_v46 = vpop.xlane.xlu2 %1095 }
0x146a   :  { %v3197_v8 = vpop.eup %3196 }
0x146b   :  { %v2398_v12 = vsel %vm2156_vm11, %v3197_v8, 0.0 }
0x146c   :  { %v2399_v17 = vrot.slane %v2398_v12, 4 }
0x146e   :  { %v2400_v13 = vadd.f32 %v2399_v17, %v2398_v12  ;;  %v2101_v22 = vpop.xlane.xlu2 %2100 }
0x146f   :  { %v2102_v52 = vsel %vm675_vm10, %v2101_v22, 0.0 }
0x1470   :  { %v2401_v3 = vrot.slane %v2400_v13, 2  ;;  %v2103_v37 = vrot.slane %v2102_v52, 4 }
0x1472   :  { %v2402_v14 = vadd.f32 %v2401_v3, %v2400_v13  ;;  %v2104_v36 = vadd.f32 %v2103_v37, %v2102_v52 }
0x1474   :  { %v2403_v15 = vrot.slane %v2402_v14, 1  ;;  %v2105_v11 = vrot.slane %v2104_v36, 2 }
0x1476   :  { %v2404_v18 = vadd.f32 %v2403_v15, %v2402_v14  ;;  %v2106_v8 = vadd.f32 %v2105_v11, %v2104_v36  ;;  %v678_v14 = vadd.f32 %v677_v48, %v676_v58  ;;  %v2776_v58 = vpop.f32.mrf.mxu3 }
0x1478   :  { %3198 = vlog2.f32 %v2404_v18  ;;  %v2107_v15 = vrot.slane %v2106_v8, 1 }
0x147e   :  { %v3199_v24 = vpop.eup %3198 }
0x148a   :  { %2655 = vmax.xlane.f32.xlu1 %v2654_v10 }
0x1492   :  { %2411 = vadd.xlane.f32.xlu1 %v2410_v50 }
0x14ca   :  { %v2678_v38 = vpop.permute.xlu1 %2677 }
0x14cb   :  { %v2683_v34 = vmul.f32 %v2678_v38, %v3725_v63  ;;  %v2406_v63 = vmul.f32 0.6931472, %v3199_v24  ;;  %v2108_v24 = vadd.f32 %v2107_v15, %v2106_v8 }
0x14cc   :  { %v3985_v27 = vpop.xlane.xlu0 %2652 }
0x14cd   :  { %v2657_v5 = vsub.f32 %v2649_v20, %v3985_v27  ;;  %2687 = vrot.lane.b32.xlu2 %v2683_v34, %s3269_s30  ;;  %v2407_v26 = vadd.f32 %v2406_v63, %v2394_v0  ;;  %v1097_v20 = vsel %vm675_vm10, %v1096_v46, 0.0 }
0x14ce   :  { %v1098_v56 = vrot.slane %v1097_v20, 4 }
0x14cf   :  { %v2659_v6 = vmul.f32 1.442695, %v2657_v5  ;;  %v2420_v28 = vsel %vm2168_vm12, %v2407_v26, 0.0 }
0x14d0   :  { %v1099_v10 = vadd.f32 %v1098_v56, %v1097_v20 }
0x14d1   :  { %3200 = vpow2.f32 %v2659_v6 }
0x14d2   :  { %v2680_v21 = vpop.permute.xlu1 %2679  ;;  %3202 = vpow2.f32 %v2381_v33  ;;  %v1100_v29 = vrot.slane %v1099_v10, 2  ;;  %v2109_v33 = vmul.f32 0.00625, %v2108_v24 }
0x14d3   :  { %v2684_v23 = vmul.f32 %v2680_v21, %v3731_v51 }
0x14d4   :  { %v1683_v45 = vpop.xlane.xlu0 %1682  ;;  %v1101_v13 = vadd.f32 %v1100_v29, %v1099_v10 }
0x14d5   :  { %2689 = vrot.lane.b32.xlu0 %v2684_v23, %s3269_s30  ;;  %v1684_v50 = vsel %vm675_vm10, %v1683_v45, 0.0  ;;  %v679_v23 = vrot.slane %v678_v14, 2 }
0x14d6   :  { %v1685_v12 = vrot.slane %v1684_v50, 4  ;;  %v1102_v18 = vrot.slane %v1101_v13, 1 }
0x14d7   :  { %v3201_v25 = vpop.eup %3200  ;;  %v680_v61 = vadd.f32 %v679_v23, %v678_v14 }
0x14d8   :  { %v2663_v44 = vsel %vm2627_vm14, %v3201_v25, 0.0  ;;  %v3203_v39 = vpop.eup %3202  ;;  %v1686_v32 = vadd.f32 %v1685_v12, %v1684_v50  ;;  %v1103_v26 = vadd.f32 %v1102_v18, %v1101_v13 }
0x14d9   :  { %2664 = vadd.xlane.f32.xlu1 %v2663_v44  ;;  %v2383_v35 = vsel %vm2156_vm11, %v3203_v39, 0.0  ;;  %v681_v22 = vrot.slane %v680_v61, 1  ;;  %vm2110_vm11 = vcmp.ne.f32.partialorder %v2109_v33, %v2109_v33 }
0x14da   :  { %v1687_v25 = vrot.slane %v1686_v32, 2 }
0x14dc   :  { %v1688_v39 = vadd.f32 %v1687_v25, %v1686_v32 }
0x14e1   :  { %2421 = vadd.xlane.f32.xlu1 %v2420_v28 }
0x14fd   :  { %v3994_v40 = vpop.xlane.xlu1 %2655 }
0x14fe   :  { %v2658_v51 = vsub.f32 %v2650_v59, %v3994_v40 }
0x14ff   :  { %2384 = vadd.xlane.f32.xlu0 %v2383_v35 }
0x1500   :  { %v2661_v42 = vmul.f32 1.442695, %v2658_v51 }
0x1502   :  { %3204 = vpow2.f32 %v2661_v42  ;;  %v1104_v42 = vmul.f32 0.0052083335, %v1103_v26 }
0x1504   :  { %vm1105_vm12 = vcmp.ne.f32.partialorder %v1104_v42, %v1104_v42 }
0x1505   :  { %v2412_v31 = vpop.xlane.xlu1 %2411 }
0x1506   :  { %v2425_v62 = vsel %vm675_vm10, %v2412_v31, 0.0  ;;  %v682_v31 = vadd.f32 %v681_v22, %v680_v61 }
0x1507   :  { %v2426_v17 = vrot.slane %v2425_v62, 4 }
0x1508   :  { %v3205_v41 = vpop.eup %3204  ;;  %v683_v56 = vmul.f32 0.0078125, %v682_v31 }
0x1509   :  { %v2666_v47 = vsel %vm2631_vm15, %v3205_v41, 0.0  ;;  %v2427_v38 = vadd.f32 %v2426_v17, %v2425_v62 }
0x150a   :  { %2667 = vadd.xlane.f32.xlu2 %v2666_v47  ;;  %v2786_v29 = vsel %vm2785_vm7, %v683_v56, 0.0 }
0x150b   :  { %v2428_v44 = vrot.slane %v2427_v38, 2 }
0x150d   :  { %v2429_v51 = vadd.f32 %v2428_v44, %v2427_v38 }
0x150f   :  { %v2430_v45 = vrot.slane %v2429_v51, 1 }
0x1511   :  { %v2431_v52 = vadd.f32 %v2430_v45, %v2429_v51 }
0x1513   :  { %v2432_v10 = vmul.f32 0.25, %v2431_v52 }
0x1527   :  { %v2688_v43 = vpop.permute.xlu2 %2687 }
0x1528   :  { %v2693_v30 = vsel %vm2627_vm14, %v2688_v43, 0.0  ;;  %vm2794_vm14 = vcmp.eq.s32.totalorder %v3399_v4, 5 }
0x1529   :  { %2694 = vadd.xlane.f32.xlu1 %v2693_v30  ;;  %v1689_v30 = vrot.slane %v1688_v39, 1 }
0x1547   :  { %v2690_v55 = vpop.permute.xlu0 %2689 }
0x1548   :  { %v2696_v57 = vsel %vm2631_vm15, %v2690_v55, 0.0  ;;  %vm2799_vm15 = vcmask 1044480  }
0x1549   :  { %2697 = vadd.xlane.f32.xlu1 %v2696_v57 }
0x154c   :  { %v2665_v9 = vpop.xlane.xlu1 %2664 }
0x1554   :  { %v2422_v0 = vpop.xlane.xlu1 %2421 }
0x1572   :  { %v2385_v2 = vpop.xlane.xlu0 %2384 }
0x1573   :  { %3206 = vlog2.f32 %v2385_v2 }
0x1579   :  { %v3207_v49 = vpop.eup %3206 }
0x157a   :  { %v2387_v16 = vmul.f32 0.6931472, %v3207_v49 }
0x157c   :  { %v2388_v53 = vadd.f32 %v2387_v16, %v2379_v19  ;;  %v1690_v16 = vadd.f32 %v1689_v30, %v1688_v39 }
0x157d   :  { %v2668_v7 = vpop.xlane.xlu2 %2667 }
0x157e   :  { %v2413_v59 = vsel %vm675_vm10, %v2388_v53, 0.0  ;;  %3208 = vlog2.f32 %v2668_v7  ;;  %v1691_v36 = vmul.f32 0.0078125, %v1690_v16  ;;  %v2777_v7 = vadd.f32 %v3837_v54, %v2776_v58 }
0x157f   :  { %v2414_v60 = vrot.slane %v2413_v59, 4  ;;  %3210 = vlog2.f32 %v2665_v9 }
0x1580   :  { %v2779_v13 = vmax.f32 %v2777_v7, 0.0 }
0x1581   :  { %v2415_v1 = vadd.f32 %v2414_v60, %v2413_v59 }
0x1582   :  { %v2797_v38 = vsel %vm192_vm2, %v2779_v13, 0.0 }
0x1583   :  { %v2416_v3 = vrot.slane %v2415_v1, 2 }
0x1584   :  { %v3209_v34 = vpop.eup %3208 }
0x1585   :  { %v2417_v5 = vadd.f32 %v2416_v3, %v2415_v1  ;;  %v3211_v21 = vpop.eup %3210  ;;  %v2672_v63 = vmul.f32 0.6931472, %v3209_v34 }
0x1586   :  { %v2670_v28 = vmul.f32 0.6931472, %v3211_v21 }
0x1587   :  { %v2418_v19 = vrot.slane %v2417_v5, 1  ;;  %v2674_v35 = vadd.f32 %v2672_v63, %v3994_v40  ;;  %v2111_v40 = vsel %vm2110_vm11, inf, %v2109_v33 }
0x1588   :  { %v2673_v47 = vadd.f32 %v2670_v28, %v3985_v27  ;;  %v1106_v27 = vsel %vm1105_vm12, inf, %v1104_v42  ;;  %v2783_v53 = vsel %vm2782_vm13, %v2111_v40, 0.0 }
0x1589   :  { %v2419_v41 = vadd.f32 %v2418_v19, %v2417_v5  ;;  %v2781_v59 = vsel %vm2780_vm6, %v1106_v27, 0.0 }
0x158a   :  { %v2784_v11 = vadd.f32 %v2783_v53, %v2781_v59 }
0x158b   :  { %v2423_v2 = vadd.f32 %v2422_v0, %v2419_v41  ;;  %v2789_v0 = vsel %vm2788_vm8, %v1691_v36, 0.0 }
0x158c   :  { %v2787_v48 = vadd.f32 %v2786_v29, %v2784_v11 }
0x158d   :  { %v2424_v37 = vmul.f32 0.125, %v2423_v2 }
0x158e   :  { %v2790_v17 = vadd.f32 %v2789_v0, %v2787_v48 }
0x158f   :  { %v2433_v50 = vsub.f32 %v2424_v37, %v2432_v10 }
0x1591   :  { %v2792_v8 = vsel %vm2791_vm9, %v2433_v50, 0.0 }
0x1592   :  { %v2793_v14 = vadd.f32 %v2792_v8, %v2790_v17 }
0x159c   :  { %v2695_v6 = vpop.xlane.xlu1 %2694 }
0x159d   :  { %v2699_v55 = vsub.f32 %v2673_v47, %v2695_v6 }
0x15bc   :  { %v2698_v46 = vpop.xlane.xlu1 %2697 }
0x15bd   :  { %v2700_v43 = vsub.f32 %v2674_v35, %v2698_v46 }
0x15bf   :  { %v2701_v57 = vsel %vm675_vm10, %v2700_v43, 0.0 }
0x15c0   :  { %v2702_v49 = vadd.f32 %v2701_v57, %v2699_v55 }
0x15c2   :  { %v2703_v20 = vrot.slane %v2702_v49, 4 }
0x15c4   :  { %v2704_v9 = vadd.f32 %v2703_v20, %v2702_v49 }
0x15c6   :  { %v2705_v60 = vrot.slane %v2704_v9, 2 }
0x15c8   :  { %v2706_v62 = vadd.f32 %v2705_v60, %v2704_v9 }
0x15ca   :  { %v2707_v1 = vrot.slane %v2706_v62, 1 }
0x15cc   :  { %v2708_v12 = vadd.f32 %v2707_v1, %v2706_v62 }
0x15ce   :  { %v2709_v3 = vmul.f32 0.083333336, %v2708_v12 }
0x15d0   :  { %v2795_v15 = vsel %vm2794_vm14, %v2709_v3, 0.0 }
0x15d1   :  { %v2796_v32 = vadd.f32 %v2795_v15, %v2793_v14 }
0x15d3   :  { %v2798_v34 = vsel %vm675_vm10, %v2797_v38, %v2796_v32 }
0x15d4   :  { %v2800_v54 = vsel %vm2799_vm15, %v2798_v34, 0.0 }
0x15d5   :  { %2801 = vst [vmem:[%s4030_s8] sm:$0xff] %v2800_v54 }
0x15d6   :  { %2806 = vsyncpa [#allocation3], 1 }
0x15d7   :  { %2807 = vsyncpa [#allocation5], 1 }

</bundles_post_ra>
